<compile_context>
chip_gen: v6e
topology: v6e:2x2x1
jax: 0.10.0
libtpu: 0.0.40
codegen_flags: <defaults>
</compile_context>

<pallas_src>
import jax
import jax.numpy as jnp
from jax.experimental import pallas as pl
from jax.experimental.pallas import tpu as pltpu

EPS = 1e-5

# ------------------------- small-model config (synthetic) -------------------
GROWTH = 8                  # growth_rate
BLOCK_CONFIG = (2, 2)       # block_config
NUM_INIT_FEATURES = 16      # num_init_features (== channels entering features)
BN_SIZE = 2                 # bn_size
NUM_CLASSES = 10            # num_classes (classifier; unused in eval forward)
N, H, W = 2, 8, 8           # batch / spatial
MID = BN_SIZE * GROWTH      # bottleneck width of every dense layer


def _block_dims():
    """Per dense block: (h, w, c_in, c_out). Also returns final (c, h, w)."""
    dims = []
    c, h, w = NUM_INIT_FEATURES, H, W
    for bi, nl in enumerate(BLOCK_CONFIG):
        c_out = c + nl * GROWTH
        dims.append((h, w, c, c_out))
        c = c_out
        if bi != len(BLOCK_CONFIG) - 1:
            c //= 2
            h //= 2
            w //= 2
    return dims, c, h, w


# ------------------------------ fused kernel ---------------------------------

def _make_fused_kernel(n_params, dims):
    n_blocks = len(dims)

    def kernel(*args):
        f32, bf16 = jnp.float32, jnp.bfloat16
        it = iter(args[:1 + n_params])          # x_ref + parameter refs (in order)
        x_ref = next(it)
        out_ref = args[1 + n_params]
        scratch = args[2 + n_params:]
        acts = [scratch[2 * i] for i in range(n_blocks)]      # activation slabs
        pads = [scratch[2 * i + 1] for i in range(n_blocks)]  # 3x3-conv padding
        patch = scratch[-1]                                   # im2col buffer

        # Zero the conv-padding buffers once per image; the interior is fully
        # rewritten by every layer, only the 1-pixel border must stay zero.
        for pad in pads:
            pad[...] = jnp.zeros(pad.shape, f32)

        # Input image -> first C0 channels of the block-0 activation slab (VMEM).
        acts[0][:, :NUM_INIT_FEATURES] = x_ref[0]

        def dense_layer(act, pad, h, w, cin):
            hw = h * w
            s1 = next(it)[...]; b1 = next(it)[...]; w1 = next(it)[...]
            s2 = next(it)[...]; b2 = next(it)[...]; w2 = next(it)[...]
            # eval-BN + ReLU + 1x1 conv: one MXU matmul (bf16 in, f32 accumulate).
            a1 = jnp.maximum(act[:, :cin] * s1 + b1, 0.0)
            bneck = jnp.dot(a1.astype(bf16), w1, preferred_element_type=f32)
            # eval-BN + ReLU, then 3x3 conv (stride 1, pad 1) as ONE im2col matmul.
            a2 = jnp.maximum(bneck * s2 + b2, 0.0)
            pad[1:h + 1, 1:w + 1, :] = a2.reshape(h, w, MID)
            for t in range(9):
                dy, dx = t // 3, t % 3
                patch[:hw, t * MID:(t + 1) * MID] = (
                    pad[dy:dy + h, dx:dx + w, :].reshape(hw, MID))
            new = jnp.dot(patch[:hw, :].astype(bf16), w2,
                          preferred_element_type=f32)          # (hw, GROWTH)
            # torch.cat([x, new], dim=1) == in-place write of the new channels.
            act[:, cin:cin + GROWTH] = new

        c = NUM_INIT_FEATURES
        for bi, (h, w, _cin, _cout) in enumerate(dims):
            act = acts[bi]
            for _ in range(BLOCK_CONFIG[bi]):
                dense_layer(act, pads[bi], h, w, c)
                c += GROWTH
            if bi != n_blocks - 1:
                st = next(it)[...]; bt = next(it)[...]
                wt = next(it)[...]; pmat = next(it)[...]
                # transition: eval-BN + ReLU + 1x1 conv, then 2x2/stride-2 average
                # pool fused as a tiny f32 matmul (pmat rows hold four 0.25's).
                a = jnp.maximum(act[:, :c] * st + bt, 0.0)
                y = jnp.dot(a.astype(bf16), wt, preferred_element_type=f32)
                pooled = jnp.dot(pmat, y, preferred_element_type=f32)
                c //= 2
                acts[bi + 1][:, :c] = pooled

        # norm5 (eval BN, NO ReLU) fused with the global average pool.
        s5 = next(it)[...]; b5 = next(it)[...]
        hl, wl = dims[-1][0], dims[-1][1]
        yf = acts[-1][:, :c] * s5 + b5
        out_ref[0] = jnp.sum(yf, axis=0, keepdims=True) * (1.0 / float(hl * wl))

    return kernel


# --------------------------- parameter flattening -----------------------------

def bn_scale_bias(p):
    # eval-mode BatchNorm folded into scale/bias: y = x*scale + bias
    scale = p["gamma"] / jnp.sqrt(p["var"] + EPS)
    bias = p["beta"] - p["mean"] * scale
    return scale, bias


def _make_pool_matrix(h, w):
    """(h//2 * w//2, h*w) matrix implementing 2x2 / stride-2 average pooling."""
    ho, wo = h // 2, w // 2
    rows = jnp.arange(ho * wo)
    oy, ox = rows // wo, rows % wo
    cols = jnp.arange(h * w)
    iy, ix = cols // w, cols % w
    hit = (iy[None, :] // 2 == oy[:, None]) & (ix[None, :] // 2 == ox[:, None])
    return hit.astype(jnp.float32) * 0.25


def _prepare_operands(params):
    """Flatten params (BN folded, conv weights bf16) into operands + BlockSpecs."""
    ops, specs = [], []

    def add(a):
        ops.append(a)
        specs.append(pl.BlockSpec(a.shape, lambda b, _z=(0,) * a.ndim: _z))

    h, w = H, W
    for bi, nl in enumerate(BLOCK_CONFIG):
        blk = params["blocks"][bi]
        for li in range(nl):
            lp = blk["layers"][li]
            s1, b1 = bn_scale_bias(lp["norm1"])
            add(s1.reshape(1, -1)); add(b1.reshape(1, -1))
            add(lp["conv1"].astype(jnp.bfloat16))                    # (cin, MID)
            s2, b2 = bn_scale_bias(lp["norm2"])
            add(s2.reshape(1, -1)); add(b2.reshape(1, -1))
            add(lp["conv2"].reshape(9 * MID, GROWTH).astype(jnp.bfloat16))
        if blk["transition"] is not None:
            t = blk["transition"]
            st, bt = bn_scale_bias(t["norm"])
            add(st.reshape(1, -1)); add(bt.reshape(1, -1))
            add(t["conv"].astype(jnp.bfloat16))                      # (c, c//2)
            add(_make_pool_matrix(h, w))
            h, w = h // 2, w // 2
    s5, b5 = bn_scale_bias(params["norm5"])
    add(s5.reshape(1, -1)); add(b5.reshape(1, -1))
    return ops, specs


# ------------------------------ forward pass ----------------------------------

def _linear_kernel(x_ref, w_ref, b_ref, o_ref):
    # classifier: (N, C) @ (C, num_classes) + bias  (training path only)
    o_ref[...] = jnp.dot(x_ref[...], w_ref[...],
                         preferred_element_type=jnp.float32) + b_ref[...]


def linear(x, w, b):
    n, _ = x.shape
    k = w.shape[1]
    return pl.pallas_call(
        _linear_kernel,
        out_shape=jax.ShapeDtypeStruct((n, k), jnp.float32),
    )(x, w, b.reshape(1, k))


def densenet_alignment_forward(params, x_nhwc, training=False):
    n, h, w, c0 = x_nhwc.shape
    assert (h, w, c0) == (H, W, NUM_INIT_FEATURES)
    dims, c_final, _, _ = _block_dims()
    ops, specs = _prepare_operands(params)
    n_params = len(ops)

    scratch_shapes = []
    for (bh, bw, _ci, co) in dims:
        scratch_shapes.append(pltpu.VMEM((bh * bw, co), jnp.float32))          # act
        scratch_shapes.append(pltpu.VMEM((bh + 2, bw + 2, MID), jnp.float32))  # pad
    max_hw = max(bh * bw for (bh, bw, _ci, _co) in dims)
    scratch_shapes.append(pltpu.VMEM((max_hw, 9 * MID), jnp.float32))          # im2col

    x2 = x_nhwc.reshape(n, h * w, c0)          # channels on the lane axis
    out = pl.pallas_call(
        _make_fused_kernel(n_params, dims),
        out_shape=jax.ShapeDtypeStruct((n, 1, c_final), jnp.float32),
        grid=(n,),
        in_specs=[pl.BlockSpec((1, h * w, c0), lambda b: (b, 0, 0))] + specs,
        out_specs=pl.BlockSpec((1, 1, c_final), lambda b: (b, 0, 0)),
        scratch_shapes=scratch_shapes,
        compiler_params=pltpu.CompilerParams(dimension_semantics=("parallel",)),
    )(x2, *ops)
    f = out.reshape(n, c_final)
    if not training:
        return f
    # TODO(synk): training-mode BatchNorm (batch statistics) not implemented;
    # the classifier below uses the eval-path features.
    return linear(f, params["cls_w"], params["cls_b"])


# -------------------------- parameters (synthetic) -----------------------------

def init_bn(key, c):
    k1, k2, k3, k4 = jax.random.split(key, 4)
    return {
        "gamma": jax.random.uniform(k1, (c,), jnp.float32, 0.5, 1.5),
        "beta": jax.random.normal(k2, (c,), jnp.float32) * 0.1,
        "mean": jax.random.normal(k3, (c,), jnp.float32) * 0.1,
        "var": jax.random.uniform(k4, (c,), jnp.float32, 0.5, 1.5),
    }


def init_dense_layer(key, cin):
    k = jax.random.split(key, 4)
    return {
        "norm1": init_bn(k[0], cin),
        # PyTorch conv1 weight is (MID, cin, 1, 1); stored here as (cin, MID).
        "conv1": jax.random.normal(k[1], (cin, MID), jnp.float32) / jnp.sqrt(cin),
        "norm2": init_bn(k[2], MID),
        # PyTorch conv2 weight is (GROWTH, MID, 3, 3); stored as (9, MID, GROWTH)
        # in (ky*3+kx, Cin, Cout) order (cross-correlation, same as PyTorch).
        "conv2": jax.random.normal(k[3], (9, MID, GROWTH), jnp.float32)
                 / jnp.sqrt(9 * MID),
    }


def init_params(key):
    keys = iter(jax.random.split(key, 64))
    blocks = []
    c = NUM_INIT_FEATURES
    for i, num_layers in enumerate(BLOCK_CONFIG):
        layers = []
        for _ in range(num_layers):
            layers.append(init_dense_layer(next(keys), c))
            c += GROWTH
        trans = None
        if i != len(BLOCK_CONFIG) - 1:
            trans = {
                "norm": init_bn(next(keys), c),
                "conv": jax.random.normal(next(keys), (c, c // 2), jnp.float32)
                        / jnp.sqrt(c),
            }
            c //= 2
        blocks.append({"layers": layers, "transition": trans})
    params = {
        "blocks": blocks,
        "norm5": init_bn(next(keys), c),
        "cls_w": jax.random.normal(next(keys), (c, NUM_CLASSES), jnp.float32)
                 / jnp.sqrt(c),
        "cls_b": jnp.zeros((NUM_CLASSES,), jnp.float32),
    }
    return params, c


# ------------------------ pure-JAX reference (check) ---------------------------

def _ref_forward(params, x_nhwc):
    """Pure-JAX reference mirroring the kernel's mixed precision
    (bf16 matmul inputs, f32 accumulation)."""
    bf16 = jnp.bfloat16

    def mm(a, w):
        return jnp.dot(a.astype(bf16), w.astype(bf16),
                       preferred_element_type=jnp.float32)

    def bnrelu(t, p):
        s, b = bn_scale_bias(p)
        return jnp.maximum(t * s + b, 0.0)

    x = x_nhwc
    for block in params["blocks"]:
        for lp in block["layers"]:
            n_, h_, w_, cin = x.shape
            a = bnrelu(x, lp["norm1"]).reshape(n_ * h_ * w_, cin)
            bneck = mm(a, lp["conv1"]).reshape(n_, h_, w_, MID)
            a2 = bnrelu(bneck, lp["norm2"])
            a2p = jnp.pad(a2, ((0, 0), (1, 1), (1, 1), (0, 0)))
            taps = [a2p[:, dy:dy + h_, dx:dx + w_, :]
                    for dy in range(3) for dx in range(3)]
            patch = jnp.concatenate(taps, axis=-1).reshape(n_ * h_ * w_, 9 * MID)
            new = mm(patch, lp["conv2"].reshape(9 * MID, GROWTH))
            x = jnp.concatenate([x, new.reshape(n_, h_, w_, GROWTH)], axis=-1)
        t = block["transition"]
        if t is not None:
            n_, h_, w_, cc = x.shape
            a = bnrelu(x, t["norm"]).reshape(n_ * h_ * w_, cc)
            y = mm(a, t["conv"]).reshape(n_, h_, w_, cc // 2)
            y = y.reshape(n_, h_ // 2, 2, w_ // 2, 2, cc // 2)
            x = y.sum(axis=(2, 4)) * 0.25
    s, b = bn_scale_bias(params["norm5"])
    return jnp.mean(x * s + b, axis=(1, 2))


# ----------------------------------- main --------------------------------------

if __name__ == "__main__":
    key = jax.random.PRNGKey(0)
    kp, kx = jax.random.split(key)
    params, c_final = init_params(kp)

    # Input as the PyTorch module would receive it (NCHW), then -> NHWC.
    x_nchw = jax.random.normal(kx, (N, NUM_INIT_FEATURES, H, W), jnp.float32)
    x_nhwc = jnp.transpose(x_nchw, (0, 2, 3, 1))

    fwd = jax.jit(densenet_alignment_forward)
    f = jax.block_until_ready(fwd(params, x_nhwc))

    assert f.shape == (N, c_final), f.shape
    f_ref = _ref_forward(params, x_nhwc)
    assert bool(jnp.allclose(f, f_ref, rtol=5e-3, atol=5e-3)), (
        "mismatch vs pure-JAX reference")

    print("KERNEL_OK")
</pallas_src>

<mosaic_0001>
module attributes {stable_mosaic.version = 11 : i64} {
  func.func @kernel(%arg0: i32, %arg1: memref<1x64x16xf32, #tpu.memory_space<vmem>>, %arg2: memref<1x16xf32, #tpu.memory_space<vmem>>, %arg3: memref<1x16xf32, #tpu.memory_space<vmem>>, %arg4: memref<16x16xbf16, #tpu.memory_space<vmem>>, %arg5: memref<1x16xf32, #tpu.memory_space<vmem>>, %arg6: memref<1x16xf32, #tpu.memory_space<vmem>>, %arg7: memref<144x8xbf16, #tpu.memory_space<vmem>>, %arg8: memref<1x24xf32, #tpu.memory_space<vmem>>, %arg9: memref<1x24xf32, #tpu.memory_space<vmem>>, %arg10: memref<24x16xbf16, #tpu.memory_space<vmem>>, %arg11: memref<1x16xf32, #tpu.memory_space<vmem>>, %arg12: memref<1x16xf32, #tpu.memory_space<vmem>>, %arg13: memref<144x8xbf16, #tpu.memory_space<vmem>>, %arg14: memref<1x32xf32, #tpu.memory_space<vmem>>, %arg15: memref<1x32xf32, #tpu.memory_space<vmem>>, %arg16: memref<32x16xbf16, #tpu.memory_space<vmem>>, %arg17: memref<16x64xf32, #tpu.memory_space<vmem>>, %arg18: memref<1x16xf32, #tpu.memory_space<vmem>>, %arg19: memref<1x16xf32, #tpu.memory_space<vmem>>, %arg20: memref<16x16xbf16, #tpu.memory_space<vmem>>, %arg21: memref<1x16xf32, #tpu.memory_space<vmem>>, %arg22: memref<1x16xf32, #tpu.memory_space<vmem>>, %arg23: memref<144x8xbf16, #tpu.memory_space<vmem>>, %arg24: memref<1x24xf32, #tpu.memory_space<vmem>>, %arg25: memref<1x24xf32, #tpu.memory_space<vmem>>, %arg26: memref<24x16xbf16, #tpu.memory_space<vmem>>, %arg27: memref<1x16xf32, #tpu.memory_space<vmem>>, %arg28: memref<1x16xf32, #tpu.memory_space<vmem>>, %arg29: memref<144x8xbf16, #tpu.memory_space<vmem>>, %arg30: memref<1x32xf32, #tpu.memory_space<vmem>>, %arg31: memref<1x32xf32, #tpu.memory_space<vmem>>, %arg32: memref<1x1x32xf32, #tpu.memory_space<vmem>>, %arg33: memref<64x32xf32, #tpu.memory_space<vmem>>, %arg34: memref<10x10x16xf32, #tpu.memory_space<vmem>>, %arg35: memref<16x32xf32, #tpu.memory_space<vmem>>, %arg36: memref<6x6x16xf32, #tpu.memory_space<vmem>>, %arg37: memref<64x144xf32, #tpu.memory_space<vmem>>) attributes {dimension_semantics = [#tpu.dimension_semantics<parallel>], iteration_bounds = array<i64: 2>, scalar_prefetch = 0 : i64, scratch_operands = 5 : i64, tpu.core_type = #tpu.core_type<tc>, window_params = [{transform_indices = @transform_0, window_bounds = array<i64: 1, 64, 16>}, {pipeline_mode = #tpu.pipeline_mode<synchronous>, transform_indices = @transform_1, window_bounds = array<i64: 1, 16>}, {pipeline_mode = #tpu.pipeline_mode<synchronous>, transform_indices = @transform_2, window_bounds = array<i64: 1, 16>}, {pipeline_mode = #tpu.pipeline_mode<synchronous>, transform_indices = @transform_3, window_bounds = array<i64: 16, 16>}, {pipeline_mode = #tpu.pipeline_mode<synchronous>, transform_indices = @transform_4, window_bounds = array<i64: 1, 16>}, {pipeline_mode = #tpu.pipeline_mode<synchronous>, transform_indices = @transform_5, window_bounds = array<i64: 1, 16>}, {pipeline_mode = #tpu.pipeline_mode<synchronous>, transform_indices = @transform_6, window_bounds = array<i64: 144, 8>}, {pipeline_mode = #tpu.pipeline_mode<synchronous>, transform_indices = @transform_7, window_bounds = array<i64: 1, 24>}, {pipeline_mode = #tpu.pipeline_mode<synchronous>, transform_indices = @transform_8, window_bounds = array<i64: 1, 24>}, {pipeline_mode = #tpu.pipeline_mode<synchronous>, transform_indices = @transform_9, window_bounds = array<i64: 24, 16>}, {pipeline_mode = #tpu.pipeline_mode<synchronous>, transform_indices = @transform_10, window_bounds = array<i64: 1, 16>}, {pipeline_mode = #tpu.pipeline_mode<synchronous>, transform_indices = @transform_11, window_bounds = array<i64: 1, 16>}, {pipeline_mode = #tpu.pipeline_mode<synchronous>, transform_indices = @transform_12, window_bounds = array<i64: 144, 8>}, {pipeline_mode = #tpu.pipeline_mode<synchronous>, transform_indices = @transform_13, window_bounds = array<i64: 1, 32>}, {pipeline_mode = #tpu.pipeline_mode<synchronous>, transform_indices = @transform_14, window_bounds = array<i64: 1, 32>}, {pipeline_mode = #tpu.pipeline_mode<synchronous>, transform_indices = @transform_15, window_bounds = array<i64: 32, 16>}, {pipeline_mode = #tpu.pipeline_mode<synchronous>, transform_indices = @transform_16, window_bounds = array<i64: 16, 64>}, {pipeline_mode = #tpu.pipeline_mode<synchronous>, transform_indices = @transform_17, window_bounds = array<i64: 1, 16>}, {pipeline_mode = #tpu.pipeline_mode<synchronous>, transform_indices = @transform_18, window_bounds = array<i64: 1, 16>}, {pipeline_mode = #tpu.pipeline_mode<synchronous>, transform_indices = @transform_19, window_bounds = array<i64: 16, 16>}, {pipeline_mode = #tpu.pipeline_mode<synchronous>, transform_indices = @transform_20, window_bounds = array<i64: 1, 16>}, {pipeline_mode = #tpu.pipeline_mode<synchronous>, transform_indices = @transform_21, window_bounds = array<i64: 1, 16>}, {pipeline_mode = #tpu.pipeline_mode<synchronous>, transform_indices = @transform_22, window_bounds = array<i64: 144, 8>}, {pipeline_mode = #tpu.pipeline_mode<synchronous>, transform_indices = @transform_23, window_bounds = array<i64: 1, 24>}, {pipeline_mode = #tpu.pipeline_mode<synchronous>, transform_indices = @transform_24, window_bounds = array<i64: 1, 24>}, {pipeline_mode = #tpu.pipeline_mode<synchronous>, transform_indices = @transform_25, window_bounds = array<i64: 24, 16>}, {pipeline_mode = #tpu.pipeline_mode<synchronous>, transform_indices = @transform_26, window_bounds = array<i64: 1, 16>}, {pipeline_mode = #tpu.pipeline_mode<synchronous>, transform_indices = @transform_27, window_bounds = array<i64: 1, 16>}, {pipeline_mode = #tpu.pipeline_mode<synchronous>, transform_indices = @transform_28, window_bounds = array<i64: 144, 8>}, {pipeline_mode = #tpu.pipeline_mode<synchronous>, transform_indices = @transform_29, window_bounds = array<i64: 1, 32>}, {pipeline_mode = #tpu.pipeline_mode<synchronous>, transform_indices = @transform_30, window_bounds = array<i64: 1, 32>}, {transform_indices = @transform_31, window_bounds = array<i64: 1, 1, 32>}]} {
    %cst = arith.constant 0.000000e+00 : f32
    %0 = vector.broadcast %cst : f32 to vector<10x10x16xf32>
    %c0 = arith.constant 0 : index
    %c0_0 = arith.constant 0 : index
    %c0_1 = arith.constant 0 : index
    %1 = vector.load %arg34[%c0, %c0_0, %c0_1] : memref<10x10x16xf32, #tpu.memory_space<vmem>>, vector<10x10x16xf32>
    tpu.vector_store %arg34[%c0, %c0_0, %c0_1], %0 {strides = array<i32>} : memref<10x10x16xf32, #tpu.memory_space<vmem>>, vector<10x10x16xf32>,
    %cst_2 = arith.constant 0.000000e+00 : f32
    %2 = vector.broadcast %cst_2 : f32 to vector<6x6x16xf32>
    %c0_3 = arith.constant 0 : index
    %c0_4 = arith.constant 0 : index
    %c0_5 = arith.constant 0 : index
    %3 = vector.load %arg36[%c0_3, %c0_4, %c0_5] : memref<6x6x16xf32, #tpu.memory_space<vmem>>, vector<6x6x16xf32>
    tpu.vector_store %arg36[%c0_3, %c0_4, %c0_5], %2 {strides = array<i32>} : memref<6x6x16xf32, #tpu.memory_space<vmem>>, vector<6x6x16xf32>,
    %c0_6 = arith.constant 0 : index
    %c0_7 = arith.constant 0 : index
    %c0_8 = arith.constant 0 : index
    %4 = vector.load %arg1[%c0_6, %c0_7, %c0_8] : memref<1x64x16xf32, #tpu.memory_space<vmem>>, vector<1x64x16xf32>
    %5 = vector.shape_cast %4 : vector<1x64x16xf32> to vector<64x16xf32>
    %c0_9 = arith.constant 0 : index
    %c0_10 = arith.constant 0 : index
    %6 = vector.load %arg33[%c0_9, %c0_10] : memref<64x32xf32, #tpu.memory_space<vmem>>, vector<64x16xf32>
    tpu.vector_store %arg33[%c0_9, %c0_10], %5 {strides = array<i32>} : memref<64x32xf32, #tpu.memory_space<vmem>>, vector<64x16xf32>,
    %c0_11 = arith.constant 0 : index
    %c0_12 = arith.constant 0 : index
    %7 = vector.load %arg2[%c0_11, %c0_12] : memref<1x16xf32, #tpu.memory_space<vmem>>, vector<1x16xf32>
    %c0_13 = arith.constant 0 : index
    %c0_14 = arith.constant 0 : index
    %8 = vector.load %arg3[%c0_13, %c0_14] : memref<1x16xf32, #tpu.memory_space<vmem>>, vector<1x16xf32>
    %c0_15 = arith.constant 0 : index
    %c0_16 = arith.constant 0 : index
    %9 = vector.load %arg4[%c0_15, %c0_16] : memref<16x16xbf16, #tpu.memory_space<vmem>>, vector<16x16xbf16>
    %c0_17 = arith.constant 0 : index
    %c0_18 = arith.constant 0 : index
    %10 = vector.load %arg5[%c0_17, %c0_18] : memref<1x16xf32, #tpu.memory_space<vmem>>, vector<1x16xf32>
    %c0_19 = arith.constant 0 : index
    %c0_20 = arith.constant 0 : index
    %11 = vector.load %arg6[%c0_19, %c0_20] : memref<1x16xf32, #tpu.memory_space<vmem>>, vector<1x16xf32>
    %c0_21 = arith.constant 0 : index
    %c0_22 = arith.constant 0 : index
    %12 = vector.load %arg7[%c0_21, %c0_22] : memref<144x8xbf16, #tpu.memory_space<vmem>>, vector<144x8xbf16>
    %c0_23 = arith.constant 0 : index
    %c0_24 = arith.constant 0 : index
    %13 = vector.load %arg33[%c0_23, %c0_24] : memref<64x32xf32, #tpu.memory_space<vmem>>, vector<64x16xf32>
    %14 = vector.broadcast %7 : vector<1x16xf32> to vector<64x16xf32>
    %15 = arith.mulf %13, %14 : vector<64x16xf32>
    %16 = vector.broadcast %8 : vector<1x16xf32> to vector<64x16xf32>
    %17 = arith.addf %15, %16 : vector<64x16xf32>
    %cst_25 = arith.constant 0.000000e+00 : f32
    %18 = vector.broadcast %cst_25 : f32 to vector<64x16xf32>
    %19 = arith.maximumf %17, %18 : vector<64x16xf32>
    %20 = arith.truncf %19 : vector<64x16xf32> to vector<64x16xbf16>
    %cst_26 = arith.constant dense<0.000000e+00> : vector<64x16xf32>
    %21 = tpu.matmul %20, %9, %cst_26 {dimension_numbers = #tpu.dot_dimension_numbers<[1], [0], [0], [1], [0, 0, 1, 1], [], []>} : vector<64x16xbf16>, vector<16x16xbf16>, vector<64x16xf32> -> vector<64x16xf32>
    %22 = vector.broadcast %10 : vector<1x16xf32> to vector<64x16xf32>
    %23 = arith.mulf %21, %22 : vector<64x16xf32>
    %24 = vector.broadcast %11 : vector<1x16xf32> to vector<64x16xf32>
    %25 = arith.addf %23, %24 : vector<64x16xf32>
    %cst_27 = arith.constant 0.000000e+00 : f32
    %26 = vector.broadcast %cst_27 : f32 to vector<64x16xf32>
    %27 = arith.maximumf %25, %26 : vector<64x16xf32>
    %28 = vector.shape_cast %27 : vector<64x16xf32> to vector<8x8x16xf32>
    %c1 = arith.constant 1 : index
    %c1_28 = arith.constant 1 : index
    %c0_29 = arith.constant 0 : index
    %29 = vector.load %arg34[%c1, %c1_28, %c0_29] : memref<10x10x16xf32, #tpu.memory_space<vmem>>, vector<8x8x16xf32>
    tpu.vector_store %arg34[%c1, %c1_28, %c0_29], %28 {strides = array<i32>} : memref<10x10x16xf32, #tpu.memory_space<vmem>>, vector<8x8x16xf32>,
    %c0_30 = arith.constant 0 : index
    %c0_31 = arith.constant 0 : index
    %c0_32 = arith.constant 0 : index
    %30 = vector.load %arg34[%c0_30, %c0_31, %c0_32] : memref<10x10x16xf32, #tpu.memory_space<vmem>>, vector<8x8x16xf32>
    %31 = vector.shape_cast %30 : vector<8x8x16xf32> to vector<64x16xf32>
    %c0_33 = arith.constant 0 : index
    %c0_34 = arith.constant 0 : index
    %32 = vector.load %arg37[%c0_33, %c0_34] : memref<64x144xf32, #tpu.memory_space<vmem>>, vector<64x16xf32>
    tpu.vector_store %arg37[%c0_33, %c0_34], %31 {strides = array<i32>} : memref<64x144xf32, #tpu.memory_space<vmem>>, vector<64x16xf32>,
    %c0_35 = arith.constant 0 : index
    %c1_36 = arith.constant 1 : index
    %c0_37 = arith.constant 0 : index
    %33 = vector.load %arg34[%c0_35, %c1_36, %c0_37] : memref<10x10x16xf32, #tpu.memory_space<vmem>>, vector<8x8x16xf32>
    %34 = vector.shape_cast %33 : vector<8x8x16xf32> to vector<64x16xf32>
    %c0_38 = arith.constant 0 : index
    %c16 = arith.constant 16 : index
    %35 = vector.load %arg37[%c0_38, %c16] : memref<64x144xf32, #tpu.memory_space<vmem>>, vector<64x16xf32>
    tpu.vector_store %arg37[%c0_38, %c16], %34 {strides = array<i32>} : memref<64x144xf32, #tpu.memory_space<vmem>>, vector<64x16xf32>,
    %c0_39 = arith.constant 0 : index
    %c2 = arith.constant 2 : index
    %c0_40 = arith.constant 0 : index
    %36 = vector.load %arg34[%c0_39, %c2, %c0_40] : memref<10x10x16xf32, #tpu.memory_space<vmem>>, vector<8x8x16xf32>
    %37 = vector.shape_cast %36 : vector<8x8x16xf32> to vector<64x16xf32>
    %c0_41 = arith.constant 0 : index
    %c32 = arith.constant 32 : index
    %38 = vector.load %arg37[%c0_41, %c32] : memref<64x144xf32, #tpu.memory_space<vmem>>, vector<64x16xf32>
    tpu.vector_store %arg37[%c0_41, %c32], %37 {strides = array<i32>} : memref<64x144xf32, #tpu.memory_space<vmem>>, vector<64x16xf32>,
    %c1_42 = arith.constant 1 : index
    %c0_43 = arith.constant 0 : index
    %c0_44 = arith.constant 0 : index
    %39 = vector.load %arg34[%c1_42, %c0_43, %c0_44] : memref<10x10x16xf32, #tpu.memory_space<vmem>>, vector<8x8x16xf32>
    %40 = vector.shape_cast %39 : vector<8x8x16xf32> to vector<64x16xf32>
    %c0_45 = arith.constant 0 : index
    %c48 = arith.constant 48 : index
    %41 = vector.load %arg37[%c0_45, %c48] : memref<64x144xf32, #tpu.memory_space<vmem>>, vector<64x16xf32>
    tpu.vector_store %arg37[%c0_45, %c48], %40 {strides = array<i32>} : memref<64x144xf32, #tpu.memory_space<vmem>>, vector<64x16xf32>,
    %c1_46 = arith.constant 1 : index
    %c1_47 = arith.constant 1 : index
    %c0_48 = arith.constant 0 : index
    %42 = vector.load %arg34[%c1_46, %c1_47, %c0_48] : memref<10x10x16xf32, #tpu.memory_space<vmem>>, vector<8x8x16xf32>
    %43 = vector.shape_cast %42 : vector<8x8x16xf32> to vector<64x16xf32>
    %c0_49 = arith.constant 0 : index
    %c64 = arith.constant 64 : index
    %44 = vector.load %arg37[%c0_49, %c64] : memref<64x144xf32, #tpu.memory_space<vmem>>, vector<64x16xf32>
    tpu.vector_store %arg37[%c0_49, %c64], %43 {strides = array<i32>} : memref<64x144xf32, #tpu.memory_space<vmem>>, vector<64x16xf32>,
    %c1_50 = arith.constant 1 : index
    %c2_51 = arith.constant 2 : index
    %c0_52 = arith.constant 0 : index
    %45 = vector.load %arg34[%c1_50, %c2_51, %c0_52] : memref<10x10x16xf32, #tpu.memory_space<vmem>>, vector<8x8x16xf32>
    %46 = vector.shape_cast %45 : vector<8x8x16xf32> to vector<64x16xf32>
    %c0_53 = arith.constant 0 : index
    %c80 = arith.constant 80 : index
    %47 = vector.load %arg37[%c0_53, %c80] : memref<64x144xf32, #tpu.memory_space<vmem>>, vector<64x16xf32>
    tpu.vector_store %arg37[%c0_53, %c80], %46 {strides = array<i32>} : memref<64x144xf32, #tpu.memory_space<vmem>>, vector<64x16xf32>,
    %c2_54 = arith.constant 2 : index
    %c0_55 = arith.constant 0 : index
    %c0_56 = arith.constant 0 : index
    %48 = vector.load %arg34[%c2_54, %c0_55, %c0_56] : memref<10x10x16xf32, #tpu.memory_space<vmem>>, vector<8x8x16xf32>
    %49 = vector.shape_cast %48 : vector<8x8x16xf32> to vector<64x16xf32>
    %c0_57 = arith.constant 0 : index
    %c96 = arith.constant 96 : index
    %50 = vector.load %arg37[%c0_57, %c96] : memref<64x144xf32, #tpu.memory_space<vmem>>, vector<64x16xf32>
    tpu.vector_store %arg37[%c0_57, %c96], %49 {strides = array<i32>} : memref<64x144xf32, #tpu.memory_space<vmem>>, vector<64x16xf32>,
    %c2_58 = arith.constant 2 : index
    %c1_59 = arith.constant 1 : index
    %c0_60 = arith.constant 0 : index
    %51 = vector.load %arg34[%c2_58, %c1_59, %c0_60] : memref<10x10x16xf32, #tpu.memory_space<vmem>>, vector<8x8x16xf32>
    %52 = vector.shape_cast %51 : vector<8x8x16xf32> to vector<64x16xf32>
    %c0_61 = arith.constant 0 : index
    %c112 = arith.constant 112 : index
    %53 = vector.load %arg37[%c0_61, %c112] : memref<64x144xf32, #tpu.memory_space<vmem>>, vector<64x16xf32>
    tpu.vector_store %arg37[%c0_61, %c112], %52 {strides = array<i32>} : memref<64x144xf32, #tpu.memory_space<vmem>>, vector<64x16xf32>,
    %c2_62 = arith.constant 2 : index
    %c2_63 = arith.constant 2 : index
    %c0_64 = arith.constant 0 : index
    %54 = vector.load %arg34[%c2_62, %c2_63, %c0_64] : memref<10x10x16xf32, #tpu.memory_space<vmem>>, vector<8x8x16xf32>
    %55 = vector.shape_cast %54 : vector<8x8x16xf32> to vector<64x16xf32>
    %c0_65 = arith.constant 0 : index
    %c128 = arith.constant 128 : index
    %56 = vector.load %arg37[%c0_65, %c128] : memref<64x144xf32, #tpu.memory_space<vmem>>, vector<64x16xf32>
    tpu.vector_store %arg37[%c0_65, %c128], %55 {strides = array<i32>} : memref<64x144xf32, #tpu.memory_space<vmem>>, vector<64x16xf32>,
    %c0_66 = arith.constant 0 : index
    %c0_67 = arith.constant 0 : index
    %57 = vector.load %arg37[%c0_66, %c0_67] : memref<64x144xf32, #tpu.memory_space<vmem>>, vector<64x144xf32>
    %58 = arith.truncf %57 : vector<64x144xf32> to vector<64x144xbf16>
    %cst_68 = arith.constant dense<0.000000e+00> : vector<64x8xf32>
    %59 = tpu.matmul %58, %12, %cst_68 {dimension_numbers = #tpu.dot_dimension_numbers<[1], [0], [0], [1], [0, 0, 1, 1], [], []>} : vector<64x144xbf16>, vector<144x8xbf16>, vector<64x8xf32> -> vector<64x8xf32>
    %c0_69 = arith.constant 0 : index
    %c16_70 = arith.constant 16 : index
    %60 = vector.load %arg33[%c0_69, %c16_70] : memref<64x32xf32, #tpu.memory_space<vmem>>, vector<64x8xf32>
    tpu.vector_store %arg33[%c0_69, %c16_70], %59 {strides = array<i32>} : memref<64x32xf32, #tpu.memory_space<vmem>>, vector<64x8xf32>,
    %c0_71 = arith.constant 0 : index
    %c0_72 = arith.constant 0 : index
    %61 = vector.load %arg8[%c0_71, %c0_72] : memref<1x24xf32, #tpu.memory_space<vmem>>, vector<1x24xf32>
    %c0_73 = arith.constant 0 : index
    %c0_74 = arith.constant 0 : index
    %62 = vector.load %arg9[%c0_73, %c0_74] : memref<1x24xf32, #tpu.memory_space<vmem>>, vector<1x24xf32>
    %c0_75 = arith.constant 0 : index
    %c0_76 = arith.constant 0 : index
    %63 = vector.load %arg10[%c0_75, %c0_76] : memref<24x16xbf16, #tpu.memory_space<vmem>>, vector<24x16xbf16>
    %c0_77 = arith.constant 0 : index
    %c0_78 = arith.constant 0 : index
    %64 = vector.load %arg11[%c0_77, %c0_78] : memref<1x16xf32, #tpu.memory_space<vmem>>, vector<1x16xf32>
    %c0_79 = arith.constant 0 : index
    %c0_80 = arith.constant 0 : index
    %65 = vector.load %arg12[%c0_79, %c0_80] : memref<1x16xf32, #tpu.memory_space<vmem>>, vector<1x16xf32>
    %c0_81 = arith.constant 0 : index
    %c0_82 = arith.constant 0 : index
    %66 = vector.load %arg13[%c0_81, %c0_82] : memref<144x8xbf16, #tpu.memory_space<vmem>>, vector<144x8xbf16>
    %c0_83 = arith.constant 0 : index
    %c0_84 = arith.constant 0 : index
    %67 = vector.load %arg33[%c0_83, %c0_84] : memref<64x32xf32, #tpu.memory_space<vmem>>, vector<64x24xf32>
    %68 = vector.broadcast %61 : vector<1x24xf32> to vector<64x24xf32>
    %69 = arith.mulf %67, %68 : vector<64x24xf32>
    %70 = vector.broadcast %62 : vector<1x24xf32> to vector<64x24xf32>
    %71 = arith.addf %69, %70 : vector<64x24xf32>
    %cst_85 = arith.constant 0.000000e+00 : f32
    %72 = vector.broadcast %cst_85 : f32 to vector<64x24xf32>
    %73 = arith.maximumf %71, %72 : vector<64x24xf32>
    %74 = arith.truncf %73 : vector<64x24xf32> to vector<64x24xbf16>
    %cst_86 = arith.constant dense<0.000000e+00> : vector<64x16xf32>
    %75 = tpu.matmul %74, %63, %cst_86 {dimension_numbers = #tpu.dot_dimension_numbers<[1], [0], [0], [1], [0, 0, 1, 1], [], []>} : vector<64x24xbf16>, vector<24x16xbf16>, vector<64x16xf32> -> vector<64x16xf32>
    %76 = vector.broadcast %64 : vector<1x16xf32> to vector<64x16xf32>
    %77 = arith.mulf %75, %76 : vector<64x16xf32>
    %78 = vector.broadcast %65 : vector<1x16xf32> to vector<64x16xf32>
    %79 = arith.addf %77, %78 : vector<64x16xf32>
    %cst_87 = arith.constant 0.000000e+00 : f32
    %80 = vector.broadcast %cst_87 : f32 to vector<64x16xf32>
    %81 = arith.maximumf %79, %80 : vector<64x16xf32>
    %82 = vector.shape_cast %81 : vector<64x16xf32> to vector<8x8x16xf32>
    %c1_88 = arith.constant 1 : index
    %c1_89 = arith.constant 1 : index
    %c0_90 = arith.constant 0 : index
    %83 = vector.load %arg34[%c1_88, %c1_89, %c0_90] : memref<10x10x16xf32, #tpu.memory_space<vmem>>, vector<8x8x16xf32>
    tpu.vector_store %arg34[%c1_88, %c1_89, %c0_90], %82 {strides = array<i32>} : memref<10x10x16xf32, #tpu.memory_space<vmem>>, vector<8x8x16xf32>,
    %c0_91 = arith.constant 0 : index
    %c0_92 = arith.constant 0 : index
    %c0_93 = arith.constant 0 : index
    %84 = vector.load %arg34[%c0_91, %c0_92, %c0_93] : memref<10x10x16xf32, #tpu.memory_space<vmem>>, vector<8x8x16xf32>
    %85 = vector.shape_cast %84 : vector<8x8x16xf32> to vector<64x16xf32>
    %c0_94 = arith.constant 0 : index
    %c0_95 = arith.constant 0 : index
    %86 = vector.load %arg37[%c0_94, %c0_95] : memref<64x144xf32, #tpu.memory_space<vmem>>, vector<64x16xf32>
    tpu.vector_store %arg37[%c0_94, %c0_95], %85 {strides = array<i32>} : memref<64x144xf32, #tpu.memory_space<vmem>>, vector<64x16xf32>,
    %c0_96 = arith.constant 0 : index
    %c1_97 = arith.constant 1 : index
    %c0_98 = arith.constant 0 : index
    %87 = vector.load %arg34[%c0_96, %c1_97, %c0_98] : memref<10x10x16xf32, #tpu.memory_space<vmem>>, vector<8x8x16xf32>
    %88 = vector.shape_cast %87 : vector<8x8x16xf32> to vector<64x16xf32>
    %c0_99 = arith.constant 0 : index
    %c16_100 = arith.constant 16 : index
    %89 = vector.load %arg37[%c0_99, %c16_100] : memref<64x144xf32, #tpu.memory_space<vmem>>, vector<64x16xf32>
    tpu.vector_store %arg37[%c0_99, %c16_100], %88 {strides = array<i32>} : memref<64x144xf32, #tpu.memory_space<vmem>>, vector<64x16xf32>,
    %c0_101 = arith.constant 0 : index
    %c2_102 = arith.constant 2 : index
    %c0_103 = arith.constant 0 : index
    %90 = vector.load %arg34[%c0_101, %c2_102, %c0_103] : memref<10x10x16xf32, #tpu.memory_space<vmem>>, vector<8x8x16xf32>
    %91 = vector.shape_cast %90 : vector<8x8x16xf32> to vector<64x16xf32>
    %c0_104 = arith.constant 0 : index
    %c32_105 = arith.constant 32 : index
    %92 = vector.load %arg37[%c0_104, %c32_105] : memref<64x144xf32, #tpu.memory_space<vmem>>, vector<64x16xf32>
    tpu.vector_store %arg37[%c0_104, %c32_105], %91 {strides = array<i32>} : memref<64x144xf32, #tpu.memory_space<vmem>>, vector<64x16xf32>,
    %c1_106 = arith.constant 1 : index
    %c0_107 = arith.constant 0 : index
    %c0_108 = arith.constant 0 : index
    %93 = vector.load %arg34[%c1_106, %c0_107, %c0_108] : memref<10x10x16xf32, #tpu.memory_space<vmem>>, vector<8x8x16xf32>
    %94 = vector.shape_cast %93 : vector<8x8x16xf32> to vector<64x16xf32>
    %c0_109 = arith.constant 0 : index
    %c48_110 = arith.constant 48 : index
    %95 = vector.load %arg37[%c0_109, %c48_110] : memref<64x144xf32, #tpu.memory_space<vmem>>, vector<64x16xf32>
    tpu.vector_store %arg37[%c0_109, %c48_110], %94 {strides = array<i32>} : memref<64x144xf32, #tpu.memory_space<vmem>>, vector<64x16xf32>,
    %c1_111 = arith.constant 1 : index
    %c1_112 = arith.constant 1 : index
    %c0_113 = arith.constant 0 : index
    %96 = vector.load %arg34[%c1_111, %c1_112, %c0_113] : memref<10x10x16xf32, #tpu.memory_space<vmem>>, vector<8x8x16xf32>
    %97 = vector.shape_cast %96 : vector<8x8x16xf32> to vector<64x16xf32>
    %c0_114 = arith.constant 0 : index
    %c64_115 = arith.constant 64 : index
    %98 = vector.load %arg37[%c0_114, %c64_115] : memref<64x144xf32, #tpu.memory_space<vmem>>, vector<64x16xf32>
    tpu.vector_store %arg37[%c0_114, %c64_115], %97 {strides = array<i32>} : memref<64x144xf32, #tpu.memory_space<vmem>>, vector<64x16xf32>,
    %c1_116 = arith.constant 1 : index
    %c2_117 = arith.constant 2 : index
    %c0_118 = arith.constant 0 : index
    %99 = vector.load %arg34[%c1_116, %c2_117, %c0_118] : memref<10x10x16xf32, #tpu.memory_space<vmem>>, vector<8x8x16xf32>
    %100 = vector.shape_cast %99 : vector<8x8x16xf32> to vector<64x16xf32>
    %c0_119 = arith.constant 0 : index
    %c80_120 = arith.constant 80 : index
    %101 = vector.load %arg37[%c0_119, %c80_120] : memref<64x144xf32, #tpu.memory_space<vmem>>, vector<64x16xf32>
    tpu.vector_store %arg37[%c0_119, %c80_120], %100 {strides = array<i32>} : memref<64x144xf32, #tpu.memory_space<vmem>>, vector<64x16xf32>,
    %c2_121 = arith.constant 2 : index
    %c0_122 = arith.constant 0 : index
    %c0_123 = arith.constant 0 : index
    %102 = vector.load %arg34[%c2_121, %c0_122, %c0_123] : memref<10x10x16xf32, #tpu.memory_space<vmem>>, vector<8x8x16xf32>
    %103 = vector.shape_cast %102 : vector<8x8x16xf32> to vector<64x16xf32>
    %c0_124 = arith.constant 0 : index
    %c96_125 = arith.constant 96 : index
    %104 = vector.load %arg37[%c0_124, %c96_125] : memref<64x144xf32, #tpu.memory_space<vmem>>, vector<64x16xf32>
    tpu.vector_store %arg37[%c0_124, %c96_125], %103 {strides = array<i32>} : memref<64x144xf32, #tpu.memory_space<vmem>>, vector<64x16xf32>,
    %c2_126 = arith.constant 2 : index
    %c1_127 = arith.constant 1 : index
    %c0_128 = arith.constant 0 : index
    %105 = vector.load %arg34[%c2_126, %c1_127, %c0_128] : memref<10x10x16xf32, #tpu.memory_space<vmem>>, vector<8x8x16xf32>
    %106 = vector.shape_cast %105 : vector<8x8x16xf32> to vector<64x16xf32>
    %c0_129 = arith.constant 0 : index
    %c112_130 = arith.constant 112 : index
    %107 = vector.load %arg37[%c0_129, %c112_130] : memref<64x144xf32, #tpu.memory_space<vmem>>, vector<64x16xf32>
    tpu.vector_store %arg37[%c0_129, %c112_130], %106 {strides = array<i32>} : memref<64x144xf32, #tpu.memory_space<vmem>>, vector<64x16xf32>,
    %c2_131 = arith.constant 2 : index
    %c2_132 = arith.constant 2 : index
    %c0_133 = arith.constant 0 : index
    %108 = vector.load %arg34[%c2_131, %c2_132, %c0_133] : memref<10x10x16xf32, #tpu.memory_space<vmem>>, vector<8x8x16xf32>
    %109 = vector.shape_cast %108 : vector<8x8x16xf32> to vector<64x16xf32>
    %c0_134 = arith.constant 0 : index
    %c128_135 = arith.constant 128 : index
    %110 = vector.load %arg37[%c0_134, %c128_135] : memref<64x144xf32, #tpu.memory_space<vmem>>, vector<64x16xf32>
    tpu.vector_store %arg37[%c0_134, %c128_135], %109 {strides = array<i32>} : memref<64x144xf32, #tpu.memory_space<vmem>>, vector<64x16xf32>,
    %c0_136 = arith.constant 0 : index
    %c0_137 = arith.constant 0 : index
    %111 = vector.load %arg37[%c0_136, %c0_137] : memref<64x144xf32, #tpu.memory_space<vmem>>, vector<64x144xf32>
    %112 = arith.truncf %111 : vector<64x144xf32> to vector<64x144xbf16>
    %cst_138 = arith.constant dense<0.000000e+00> : vector<64x8xf32>
    %113 = tpu.matmul %112, %66, %cst_138 {dimension_numbers = #tpu.dot_dimension_numbers<[1], [0], [0], [1], [0, 0, 1, 1], [], []>} : vector<64x144xbf16>, vector<144x8xbf16>, vector<64x8xf32> -> vector<64x8xf32>
    %c0_139 = arith.constant 0 : index
    %c24 = arith.constant 24 : index
    %114 = vector.load %arg33[%c0_139, %c24] : memref<64x32xf32, #tpu.memory_space<vmem>>, vector<64x8xf32>
    tpu.vector_store %arg33[%c0_139, %c24], %113 {strides = array<i32>} : memref<64x32xf32, #tpu.memory_space<vmem>>, vector<64x8xf32>,
    %c0_140 = arith.constant 0 : index
    %c0_141 = arith.constant 0 : index
    %115 = vector.load %arg14[%c0_140, %c0_141] : memref<1x32xf32, #tpu.memory_space<vmem>>, vector<1x32xf32>
    %c0_142 = arith.constant 0 : index
    %c0_143 = arith.constant 0 : index
    %116 = vector.load %arg15[%c0_142, %c0_143] : memref<1x32xf32, #tpu.memory_space<vmem>>, vector<1x32xf32>
    %c0_144 = arith.constant 0 : index
    %c0_145 = arith.constant 0 : index
    %117 = vector.load %arg16[%c0_144, %c0_145] : memref<32x16xbf16, #tpu.memory_space<vmem>>, vector<32x16xbf16>
    %c0_146 = arith.constant 0 : index
    %c0_147 = arith.constant 0 : index
    %118 = vector.load %arg17[%c0_146, %c0_147] : memref<16x64xf32, #tpu.memory_space<vmem>>, vector<16x64xf32>
    %c0_148 = arith.constant 0 : index
    %c0_149 = arith.constant 0 : index
    %119 = vector.load %arg33[%c0_148, %c0_149] : memref<64x32xf32, #tpu.memory_space<vmem>>, vector<64x32xf32>
    %120 = vector.broadcast %115 : vector<1x32xf32> to vector<64x32xf32>
    %121 = arith.mulf %119, %120 : vector<64x32xf32>
    %122 = vector.broadcast %116 : vector<1x32xf32> to vector<64x32xf32>
    %123 = arith.addf %121, %122 : vector<64x32xf32>
    %cst_150 = arith.constant 0.000000e+00 : f32
    %124 = vector.broadcast %cst_150 : f32 to vector<64x32xf32>
    %125 = arith.maximumf %123, %124 : vector<64x32xf32>
    %126 = arith.truncf %125 : vector<64x32xf32> to vector<64x32xbf16>
    %cst_151 = arith.constant dense<0.000000e+00> : vector<64x16xf32>
    %127 = tpu.matmul %126, %117, %cst_151 {dimension_numbers = #tpu.dot_dimension_numbers<[1], [0], [0], [1], [0, 0, 1, 1], [], []>} : vector<64x32xbf16>, vector<32x16xbf16>, vector<64x16xf32> -> vector<64x16xf32>
    %cst_152 = arith.constant dense<0.000000e+00> : vector<16x16xf32>
    %128 = tpu.matmul %118, %127, %cst_152 {dimension_numbers = #tpu.dot_dimension_numbers<[1], [0], [0], [1], [0, 0, 1, 1], [], []>} : vector<16x64xf32>, vector<64x16xf32>, vector<16x16xf32> -> vector<16x16xf32>
    %c0_153 = arith.constant 0 : index
    %c0_154 = arith.constant 0 : index
    %129 = vector.load %arg35[%c0_153, %c0_154] : memref<16x32xf32, #tpu.memory_space<vmem>>, vector<16x16xf32>
    tpu.vector_store %arg35[%c0_153, %c0_154], %128 {strides = array<i32>} : memref<16x32xf32, #tpu.memory_space<vmem>>, vector<16x16xf32>,
    %c0_155 = arith.constant 0 : index
    %c0_156 = arith.constant 0 : index
    %130 = vector.load %arg18[%c0_155, %c0_156] : memref<1x16xf32, #tpu.memory_space<vmem>>, vector<1x16xf32>
    %c0_157 = arith.constant 0 : index
    %c0_158 = arith.constant 0 : index
    %131 = vector.load %arg19[%c0_157, %c0_158] : memref<1x16xf32, #tpu.memory_space<vmem>>, vector<1x16xf32>
    %c0_159 = arith.constant 0 : index
    %c0_160 = arith.constant 0 : index
    %132 = vector.load %arg20[%c0_159, %c0_160] : memref<16x16xbf16, #tpu.memory_space<vmem>>, vector<16x16xbf16>
    %c0_161 = arith.constant 0 : index
    %c0_162 = arith.constant 0 : index
    %133 = vector.load %arg21[%c0_161, %c0_162] : memref<1x16xf32, #tpu.memory_space<vmem>>, vector<1x16xf32>
    %c0_163 = arith.constant 0 : index
    %c0_164 = arith.constant 0 : index
    %134 = vector.load %arg22[%c0_163, %c0_164] : memref<1x16xf32, #tpu.memory_space<vmem>>, vector<1x16xf32>
    %c0_165 = arith.constant 0 : index
    %c0_166 = arith.constant 0 : index
    %135 = vector.load %arg23[%c0_165, %c0_166] : memref<144x8xbf16, #tpu.memory_space<vmem>>, vector<144x8xbf16>
    %c0_167 = arith.constant 0 : index
    %c0_168 = arith.constant 0 : index
    %136 = vector.load %arg35[%c0_167, %c0_168] : memref<16x32xf32, #tpu.memory_space<vmem>>, vector<16x16xf32>
    %137 = vector.broadcast %130 : vector<1x16xf32> to vector<16x16xf32>
    %138 = arith.mulf %136, %137 : vector<16x16xf32>
    %139 = vector.broadcast %131 : vector<1x16xf32> to vector<16x16xf32>
    %140 = arith.addf %138, %139 : vector<16x16xf32>
    %cst_169 = arith.constant 0.000000e+00 : f32
    %141 = vector.broadcast %cst_169 : f32 to vector<16x16xf32>
    %142 = arith.maximumf %140, %141 : vector<16x16xf32>
    %143 = arith.truncf %142 : vector<16x16xf32> to vector<16x16xbf16>
    %cst_170 = arith.constant dense<0.000000e+00> : vector<16x16xf32>
    %144 = tpu.matmul %143, %132, %cst_170 {dimension_numbers = #tpu.dot_dimension_numbers<[1], [0], [0], [1], [0, 0, 1, 1], [], []>} : vector<16x16xbf16>, vector<16x16xbf16>, vector<16x16xf32> -> vector<16x16xf32>
    %145 = vector.broadcast %133 : vector<1x16xf32> to vector<16x16xf32>
    %146 = arith.mulf %144, %145 : vector<16x16xf32>
    %147 = vector.broadcast %134 : vector<1x16xf32> to vector<16x16xf32>
    %148 = arith.addf %146, %147 : vector<16x16xf32>
    %cst_171 = arith.constant 0.000000e+00 : f32
    %149 = vector.broadcast %cst_171 : f32 to vector<16x16xf32>
    %150 = arith.maximumf %148, %149 : vector<16x16xf32>
    %151 = vector.shape_cast %150 : vector<16x16xf32> to vector<4x4x16xf32>
    %c1_172 = arith.constant 1 : index
    %c1_173 = arith.constant 1 : index
    %c0_174 = arith.constant 0 : index
    %152 = vector.load %arg36[%c1_172, %c1_173, %c0_174] : memref<6x6x16xf32, #tpu.memory_space<vmem>>, vector<4x4x16xf32>
    tpu.vector_store %arg36[%c1_172, %c1_173, %c0_174], %151 {strides = array<i32>} : memref<6x6x16xf32, #tpu.memory_space<vmem>>, vector<4x4x16xf32>,
    %c0_175 = arith.constant 0 : index
    %c0_176 = arith.constant 0 : index
    %c0_177 = arith.constant 0 : index
    %153 = vector.load %arg36[%c0_175, %c0_176, %c0_177] : memref<6x6x16xf32, #tpu.memory_space<vmem>>, vector<4x4x16xf32>
    %154 = vector.shape_cast %153 : vector<4x4x16xf32> to vector<16x16xf32>
    %c0_178 = arith.constant 0 : index
    %c0_179 = arith.constant 0 : index
    %155 = vector.load %arg37[%c0_178, %c0_179] : memref<64x144xf32, #tpu.memory_space<vmem>>, vector<16x16xf32>
    tpu.vector_store %arg37[%c0_178, %c0_179], %154 {strides = array<i32>} : memref<64x144xf32, #tpu.memory_space<vmem>>, vector<16x16xf32>,
    %c0_180 = arith.constant 0 : index
    %c1_181 = arith.constant 1 : index
    %c0_182 = arith.constant 0 : index
    %156 = vector.load %arg36[%c0_180, %c1_181, %c0_182] : memref<6x6x16xf32, #tpu.memory_space<vmem>>, vector<4x4x16xf32>
    %157 = vector.shape_cast %156 : vector<4x4x16xf32> to vector<16x16xf32>
    %c0_183 = arith.constant 0 : index
    %c16_184 = arith.constant 16 : index
    %158 = vector.load %arg37[%c0_183, %c16_184] : memref<64x144xf32, #tpu.memory_space<vmem>>, vector<16x16xf32>
    tpu.vector_store %arg37[%c0_183, %c16_184], %157 {strides = array<i32>} : memref<64x144xf32, #tpu.memory_space<vmem>>, vector<16x16xf32>,
    %c0_185 = arith.constant 0 : index
    %c2_186 = arith.constant 2 : index
    %c0_187 = arith.constant 0 : index
    %159 = vector.load %arg36[%c0_185, %c2_186, %c0_187] : memref<6x6x16xf32, #tpu.memory_space<vmem>>, vector<4x4x16xf32>
    %160 = vector.shape_cast %159 : vector<4x4x16xf32> to vector<16x16xf32>
    %c0_188 = arith.constant 0 : index
    %c32_189 = arith.constant 32 : index
    %161 = vector.load %arg37[%c0_188, %c32_189] : memref<64x144xf32, #tpu.memory_space<vmem>>, vector<16x16xf32>
    tpu.vector_store %arg37[%c0_188, %c32_189], %160 {strides = array<i32>} : memref<64x144xf32, #tpu.memory_space<vmem>>, vector<16x16xf32>,
    %c1_190 = arith.constant 1 : index
    %c0_191 = arith.constant 0 : index
    %c0_192 = arith.constant 0 : index
    %162 = vector.load %arg36[%c1_190, %c0_191, %c0_192] : memref<6x6x16xf32, #tpu.memory_space<vmem>>, vector<4x4x16xf32>
    %163 = vector.shape_cast %162 : vector<4x4x16xf32> to vector<16x16xf32>
    %c0_193 = arith.constant 0 : index
    %c48_194 = arith.constant 48 : index
    %164 = vector.load %arg37[%c0_193, %c48_194] : memref<64x144xf32, #tpu.memory_space<vmem>>, vector<16x16xf32>
    tpu.vector_store %arg37[%c0_193, %c48_194], %163 {strides = array<i32>} : memref<64x144xf32, #tpu.memory_space<vmem>>, vector<16x16xf32>,
    %c1_195 = arith.constant 1 : index
    %c1_196 = arith.constant 1 : index
    %c0_197 = arith.constant 0 : index
    %165 = vector.load %arg36[%c1_195, %c1_196, %c0_197] : memref<6x6x16xf32, #tpu.memory_space<vmem>>, vector<4x4x16xf32>
    %166 = vector.shape_cast %165 : vector<4x4x16xf32> to vector<16x16xf32>
    %c0_198 = arith.constant 0 : index
    %c64_199 = arith.constant 64 : index
    %167 = vector.load %arg37[%c0_198, %c64_199] : memref<64x144xf32, #tpu.memory_space<vmem>>, vector<16x16xf32>
    tpu.vector_store %arg37[%c0_198, %c64_199], %166 {strides = array<i32>} : memref<64x144xf32, #tpu.memory_space<vmem>>, vector<16x16xf32>,
    %c1_200 = arith.constant 1 : index
    %c2_201 = arith.constant 2 : index
    %c0_202 = arith.constant 0 : index
    %168 = vector.load %arg36[%c1_200, %c2_201, %c0_202] : memref<6x6x16xf32, #tpu.memory_space<vmem>>, vector<4x4x16xf32>
    %169 = vector.shape_cast %168 : vector<4x4x16xf32> to vector<16x16xf32>
    %c0_203 = arith.constant 0 : index
    %c80_204 = arith.constant 80 : index
    %170 = vector.load %arg37[%c0_203, %c80_204] : memref<64x144xf32, #tpu.memory_space<vmem>>, vector<16x16xf32>
    tpu.vector_store %arg37[%c0_203, %c80_204], %169 {strides = array<i32>} : memref<64x144xf32, #tpu.memory_space<vmem>>, vector<16x16xf32>,
    %c2_205 = arith.constant 2 : index
    %c0_206 = arith.constant 0 : index
    %c0_207 = arith.constant 0 : index
    %171 = vector.load %arg36[%c2_205, %c0_206, %c0_207] : memref<6x6x16xf32, #tpu.memory_space<vmem>>, vector<4x4x16xf32>
    %172 = vector.shape_cast %171 : vector<4x4x16xf32> to vector<16x16xf32>
    %c0_208 = arith.constant 0 : index
    %c96_209 = arith.constant 96 : index
    %173 = vector.load %arg37[%c0_208, %c96_209] : memref<64x144xf32, #tpu.memory_space<vmem>>, vector<16x16xf32>
    tpu.vector_store %arg37[%c0_208, %c96_209], %172 {strides = array<i32>} : memref<64x144xf32, #tpu.memory_space<vmem>>, vector<16x16xf32>,
    %c2_210 = arith.constant 2 : index
    %c1_211 = arith.constant 1 : index
    %c0_212 = arith.constant 0 : index
    %174 = vector.load %arg36[%c2_210, %c1_211, %c0_212] : memref<6x6x16xf32, #tpu.memory_space<vmem>>, vector<4x4x16xf32>
    %175 = vector.shape_cast %174 : vector<4x4x16xf32> to vector<16x16xf32>
    %c0_213 = arith.constant 0 : index
    %c112_214 = arith.constant 112 : index
    %176 = vector.load %arg37[%c0_213, %c112_214] : memref<64x144xf32, #tpu.memory_space<vmem>>, vector<16x16xf32>
    tpu.vector_store %arg37[%c0_213, %c112_214], %175 {strides = array<i32>} : memref<64x144xf32, #tpu.memory_space<vmem>>, vector<16x16xf32>,
    %c2_215 = arith.constant 2 : index
    %c2_216 = arith.constant 2 : index
    %c0_217 = arith.constant 0 : index
    %177 = vector.load %arg36[%c2_215, %c2_216, %c0_217] : memref<6x6x16xf32, #tpu.memory_space<vmem>>, vector<4x4x16xf32>
    %178 = vector.shape_cast %177 : vector<4x4x16xf32> to vector<16x16xf32>
    %c0_218 = arith.constant 0 : index
    %c128_219 = arith.constant 128 : index
    %179 = vector.load %arg37[%c0_218, %c128_219] : memref<64x144xf32, #tpu.memory_space<vmem>>, vector<16x16xf32>
    tpu.vector_store %arg37[%c0_218, %c128_219], %178 {strides = array<i32>} : memref<64x144xf32, #tpu.memory_space<vmem>>, vector<16x16xf32>,
    %c0_220 = arith.constant 0 : index
    %c0_221 = arith.constant 0 : index
    %180 = vector.load %arg37[%c0_220, %c0_221] : memref<64x144xf32, #tpu.memory_space<vmem>>, vector<16x144xf32>
    %181 = arith.truncf %180 : vector<16x144xf32> to vector<16x144xbf16>
    %cst_222 = arith.constant dense<0.000000e+00> : vector<16x8xf32>
    %182 = tpu.matmul %181, %135, %cst_222 {dimension_numbers = #tpu.dot_dimension_numbers<[1], [0], [0], [1], [0, 0, 1, 1], [], []>} : vector<16x144xbf16>, vector<144x8xbf16>, vector<16x8xf32> -> vector<16x8xf32>
    %c0_223 = arith.constant 0 : index
    %c16_224 = arith.constant 16 : index
    %183 = vector.load %arg35[%c0_223, %c16_224] : memref<16x32xf32, #tpu.memory_space<vmem>>, vector<16x8xf32>
    tpu.vector_store %arg35[%c0_223, %c16_224], %182 {strides = array<i32>} : memref<16x32xf32, #tpu.memory_space<vmem>>, vector<16x8xf32>,
    %c0_225 = arith.constant 0 : index
    %c0_226 = arith.constant 0 : index
    %184 = vector.load %arg24[%c0_225, %c0_226] : memref<1x24xf32, #tpu.memory_space<vmem>>, vector<1x24xf32>
    %c0_227 = arith.constant 0 : index
    %c0_228 = arith.constant 0 : index
    %185 = vector.load %arg25[%c0_227, %c0_228] : memref<1x24xf32, #tpu.memory_space<vmem>>, vector<1x24xf32>
    %c0_229 = arith.constant 0 : index
    %c0_230 = arith.constant 0 : index
    %186 = vector.load %arg26[%c0_229, %c0_230] : memref<24x16xbf16, #tpu.memory_space<vmem>>, vector<24x16xbf16>
    %c0_231 = arith.constant 0 : index
    %c0_232 = arith.constant 0 : index
    %187 = vector.load %arg27[%c0_231, %c0_232] : memref<1x16xf32, #tpu.memory_space<vmem>>, vector<1x16xf32>
    %c0_233 = arith.constant 0 : index
    %c0_234 = arith.constant 0 : index
    %188 = vector.load %arg28[%c0_233, %c0_234] : memref<1x16xf32, #tpu.memory_space<vmem>>, vector<1x16xf32>
    %c0_235 = arith.constant 0 : index
    %c0_236 = arith.constant 0 : index
    %189 = vector.load %arg29[%c0_235, %c0_236] : memref<144x8xbf16, #tpu.memory_space<vmem>>, vector<144x8xbf16>
    %c0_237 = arith.constant 0 : index
    %c0_238 = arith.constant 0 : index
    %190 = vector.load %arg35[%c0_237, %c0_238] : memref<16x32xf32, #tpu.memory_space<vmem>>, vector<16x24xf32>
    %191 = vector.broadcast %184 : vector<1x24xf32> to vector<16x24xf32>
    %192 = arith.mulf %190, %191 : vector<16x24xf32>
    %193 = vector.broadcast %185 : vector<1x24xf32> to vector<16x24xf32>
    %194 = arith.addf %192, %193 : vector<16x24xf32>
    %cst_239 = arith.constant 0.000000e+00 : f32
    %195 = vector.broadcast %cst_239 : f32 to vector<16x24xf32>
    %196 = arith.maximumf %194, %195 : vector<16x24xf32>
    %197 = arith.truncf %196 : vector<16x24xf32> to vector<16x24xbf16>
    %cst_240 = arith.constant dense<0.000000e+00> : vector<16x16xf32>
    %198 = tpu.matmul %197, %186, %cst_240 {dimension_numbers = #tpu.dot_dimension_numbers<[1], [0], [0], [1], [0, 0, 1, 1], [], []>} : vector<16x24xbf16>, vector<24x16xbf16>, vector<16x16xf32> -> vector<16x16xf32>
    %199 = vector.broadcast %187 : vector<1x16xf32> to vector<16x16xf32>
    %200 = arith.mulf %198, %199 : vector<16x16xf32>
    %201 = vector.broadcast %188 : vector<1x16xf32> to vector<16x16xf32>
    %202 = arith.addf %200, %201 : vector<16x16xf32>
    %cst_241 = arith.constant 0.000000e+00 : f32
    %203 = vector.broadcast %cst_241 : f32 to vector<16x16xf32>
    %204 = arith.maximumf %202, %203 : vector<16x16xf32>
    %205 = vector.shape_cast %204 : vector<16x16xf32> to vector<4x4x16xf32>
    %c1_242 = arith.constant 1 : index
    %c1_243 = arith.constant 1 : index
    %c0_244 = arith.constant 0 : index
    %206 = vector.load %arg36[%c1_242, %c1_243, %c0_244] : memref<6x6x16xf32, #tpu.memory_space<vmem>>, vector<4x4x16xf32>
    tpu.vector_store %arg36[%c1_242, %c1_243, %c0_244], %205 {strides = array<i32>} : memref<6x6x16xf32, #tpu.memory_space<vmem>>, vector<4x4x16xf32>,
    %c0_245 = arith.constant 0 : index
    %c0_246 = arith.constant 0 : index
    %c0_247 = arith.constant 0 : index
    %207 = vector.load %arg36[%c0_245, %c0_246, %c0_247] : memref<6x6x16xf32, #tpu.memory_space<vmem>>, vector<4x4x16xf32>
    %208 = vector.shape_cast %207 : vector<4x4x16xf32> to vector<16x16xf32>
    %c0_248 = arith.constant 0 : index
    %c0_249 = arith.constant 0 : index
    %209 = vector.load %arg37[%c0_248, %c0_249] : memref<64x144xf32, #tpu.memory_space<vmem>>, vector<16x16xf32>
    tpu.vector_store %arg37[%c0_248, %c0_249], %208 {strides = array<i32>} : memref<64x144xf32, #tpu.memory_space<vmem>>, vector<16x16xf32>,
    %c0_250 = arith.constant 0 : index
    %c1_251 = arith.constant 1 : index
    %c0_252 = arith.constant 0 : index
    %210 = vector.load %arg36[%c0_250, %c1_251, %c0_252] : memref<6x6x16xf32, #tpu.memory_space<vmem>>, vector<4x4x16xf32>
    %211 = vector.shape_cast %210 : vector<4x4x16xf32> to vector<16x16xf32>
    %c0_253 = arith.constant 0 : index
    %c16_254 = arith.constant 16 : index
    %212 = vector.load %arg37[%c0_253, %c16_254] : memref<64x144xf32, #tpu.memory_space<vmem>>, vector<16x16xf32>
    tpu.vector_store %arg37[%c0_253, %c16_254], %211 {strides = array<i32>} : memref<64x144xf32, #tpu.memory_space<vmem>>, vector<16x16xf32>,
    %c0_255 = arith.constant 0 : index
    %c2_256 = arith.constant 2 : index
    %c0_257 = arith.constant 0 : index
    %213 = vector.load %arg36[%c0_255, %c2_256, %c0_257] : memref<6x6x16xf32, #tpu.memory_space<vmem>>, vector<4x4x16xf32>
    %214 = vector.shape_cast %213 : vector<4x4x16xf32> to vector<16x16xf32>
    %c0_258 = arith.constant 0 : index
    %c32_259 = arith.constant 32 : index
    %215 = vector.load %arg37[%c0_258, %c32_259] : memref<64x144xf32, #tpu.memory_space<vmem>>, vector<16x16xf32>
    tpu.vector_store %arg37[%c0_258, %c32_259], %214 {strides = array<i32>} : memref<64x144xf32, #tpu.memory_space<vmem>>, vector<16x16xf32>,
    %c1_260 = arith.constant 1 : index
    %c0_261 = arith.constant 0 : index
    %c0_262 = arith.constant 0 : index
    %216 = vector.load %arg36[%c1_260, %c0_261, %c0_262] : memref<6x6x16xf32, #tpu.memory_space<vmem>>, vector<4x4x16xf32>
    %217 = vector.shape_cast %216 : vector<4x4x16xf32> to vector<16x16xf32>
    %c0_263 = arith.constant 0 : index
    %c48_264 = arith.constant 48 : index
    %218 = vector.load %arg37[%c0_263, %c48_264] : memref<64x144xf32, #tpu.memory_space<vmem>>, vector<16x16xf32>
    tpu.vector_store %arg37[%c0_263, %c48_264], %217 {strides = array<i32>} : memref<64x144xf32, #tpu.memory_space<vmem>>, vector<16x16xf32>,
    %c1_265 = arith.constant 1 : index
    %c1_266 = arith.constant 1 : index
    %c0_267 = arith.constant 0 : index
    %219 = vector.load %arg36[%c1_265, %c1_266, %c0_267] : memref<6x6x16xf32, #tpu.memory_space<vmem>>, vector<4x4x16xf32>
    %220 = vector.shape_cast %219 : vector<4x4x16xf32> to vector<16x16xf32>
    %c0_268 = arith.constant 0 : index
    %c64_269 = arith.constant 64 : index
    %221 = vector.load %arg37[%c0_268, %c64_269] : memref<64x144xf32, #tpu.memory_space<vmem>>, vector<16x16xf32>
    tpu.vector_store %arg37[%c0_268, %c64_269], %220 {strides = array<i32>} : memref<64x144xf32, #tpu.memory_space<vmem>>, vector<16x16xf32>,
    %c1_270 = arith.constant 1 : index
    %c2_271 = arith.constant 2 : index
    %c0_272 = arith.constant 0 : index
    %222 = vector.load %arg36[%c1_270, %c2_271, %c0_272] : memref<6x6x16xf32, #tpu.memory_space<vmem>>, vector<4x4x16xf32>
    %223 = vector.shape_cast %222 : vector<4x4x16xf32> to vector<16x16xf32>
    %c0_273 = arith.constant 0 : index
    %c80_274 = arith.constant 80 : index
    %224 = vector.load %arg37[%c0_273, %c80_274] : memref<64x144xf32, #tpu.memory_space<vmem>>, vector<16x16xf32>
    tpu.vector_store %arg37[%c0_273, %c80_274], %223 {strides = array<i32>} : memref<64x144xf32, #tpu.memory_space<vmem>>, vector<16x16xf32>,
    %c2_275 = arith.constant 2 : index
    %c0_276 = arith.constant 0 : index
    %c0_277 = arith.constant 0 : index
    %225 = vector.load %arg36[%c2_275, %c0_276, %c0_277] : memref<6x6x16xf32, #tpu.memory_space<vmem>>, vector<4x4x16xf32>
    %226 = vector.shape_cast %225 : vector<4x4x16xf32> to vector<16x16xf32>
    %c0_278 = arith.constant 0 : index
    %c96_279 = arith.constant 96 : index
    %227 = vector.load %arg37[%c0_278, %c96_279] : memref<64x144xf32, #tpu.memory_space<vmem>>, vector<16x16xf32>
    tpu.vector_store %arg37[%c0_278, %c96_279], %226 {strides = array<i32>} : memref<64x144xf32, #tpu.memory_space<vmem>>, vector<16x16xf32>,
    %c2_280 = arith.constant 2 : index
    %c1_281 = arith.constant 1 : index
    %c0_282 = arith.constant 0 : index
    %228 = vector.load %arg36[%c2_280, %c1_281, %c0_282] : memref<6x6x16xf32, #tpu.memory_space<vmem>>, vector<4x4x16xf32>
    %229 = vector.shape_cast %228 : vector<4x4x16xf32> to vector<16x16xf32>
    %c0_283 = arith.constant 0 : index
    %c112_284 = arith.constant 112 : index
    %230 = vector.load %arg37[%c0_283, %c112_284] : memref<64x144xf32, #tpu.memory_space<vmem>>, vector<16x16xf32>
    tpu.vector_store %arg37[%c0_283, %c112_284], %229 {strides = array<i32>} : memref<64x144xf32, #tpu.memory_space<vmem>>, vector<16x16xf32>,
    %c2_285 = arith.constant 2 : index
    %c2_286 = arith.constant 2 : index
    %c0_287 = arith.constant 0 : index
    %231 = vector.load %arg36[%c2_285, %c2_286, %c0_287] : memref<6x6x16xf32, #tpu.memory_space<vmem>>, vector<4x4x16xf32>
    %232 = vector.shape_cast %231 : vector<4x4x16xf32> to vector<16x16xf32>
    %c0_288 = arith.constant 0 : index
    %c128_289 = arith.constant 128 : index
    %233 = vector.load %arg37[%c0_288, %c128_289] : memref<64x144xf32, #tpu.memory_space<vmem>>, vector<16x16xf32>
    tpu.vector_store %arg37[%c0_288, %c128_289], %232 {strides = array<i32>} : memref<64x144xf32, #tpu.memory_space<vmem>>, vector<16x16xf32>,
    %c0_290 = arith.constant 0 : index
    %c0_291 = arith.constant 0 : index
    %234 = vector.load %arg37[%c0_290, %c0_291] : memref<64x144xf32, #tpu.memory_space<vmem>>, vector<16x144xf32>
    %235 = arith.truncf %234 : vector<16x144xf32> to vector<16x144xbf16>
    %cst_292 = arith.constant dense<0.000000e+00> : vector<16x8xf32>
    %236 = tpu.matmul %235, %189, %cst_292 {dimension_numbers = #tpu.dot_dimension_numbers<[1], [0], [0], [1], [0, 0, 1, 1], [], []>} : vector<16x144xbf16>, vector<144x8xbf16>, vector<16x8xf32> -> vector<16x8xf32>
    %c0_293 = arith.constant 0 : index
    %c24_294 = arith.constant 24 : index
    %237 = vector.load %arg35[%c0_293, %c24_294] : memref<16x32xf32, #tpu.memory_space<vmem>>, vector<16x8xf32>
    tpu.vector_store %arg35[%c0_293, %c24_294], %236 {strides = array<i32>} : memref<16x32xf32, #tpu.memory_space<vmem>>, vector<16x8xf32>,
    %c0_295 = arith.constant 0 : index
    %c0_296 = arith.constant 0 : index
    %238 = vector.load %arg30[%c0_295, %c0_296] : memref<1x32xf32, #tpu.memory_space<vmem>>, vector<1x32xf32>
    %c0_297 = arith.constant 0 : index
    %c0_298 = arith.constant 0 : index
    %239 = vector.load %arg31[%c0_297, %c0_298] : memref<1x32xf32, #tpu.memory_space<vmem>>, vector<1x32xf32>
    %c0_299 = arith.constant 0 : index
    %c0_300 = arith.constant 0 : index
    %240 = vector.load %arg35[%c0_299, %c0_300] : memref<16x32xf32, #tpu.memory_space<vmem>>, vector<16x32xf32>
    %241 = vector.broadcast %238 : vector<1x32xf32> to vector<16x32xf32>
    %242 = arith.mulf %240, %241 : vector<16x32xf32>
    %243 = vector.broadcast %239 : vector<1x32xf32> to vector<16x32xf32>
    %244 = arith.addf %242, %243 : vector<16x32xf32>
    %cst_301 = arith.constant dense<0.000000e+00> : vector<32xf32>
    %245 = vector.multi_reduction <add>, %244, %cst_301 [0] : vector<16x32xf32> to vector<32xf32>
    %246 = vector.shape_cast %245 : vector<32xf32> to vector<1x32xf32>
    %cst_302 = arith.constant 6.250000e-02 : f32
    %247 = vector.broadcast %cst_302 : f32 to vector<1x32xf32>
    %248 = arith.mulf %246, %247 : vector<1x32xf32>
    %c0_303 = arith.constant 0 : index
    %c0_304 = arith.constant 0 : index
    %c0_305 = arith.constant 0 : index
    %249 = vector.load %arg32[%c0_303, %c0_304, %c0_305] : memref<1x1x32xf32, #tpu.memory_space<vmem>>, vector<1x1x32xf32>
    %250 = vector.shape_cast %249 : vector<1x1x32xf32> to vector<1x32xf32>
    %251 = vector.shape_cast %248 : vector<1x32xf32> to vector<1x1x32xf32>
    tpu.vector_store %arg32[%c0_303, %c0_304, %c0_305], %251 {strides = array<i32>} : memref<1x1x32xf32, #tpu.memory_space<vmem>>, vector<1x1x32xf32>,
    return
  }
  func.func @transform_0(%arg0: i32) -> (i32, i32, i32) {
    %c0_i32 = arith.constant 0 : i32
    %c0_i32_0 = arith.constant 0 : i32
    %c0_i32_1 = arith.constant 0 : i32
    return %arg0, %c0_i32, %c0_i32_0 : i32, i32, i32
  }
  func.func @transform_1(%arg0: i32) -> (i32, i32) {
    %c0_i32 = arith.constant 0 : i32
    %c0_i32_0 = arith.constant 0 : i32
    %c0_i32_1 = arith.constant 0 : i32
    return %c0_i32, %c0_i32_0 : i32, i32
  }
  func.func @transform_2(%arg0: i32) -> (i32, i32) {
    %c0_i32 = arith.constant 0 : i32
    %c0_i32_0 = arith.constant 0 : i32
    %c0_i32_1 = arith.constant 0 : i32
    return %c0_i32, %c0_i32_0 : i32, i32
  }
  func.func @transform_3(%arg0: i32) -> (i32, i32) {
    %c0_i32 = arith.constant 0 : i32
    %c0_i32_0 = arith.constant 0 : i32
    %c0_i32_1 = arith.constant 0 : i32
    return %c0_i32, %c0_i32_0 : i32, i32
  }
  func.func @transform_4(%arg0: i32) -> (i32, i32) {
    %c0_i32 = arith.constant 0 : i32
    %c0_i32_0 = arith.constant 0 : i32
    %c0_i32_1 = arith.constant 0 : i32
    return %c0_i32, %c0_i32_0 : i32, i32
  }
  func.func @transform_5(%arg0: i32) -> (i32, i32) {
    %c0_i32 = arith.constant 0 : i32
    %c0_i32_0 = arith.constant 0 : i32
    %c0_i32_1 = arith.constant 0 : i32
    return %c0_i32, %c0_i32_0 : i32, i32
  }
  func.func @transform_6(%arg0: i32) -> (i32, i32) {
    %c0_i32 = arith.constant 0 : i32
    %c0_i32_0 = arith.constant 0 : i32
    %c0_i32_1 = arith.constant 0 : i32
    return %c0_i32, %c0_i32_0 : i32, i32
  }
  func.func @transform_7(%arg0: i32) -> (i32, i32) {
    %c0_i32 = arith.constant 0 : i32
    %c0_i32_0 = arith.constant 0 : i32
    %c0_i32_1 = arith.constant 0 : i32
    return %c0_i32, %c0_i32_0 : i32, i32
  }
  func.func @transform_8(%arg0: i32) -> (i32, i32) {
    %c0_i32 = arith.constant 0 : i32
    %c0_i32_0 = arith.constant 0 : i32
    %c0_i32_1 = arith.constant 0 : i32
    return %c0_i32, %c0_i32_0 : i32, i32
  }
  func.func @transform_9(%arg0: i32) -> (i32, i32) {
    %c0_i32 = arith.constant 0 : i32
    %c0_i32_0 = arith.constant 0 : i32
    %c0_i32_1 = arith.constant 0 : i32
    return %c0_i32, %c0_i32_0 : i32, i32
  }
  func.func @transform_10(%arg0: i32) -> (i32, i32) {
    %c0_i32 = arith.constant 0 : i32
    %c0_i32_0 = arith.constant 0 : i32
    %c0_i32_1 = arith.constant 0 : i32
    return %c0_i32, %c0_i32_0 : i32, i32
  }
  func.func @transform_11(%arg0: i32) -> (i32, i32) {
    %c0_i32 = arith.constant 0 : i32
    %c0_i32_0 = arith.constant 0 : i32
    %c0_i32_1 = arith.constant 0 : i32
    return %c0_i32, %c0_i32_0 : i32, i32
  }
  func.func @transform_12(%arg0: i32) -> (i32, i32) {
    %c0_i32 = arith.constant 0 : i32
    %c0_i32_0 = arith.constant 0 : i32
    %c0_i32_1 = arith.constant 0 : i32
    return %c0_i32, %c0_i32_0 : i32, i32
  }
  func.func @transform_13(%arg0: i32) -> (i32, i32) {
    %c0_i32 = arith.constant 0 : i32
    %c0_i32_0 = arith.constant 0 : i32
    %c0_i32_1 = arith.constant 0 : i32
    return %c0_i32, %c0_i32_0 : i32, i32
  }
  func.func @transform_14(%arg0: i32) -> (i32, i32) {
    %c0_i32 = arith.constant 0 : i32
    %c0_i32_0 = arith.constant 0 : i32
    %c0_i32_1 = arith.constant 0 : i32
    return %c0_i32, %c0_i32_0 : i32, i32
  }
  func.func @transform_15(%arg0: i32) -> (i32, i32) {
    %c0_i32 = arith.constant 0 : i32
    %c0_i32_0 = arith.constant 0 : i32
    %c0_i32_1 = arith.constant 0 : i32
    return %c0_i32, %c0_i32_0 : i32, i32
  }
  func.func @transform_16(%arg0: i32) -> (i32, i32) {
    %c0_i32 = arith.constant 0 : i32
    %c0_i32_0 = arith.constant 0 : i32
    %c0_i32_1 = arith.constant 0 : i32
    return %c0_i32, %c0_i32_0 : i32, i32
  }
  func.func @transform_17(%arg0: i32) -> (i32, i32) {
    %c0_i32 = arith.constant 0 : i32
    %c0_i32_0 = arith.constant 0 : i32
    %c0_i32_1 = arith.constant 0 : i32
    return %c0_i32, %c0_i32_0 : i32, i32
  }
  func.func @transform_18(%arg0: i32) -> (i32, i32) {
    %c0_i32 = arith.constant 0 : i32
    %c0_i32_0 = arith.constant 0 : i32
    %c0_i32_1 = arith.constant 0 : i32
    return %c0_i32, %c0_i32_0 : i32, i32
  }
  func.func @transform_19(%arg0: i32) -> (i32, i32) {
    %c0_i32 = arith.constant 0 : i32
    %c0_i32_0 = arith.constant 0 : i32
    %c0_i32_1 = arith.constant 0 : i32
    return %c0_i32, %c0_i32_0 : i32, i32
  }
  func.func @transform_20(%arg0: i32) -> (i32, i32) {
    %c0_i32 = arith.constant 0 : i32
    %c0_i32_0 = arith.constant 0 : i32
    %c0_i32_1 = arith.constant 0 : i32
    return %c0_i32, %c0_i32_0 : i32, i32
  }
  func.func @transform_21(%arg0: i32) -> (i32, i32) {
    %c0_i32 = arith.constant 0 : i32
    %c0_i32_0 = arith.constant 0 : i32
    %c0_i32_1 = arith.constant 0 : i32
    return %c0_i32, %c0_i32_0 : i32, i32
  }
  func.func @transform_22(%arg0: i32) -> (i32, i32) {
    %c0_i32 = arith.constant 0 : i32
    %c0_i32_0 = arith.constant 0 : i32
    %c0_i32_1 = arith.constant 0 : i32
    return %c0_i32, %c0_i32_0 : i32, i32
  }
  func.func @transform_23(%arg0: i32) -> (i32, i32) {
    %c0_i32 = arith.constant 0 : i32
    %c0_i32_0 = arith.constant 0 : i32
    %c0_i32_1 = arith.constant 0 : i32
    return %c0_i32, %c0_i32_0 : i32, i32
  }
  func.func @transform_24(%arg0: i32) -> (i32, i32) {
    %c0_i32 = arith.constant 0 : i32
    %c0_i32_0 = arith.constant 0 : i32
    %c0_i32_1 = arith.constant 0 : i32
    return %c0_i32, %c0_i32_0 : i32, i32
  }
  func.func @transform_25(%arg0: i32) -> (i32, i32) {
    %c0_i32 = arith.constant 0 : i32
    %c0_i32_0 = arith.constant 0 : i32
    %c0_i32_1 = arith.constant 0 : i32
    return %c0_i32, %c0_i32_0 : i32, i32
  }
  func.func @transform_26(%arg0: i32) -> (i32, i32) {
    %c0_i32 = arith.constant 0 : i32
    %c0_i32_0 = arith.constant 0 : i32
    %c0_i32_1 = arith.constant 0 : i32
    return %c0_i32, %c0_i32_0 : i32, i32
  }
  func.func @transform_27(%arg0: i32) -> (i32, i32) {
    %c0_i32 = arith.constant 0 : i32
    %c0_i32_0 = arith.constant 0 : i32
    %c0_i32_1 = arith.constant 0 : i32
    return %c0_i32, %c0_i32_0 : i32, i32
  }
  func.func @transform_28(%arg0: i32) -> (i32, i32) {
    %c0_i32 = arith.constant 0 : i32
    %c0_i32_0 = arith.constant 0 : i32
    %c0_i32_1 = arith.constant 0 : i32
    return %c0_i32, %c0_i32_0 : i32, i32
  }
  func.func @transform_29(%arg0: i32) -> (i32, i32) {
    %c0_i32 = arith.constant 0 : i32
    %c0_i32_0 = arith.constant 0 : i32
    %c0_i32_1 = arith.constant 0 : i32
    return %c0_i32, %c0_i32_0 : i32, i32
  }
  func.func @transform_30(%arg0: i32) -> (i32, i32) {
    %c0_i32 = arith.constant 0 : i32
    %c0_i32_0 = arith.constant 0 : i32
    %c0_i32_1 = arith.constant 0 : i32
    return %c0_i32, %c0_i32_0 : i32, i32
  }
  func.func @transform_31(%arg0: i32) -> (i32, i32, i32) {
    %c0_i32 = arith.constant 0 : i32
    %c0_i32_0 = arith.constant 0 : i32
    %c0_i32_1 = arith.constant 0 : i32
    return %arg0, %c0_i32, %c0_i32_0 : i32, i32, i32
  }
}

</mosaic_0001>

<bundles_post_ra>
// kernel: densenet_alignment_forward.1
= control target key start
LH: loop header
LB: loop body
LE: loop exit
PB: predicated region body
PF: predicated region fallthrough
CT: control target
= control target key end

     0   :  { %s4122_s6 = smov 1   ;;  %s4123_s10 = smov 2   ;;  %s5122_s0 = inlined_call_operand.smem [shape: u32[32], index: -1, kind: input, shape index: {}] }
   0x1   :  { %s4173_s5 = sld [smem:[%s5122_s0]]   ;;  %s4124_s14 = smov 3  }
   0x2   :  { %s4178_s9 = sld [smem:[%s5122_s0 + %s4122_s6]]   ;;  %s4125_s18 = smov 4  }
   0x3   :  { %s4183_s13 = sld [smem:[%s5122_s0 + %s4123_s10]]   ;;  %s4126_s22 = smov 5  }
   0x4   :  { %s4188_s17 = sld [smem:[%s5122_s0 + %s4124_s14]]   ;;  %s4127_s26 = smov 6  }
   0x5   :  { %s4193_s21 = sld [smem:[%s5122_s0 + %s4125_s18]]   ;;  %s4128_s30 = smov 7  }
   0x6   :  { %s4198_s25 = sld [smem:[%s5122_s0 + %s4126_s22]]   ;;  %s4129_s4 = smov 8  }
   0x7   :  { %5145 = sst [smem:[#allocation10_spill]] %s4173_s5  ;;  %s4130_s10 = smov 9  }
   0x8   :  { %5146 = sst [smem:[#allocation11_spill]] %s4178_s9  ;;  %s4131_s15 = smov 10  }
   0x9   :  { %5147 = sst [smem:[#allocation12_spill]] %s4183_s13  ;;  %s4132_s20 = smov 11  }
   0xa   :  { %5148 = sst [smem:[#allocation13_spill]] %s4188_s17  ;;  %s4134_s1 = smov 13  }
   0xb   :  { %s4203_s29 = sld [smem:[%s5122_s0 + %s4127_s26]]   ;;  %s4133_s26 = smov 12  }
   0xc   :  { %s4208_s3 = sld [smem:[%s5122_s0 + %s4128_s30]]   ;;  %s4135_s7 = smov 14  }
   0xd   :  { %s4213_s8 = sld [smem:[%s5122_s0 + %s4129_s4]]   ;;  %s4137_s22 = smov 16  }
   0xe   :  { %s4218_s14 = sld [smem:[%s5122_s0 + %s4130_s10]]   ;;  %s4138_s28 = smov 17  }
   0xf   :  { %s4223_s19 = sld [smem:[%s5122_s0 + %s4131_s15]]   ;;  %s4136_s15 = smov 15  }
  0x10   :  { %s4228_s24 = sld [smem:[%s5122_s0 + %s4132_s20]]  }
  0x11   :  { %s4233_s30 = sld [smem:[%s5122_s0 + %s4133_s26]]  }
  0x12   :  { %5149 = sst [smem:[#allocation14_spill]] %s4208_s3 }
  0x13   :  { %5150 = sst [smem:[#allocation15_spill]] %s4213_s8 }
  0x14   :  { %5151 = sst [smem:[#allocation16_spill]] %s4218_s14 }
  0x15   :  { %5152 = sst [smem:[#allocation17_spill]] %s4223_s19 }
  0x16   :  { %s4238_s6 = sld [smem:[%s5122_s0 + %s4134_s1]]  }
  0x17   :  { %s4243_s12 = sld [smem:[%s5122_s0 + %s4135_s7]]   ;;  %s4139_s7 = smov 18  }
  0x18   :  { %s4248_s20 = sld [smem:[%s5122_s0 + %s4136_s15]]   ;;  %s4140_s15 = smov 19  }
  0x19   :  { %s4253_s27 = sld [smem:[%s5122_s0 + %s4137_s22]]   ;;  %s4141_s22 = smov 20  }
  0x1a   :  { %s4258_s4 = sld [smem:[%s5122_s0 + %s4138_s28]]   ;;  %s4142_s28 = smov 21  }
  0x1c   :  { %5153 = sst [smem:[#allocation18_spill]] %s4238_s6 }
  0x1d   :  { %5154 = sst [smem:[#allocation19_spill]] %s4243_s12 }
  0x1e   :  { %s4263_s12 = sld [smem:[%s5122_s0 + %s4139_s7]]   ;;  %s4143_s7 = smov 22  }
  0x1f   :  { %5155 = sst [smem:[#allocation20_spill]] %s4253_s27 }
  0x20   :  { %5156 = sst [smem:[#allocation21_spill]] %s4258_s4 }
  0x21   :  { %s4268_s6 = sld [smem:[%s5122_s0 + %s4140_s15]]   ;;  %s4144_s15 = smov 23  }
  0x22   :  { %s4273_s27 = sld [smem:[%s5122_s0 + %s4141_s22]]   ;;  %s4145_s22 = smov 24  }
  0x23   :  { %s4278_s4 = sld [smem:[%s5122_s0 + %s4142_s28]]   ;;  %s4146_s28 = smov 25  }
  0x24   :  { %5157 = sst [smem:[#allocation22_spill]] %s4263_s12 }
  0x25   :  { %s4283_s12 = sld [smem:[%s5122_s0 + %s4143_s7]]   ;;  %s4147_s7 = smov 26  }
  0x27   :  { %5158 = sst [smem:[#allocation23_spill]] %s4268_s6 }
  0x28   :  { %5159 = sst [smem:[#allocation24_spill]] %s4273_s27 }
  0x29   :  { %5160 = sst [smem:[#allocation25_spill]] %s4278_s4 }
  0x2a   :  { %s4288_s6 = sld [smem:[%s5122_s0 + %s4144_s15]]   ;;  %s4148_s15 = smov 27  }
  0x2b   :  { %5161 = sst [smem:[#allocation26_spill]] %s4283_s12 }
  0x2c   :  { %s4293_s27 = sld [smem:[%s5122_s0 + %s4145_s22]]   ;;  %s4149_s22 = smov 28  }
  0x2d   :  { %s4298_s4 = sld [smem:[%s5122_s0 + %s4146_s28]]   ;;  %s4150_s28 = smov 29  }
  0x2e   :  { %s4303_s12 = sld [smem:[%s5122_s0 + %s4147_s7]]   ;;  %s4151_s7 = smov 30  }
  0x30   :  { %5162 = sst [smem:[#allocation27_spill]] %s4288_s6 }
  0x31   :  { %s4308_s6 = sld [smem:[%s5122_s0 + %s4148_s15]]   ;;  %s4152_s15 = smov 31  }
  0x32   :  { %5163 = sst [smem:[#allocation28_spill]] %s4293_s27 }
  0x33   :  { %5164 = sst [smem:[#allocation29_spill]] %s4298_s4 }
  0x34   :  { %5165 = sst [smem:[#allocation30_spill]] %s4303_s12 }
  0x35   :  { %s4313_s27 = sld [smem:[%s5122_s0 + %s4149_s22]]  }
  0x36   :  { %s4318_s4 = sld [smem:[%s5122_s0 + %s4150_s28]]  }
  0x37   :  { %5166 = sst [smem:[#allocation31_spill]] %s4308_s6 }
  0x38   :  { %s4323_s12 = sld [smem:[%s5122_s0 + %s4151_s7]]  }
  0x39   :  { %s4328_s6 = sld [smem:[%s5122_s0 + %s4152_s15]]  }
  0x3a   :  { %68 = vsyncpa [#allocation8], 0 }
  0x3b   :  { %70 = vsyncpa [#allocation8 + $0x1], 0  ;;  %s4330_s22 = smov 0   ;;  %s4332_s23 = smov 0  }
  0x3c   :  { %s4334_s26 = smov 0   ;;  %s4336_s28 = smov 0  }
  0x3d LB: > { %s5167_s14 = sld [smem:[#allocation16_spill]]  ;;  %s4351_s0 = sadd.s32 4294967295, %s4120_s28   ;;  %s4108_s22 = sphi %s4330_s22, %s5199_s22   ;;  %s4120_s28 = sphi %s4336_s28, %s5202_s28   ;;  %s4116_s26 = sphi %s4334_s26, %s5201_s26   ;;  %s4112_s23 = sphi %s4332_s23, %s5200_s23  }
  0x3e   : > { %s3699_s1 = sadd.s32 4294967294, %s4120_s28   ;;  %s4355_s2 = sadd.s32 1, %s4120_s28  }
  0x3f   : > { %s739_s7 = sadd.s32 1, %s4116_s26  ;;  %s736_s10 = ssub.s32 %s4120_s28, %s4355_s2 }
  0x40   : > { %p749_p0 = scmp.ne.s32.totalorder %s4116_s26, %s4112_s23  ;;  %p737_p1 = scmp.eq.s32.totalorder %s736_s10, 0 }
  0x41   : > { %p750_p2 = scmp.eq.s32.totalorder %s4351_s0, 1  ;;  %p755_p3 = scmp.ne.s32.totalorder %s4112_s23, %s4108_s22 }
  0x42   : > { %p756_p4 = scmp.eq.s32.totalorder %s3699_s1, 1  ;;  %p3702_p7 = scmp.ge.s32.totalorder %s4120_s28, 1 }
  0x43   : > { %s4366_s11 = scalar_select %p737_p1, %s4116_s26, %s739_s7  }
  0x44   : > { %p4368_p5 = por %p750_p2, %p749_p0  ;;  %p4372_p6 = por %p756_p4, %p755_p3 }
  0x45   : > { %p872_p8 = scmp.lt.s32.totalorder %s4120_s28, 3 }
  0x47   : > { %p873_p9 = pnand %p3702_p7, %p872_p8 }
  0x48   : > { %s5170_s17 = sld [smem:[#allocation13_spill]] (!%p873_p9)  ;;  %p951_p10 = scmp.lt.s32.totalorder (!%p873_p9), %s4351_s0, 1 }
  0x49   : > { %876 = sbr.rel (%p873_p9) target bundleno = 3425 (0xd61), region = 144  ;;  %s5171_s5 = sld [smem:[#allocation10_spill]] (!%p873_p9) }
  0x4a   : > { %s5172_s9 = sld [smem:[#allocation11_spill]] (!%p873_p9)  ;;  %s5132_s10 = smov (!%p873_p9), 16  }
  0x4b   : > { %s5173_s13 = sld [smem:[#allocation12_spill]] (!%p873_p9) }
  0x4c   : > { %s5181_s3 = sld [smem:[#allocation14_spill]] (!%p873_p9) }
  0x4d   : > { %s5182_s8 = sld [smem:[#allocation15_spill]] (!%p873_p9) }
  0x4e   : > { %v3980_v0 = vld [vmem:[%s5170_s17] sm:$0xff]   ;;  %vm957_vm0 = vcmask 130048   ;;  %s952_s18 = scalar_select %p951_p10, %s4351_s0, 1  ;;  %vm959_vm1 = vcmask 123904   ;;  %v4153_v1 = vmov 0.0   ;;  %vm1258_vm2 = vcmask 261248  }
  0x4f   : > { %3831 = vmatprep.subr.bf16.mxu1 %v3980_v0  ;;  %965 = vst.msk [vmem:[#allocation3 + $0x30] sm:$0xff] %vm957_vm0, %v4153_v1  ;;  %958 = vst.msk [vmem:[#allocation3] sm:$0xff] %vm957_vm0, %v4153_v1  ;;  %vm1307_vm3 = vcmask 392448   ;;  %v3712_v55 = vld [vmem:[%s4193_s21] ss:$0 sm:$0xff]  ;;  %vm1356_vm4 = vcmask 523648  }
  0x50   : > { %961 = vst.msk [vmem:[#allocation3 + $0x10] sm:$0xff] %vm957_vm0, %v4153_v1  ;;  %963 = vst.msk [vmem:[#allocation3 + $0x20] sm:$0xff] %vm957_vm0, %v4153_v1  ;;  %3832 = vmatpush3.bf16.msra.mxu1 %v3980_v0  ;;  %s3798_s1 = sshll.u32 %s952_s18, 6  ;;  %v3705_v10 = vld [vmem:[%s5172_s9] ss:$0 sm:$0xff]  ;;  %s5134_s18 = smov 32  }
  0x51   : > { %967 = vst.msk [vmem:[#allocation3 + $0x40] sm:$0xff] %vm957_vm0, %v4153_v1  ;;  %969 = vst.msk [vmem:[#allocation3 + $0x50] sm:$0xff] %vm957_vm0, %v4153_v1  ;;  %s955_s7 = scalar_lea.vmem %s5171_s5, %s3798_s1  ;;  %v3706_v11 = vld [vmem:[%s5173_s13] ss:$0 sm:$0xff]  ;;  %s5126_s1 = smov 96   ;;  %vm1405_vm5 = vcmask 654848  }
  0x52   : > { %971 = vst.msk [vmem:[#allocation3 + $0x60] sm:$0xff] %vm957_vm0, %v4153_v1  ;;  %973 = vst.msk [vmem:[#allocation3 + $0x70] sm:$0xff] %vm957_vm0, %v4153_v1  ;;  %v986_v2 = vld [vmem:[%s955_s7] sm:$0xff]  ;;  %v987_v3 = vld [vmem:[%s955_s7 + $0x8] sm:$0xff]  ;;  %s5176_s5 = smov 112   ;;  %s5178_s9 = smov 64  }
  0x53   : > { %975 = vst.msk [vmem:[#allocation3 + $0x80] sm:$0xff] %vm957_vm0, %v4153_v1  ;;  %977 = vst.msk [vmem:[#allocation3 + $0x90] sm:$0xff] %vm957_vm0, %v4153_v1  ;;  %v988_v4 = vld [vmem:[%s955_s7 + $0x10] sm:$0xff]  ;;  %v989_v5 = vld [vmem:[%s955_s7 + $0x18] sm:$0xff]  ;;  %s5180_s13 = smov 80   ;;  %vm1454_vm6 = vcmask 786048  }
  0x54   : > { %966 = vst.msk [vmem:[#allocation3 + $0x38] sm:$0x3] %vm959_vm1, %v4153_v1  ;;  %960 = vst.msk [vmem:[#allocation3 + $0x8] sm:$0x3] %vm959_vm1, %v4153_v1  ;;  %v990_v6 = vld [vmem:[%s955_s7 + $0x20] sm:$0xff]  ;;  %v991_v7 = vld [vmem:[%s955_s7 + $0x28] sm:$0xff] }
  0x55   : > { %962 = vst.msk [vmem:[#allocation3 + $0x18] sm:$0x3] %vm959_vm1, %v4153_v1  ;;  %964 = vst.msk [vmem:[#allocation3 + $0x28] sm:$0x3] %vm959_vm1, %v4153_v1  ;;  %v992_v8 = vld [vmem:[%s955_s7 + $0x30] sm:$0xff]  ;;  %v993_v9 = vld [vmem:[%s955_s7 + $0x38] sm:$0xff] }
  0x56   : > { %968 = vst.msk [vmem:[#allocation3 + $0x48] sm:$0x3] %vm959_vm1, %v4153_v1  ;;  %970 = vst.msk [vmem:[#allocation3 + $0x58] sm:$0x3] %vm959_vm1, %v4153_v1  ;;  %v4448_v52 = vld [vmem:[#allocation3] sm:$0xff]  ;;  %s5128_s7 = smov 48  }
  0x57   : > { %972 = vst.msk [vmem:[#allocation3 + $0x68] sm:$0x3] %vm959_vm1, %v4153_v1  ;;  %974 = vst.msk [vmem:[#allocation3 + $0x78] sm:$0x3] %vm959_vm1, %v4153_v1  ;;  %v3713_v56 = vld [vmem:[%s4198_s25] ss:$0 sm:$0xff] }
  0x58   : > { %976 = vst.msk [vmem:[#allocation3 + $0x88] sm:$0x3] %vm959_vm1, %v4153_v1  ;;  %978 = vst.msk [vmem:[#allocation3 + $0x98] sm:$0x3] %vm959_vm1, %v4153_v1  ;;  %vm1504_vm7 = vcmask 917248   ;;  %vm1553_vm8 = vcmask 1048448  }
  0x59   : > { %994 = vst.msk [vmem:[#allocation2] sm:$0xff] %vm957_vm0, %v986_v2  ;;  %995 = vst.msk [vmem:[#allocation2 + $0x8] sm:$0xff] %vm957_vm0, %v987_v3  ;;  %vm1869_vm9 = vcmask 1043456   ;;  %vm1765_vm10 = vcmask 195712   ;;  %vm1856_vm11 = vcmask 195584   ;;  %s5183_s19 = sld [smem:[#allocation17_spill]] }
  0x5a   : > { %996 = vst.msk [vmem:[#allocation2 + $0x10] sm:$0xff] %vm957_vm0, %v988_v4  ;;  %997 = vst.msk [vmem:[#allocation2 + $0x18] sm:$0xff] %vm957_vm0, %v989_v5  ;;  %vm2537_vm12 = vcmask 261312   ;;  %vm2614_vm13 = vcmask 261120   ;;  %vm2692_vm14 = vcmask 523264   ;;  %vm4163_vm15 = vmmov 0  }
  0x5b   : > { %998 = vst.msk [vmem:[#allocation2 + $0x20] sm:$0xff] %vm957_vm0, %v990_v6  ;;  %999 = vst.msk [vmem:[#allocation2 + $0x28] sm:$0xff] %vm957_vm0, %v991_v7  ;;  %v4436_v48 = vld [vmem:[#allocation3 + $0x1] sm:$0xff]  ;;  %vm979_vm1 = vcmask 128000   ;;  %s5191_s17 = sld [smem:[#allocation25_spill]] }
  0x5c   : > { %1000 = vst.msk [vmem:[#allocation2 + $0x30] sm:$0xff] %vm957_vm0, %v992_v8  ;;  %1001 = vst.msk [vmem:[#allocation2 + $0x38] sm:$0xff] %vm957_vm0, %v993_v9  ;;  %1234 = vrot.lane.b32.xlu0 %v4436_v48, %s5132_s10  ;;  %v4440_v49 = vld [vmem:[#allocation3 + $0x2] sm:$0xff] }
  0x5d   : > { %1283 = vrot.lane.b32.xlu1 %v4440_v49, %s5134_s18  ;;  %1210 = vst.msk [vmem:[#allocation6] sm:$0xff] %vm957_vm0, %v4448_v52 }
  0x5e   : > { %981 = vst.msk [vmem:[#allocation5 + $0x8] sm:$0x3f] %vm979_vm1, %v4153_v1  ;;  %982 = vst.msk [vmem:[#allocation5 + $0x10] sm:$0x3f] %vm979_vm1, %v4153_v1 }
  0x5f   : > { %v1569_v50 = vld [vmem:[#allocation3 + $0x92] sm:$0xff]  ;;  %983 = vst.msk [vmem:[#allocation5 + $0x18] sm:$0x3f] %vm979_vm1, %v4153_v1  ;;  %985 = vst.msk [vmem:[#allocation5 + $0x28] sm:$0x3f] %vm979_vm1, %v4153_v1 }
  0x60   : > { %v1026_v12 = vld [vmem:[#allocation2] sm:$0xff]  ;;  %v1027_v13 = vld [vmem:[#allocation2 + $0x8] sm:$0xff]  ;;  %1577 = vst.msk [vmem:[#allocation6 + $0x78] sm:$0xff] %vm957_vm0, %v1569_v50 }
  0x61   : > { %v1028_v14 = vld [vmem:[#allocation2 + $0x10] sm:$0xff]  ;;  %v1040_v15 = vmul.f32 %v3705_v10, %v1026_v12  ;;  %v1041_v16 = vmul.f32 %v3705_v10, %v1027_v13  ;;  %v1029_v17 = vld [vmem:[#allocation2 + $0x18] sm:$0xff]  ;;  %980 = vst.msk [vmem:[#allocation5] sm:$0x3f] %vm979_vm1, %v4153_v1  ;;  %984 = vst.msk [vmem:[#allocation5 + $0x20] sm:$0x3f] %vm979_vm1, %v4153_v1 }
  0x62   : > { %v1042_v18 = vmul.f32 %v3705_v10, %v1028_v14  ;;  %v1030_v19 = vld [vmem:[#allocation2 + $0x20] sm:$0xff]  ;;  %v1031_v20 = vld [vmem:[#allocation2 + $0x28] sm:$0xff]  ;;  %v1043_v21 = vmul.f32 %v3705_v10, %v1029_v17 }
  0x63   : > { %v1044_v22 = vmul.f32 %v3705_v10, %v1030_v19  ;;  %v1045_v23 = vmul.f32 %v3705_v10, %v1031_v20  ;;  %v1032_v24 = vld [vmem:[#allocation2 + $0x30] sm:$0xff]  ;;  %v1033_v25 = vld [vmem:[#allocation2 + $0x38] sm:$0xff]  ;;  %v1054_v26 = vadd.f32 %v3706_v11, %v1040_v15  ;;  %v1055_v27 = vadd.f32 %v3706_v11, %v1041_v16 }
  0x64   : > { %v1056_v28 = vadd.f32 %v3706_v11, %v1042_v18  ;;  %v1046_v29 = vmul.f32 %v3705_v10, %v1032_v24  ;;  %v1057_v30 = vadd.f32 %v3706_v11, %v1043_v21  ;;  %v1047_v33 = vmul.f32 %v3705_v10, %v1033_v25 }
  0x65   : > { %v1058_v31 = vadd.f32 %v3706_v11, %v1044_v22  ;;  %v1059_v32 = vadd.f32 %v3706_v11, %v1045_v23  ;;  %v1062_v34 = vmax.f32 %v1054_v26, 0.0  ;;  %v1063_v35 = vmax.f32 %v1055_v27, 0.0 }
  0x66   : > { %v1064_v36 = vmax.f32 %v1056_v28, 0.0  ;;  %v1060_v37 = vadd.f32 %v3706_v11, %v1046_v29  ;;  %v1065_v38 = vmax.f32 %v1057_v30, 0.0  ;;  %v1061_v41 = vadd.f32 %v3706_v11, %v1047_v33 }
  0x67   : > { %v1066_v39 = vmax.f32 %v1058_v31, 0.0  ;;  %v1067_v40 = vmax.f32 %v1059_v32, 0.0  ;;  %v1070_v42 = vpack.c.bf16 %v1063_v35, %v1062_v34  ;;  %v4445_v51 = vld [vmem:[#allocation6 + $0x78] sm:$0xff] }
  0x68   : > { %v1071_v43 = vpack.c.bf16 %v1065_v38, %v1064_v36  ;;  %v1068_v45 = vmax.f32 %v1060_v37, 0.0  ;;  %v1069_v46 = vmax.f32 %v1061_v41, 0.0  ;;  %2349 = vst.msk [vmem:[#allocation6 + $0x78] sm:$0xff] %vm957_vm0, %v1569_v50  ;;  %v3981_v36 = vld [vmem:[%s4203_s29 + $0x38] sm:$0xff]  }
  0x69   : > { %v1072_v44 = vpack.c.bf16 %v1067_v40, %v1066_v39  ;;  %3833 = vmatprep.mubr.msk.bf16.mxu1 %vm957_vm0, %v1070_v42  ;;  %v4161_v39 = vmov 0   ;;  %v3982_v42 = vld [vmem:[%s4203_s29 + $0x30] sm:$0xff]  }
  0x6a   : > { %3834 = vmatmul.mubr.msk.bf16.vlgmr.msra.gmra.mxu1 %vm957_vm0, %v1071_v43  ;;  %v1073_v47 = vpack.c.bf16 %v1069_v46, %v1068_v45  ;;  %1668 = vmatprep.subr.bf16.mxu1 %v4161_v39 }
  0x6b   : > { %3837 = vmatprep.mubr.msk.bf16.mxu1 %vm957_vm0, %v1072_v44  ;;  %1669 = vmatpush1.bf16.msra.mxu1 %v3981_v36 }
  0x6c   : > { %1670 = vmatprep.subr.bf16.mxu1 %v4161_v39 }
  0x6f   : > { %1671 = vmatpush1.bf16.msra.mxu1 %v3982_v42 }
  0x70   : > { %1672 = vmatprep.subr.bf16.mxu1 %v4161_v39 }
  0x72   : > { %3838 = vmatmul.mubr.msk.bf16.gmra.mxu1 %vm957_vm0, %v1073_v47 }
  0xce   : > { %v1235_v53 = vpop.permute.xlu0 %1234 }
  0xcf   : > { %1259 = vst.msk [vmem:[#allocation6] sm:$0xff] %vm1258_vm2, %v1235_v53  ;;  %v1284_v54 = vpop.permute.xlu1 %1283  ;;  %v3983_v53 = vld [vmem:[%s4203_s29 + $0x28] sm:$0xff]  }
  0xd0   : > { %1308 = vst.msk [vmem:[#allocation6] sm:$0xff] %vm1307_vm3, %v1284_v54  ;;  %1673 = vmatpush1.bf16.msra.mxu1 %v3983_v53  ;;  %v3984_v54 = vld [vmem:[%s4203_s29 + $0x20] sm:$0xff]  }
  0xd1   : > { %1674 = vmatprep.subr.bf16.mxu1 %v4161_v39 }
  0xd4   : > { %1675 = vmatpush1.bf16.msra.mxu1 %v3984_v54 }
  0xd5   : > { %1676 = vmatprep.subr.bf16.mxu1 %v4161_v39 }
 0x12a   : > { %v3835_v57 = vpop.f32.mrf.mxu1 }
 0x12b   : > { %v1165_v58 = vmul.f32 %v3835_v57, %v3712_v55  ;;  %v3986_v57 = vld [vmem:[%s4203_s29 + $0x10] sm:$0xff]  }
 0x12c   : > { %v1126_v59 = vpop.f32.mrf.mxu1 }
 0x12d   : > { %v1179_v60 = vadd.f32 %v3713_v56, %v1165_v58  ;;  %v1163_v61 = vmul.f32 %v3712_v55, %v1126_v59  ;;  %v3987_v58 = vld [vmem:[%s4203_s29 + $0x8] sm:$0xff]  }
 0x12e   : > { %v3836_v62 = vpop.f32.mrf.mxu1 }
 0x12f   : > { %v1187_v63 = vmax.f32 %v1179_v60, 0.0  ;;  %v1177_v0 = vadd.f32 %v3713_v56, %v1163_v61  ;;  %v1166_v2 = vmul.f32 %v3836_v62, %v3712_v55  ;;  %v3988_v60 = vld [vmem:[%s4203_s29] sm:$0xff]  }
 0x130   : > { %v1129_v3 = vpop.f32.mrf.mxu1  ;;  %v3989_v61 = vld [vmem:[%s4203_s29 + $0x40] sm:$0xff]  }
 0x131   : > { %1196 = vst.msk [vmem:[#allocation3 + $0x31] sm:$0xff] %vm957_vm0, %v1187_v63  ;;  %v1185_v4 = vmax.f32 %v1177_v0, 0.0  ;;  %v1180_v5 = vadd.f32 %v3713_v56, %v1166_v2  ;;  %v1164_v6 = vmul.f32 %v3712_v55, %v1129_v3 }
 0x132   : > { %v3839_v7 = vpop.f32.mrf.mxu1 }
 0x133   : > { %1194 = vst.msk [vmem:[#allocation3 + $0x11] sm:$0xff] %vm957_vm0, %v1185_v4  ;;  %v1188_v8 = vmax.f32 %v1180_v5, 0.0  ;;  %v1178_v9 = vadd.f32 %v3713_v56, %v1164_v6  ;;  %v1169_v10 = vmul.f32 %v3839_v7, %v3712_v55  ;;  %v4601_v4 = vld [vmem:[#allocation3 + $0x90] sm:$0xff] }
 0x134   : > { %v1142_v11 = vpop.f32.mrf.mxu1  ;;  %v4606_v5 = vld [vmem:[#allocation3 + $0x91] sm:$0xff] }
 0x135   : > { %1197 = vst.msk [vmem:[#allocation3 + $0x41] sm:$0xff] %vm957_vm0, %v1188_v8  ;;  %v1186_v12 = vmax.f32 %v1178_v9, 0.0  ;;  %v1183_v13 = vadd.f32 %v3713_v56, %v1169_v10  ;;  %v1167_v14 = vmul.f32 %v3712_v55, %v1142_v11 }
 0x136   : > { %v3840_v15 = vpop.f32.mrf.mxu1 }
 0x137   : > { %1195 = vst.msk [vmem:[#allocation3 + $0x21] sm:$0xff] %vm957_vm0, %v1186_v12  ;;  %v1191_v16 = vmax.f32 %v1183_v13, 0.0  ;;  %v1181_v17 = vadd.f32 %v3713_v56, %v1167_v14  ;;  %v1170_v18 = vmul.f32 %v3840_v15, %v3712_v55 }
 0x138   : > { %v1465_v19 = vld [vmem:[#allocation3 + $0x30] sm:$0xff]  ;;  %v1145_v21 = vpop.f32.mrf.mxu1 }
 0x139   : > { %v1416_v20 = vld [vmem:[#allocation3 + $0x32] sm:$0xff]  ;;  %1200 = vst.msk [vmem:[#allocation3 + $0x71] sm:$0xff] %vm957_vm0, %v1191_v16  ;;  %v1189_v22 = vmax.f32 %v1181_v17, 0.0  ;;  %1482 = vrot.lane.b32.xlu1 %v1465_v19, %s5126_s1  ;;  %1336 = vrot.lane.b32.xlu0 %v1465_v19, %s5128_s7  ;;  %v1184_v23 = vadd.f32 %v3713_v56, %v1170_v18  ;;  %v1168_v24 = vmul.f32 %v3712_v55, %v1145_v21  ;;  %1213 = vst.msk [vmem:[#allocation6 + $0x30] sm:$0xff] %vm957_vm0, %v1465_v19  ;;  %s5130_s1 = smov 112   ;;  %s5136_s7 = smov 64  }
 0x13a   : > { %1571 = vst.msk [vmem:[#allocation6 + $0x18] sm:$0xff] %vm957_vm0, %v1416_v20  ;;  %v1316_v25 = vld [vmem:[#allocation3 + $0x10] sm:$0xff] }
 0x13b   : > { %1198 = vst.msk [vmem:[#allocation3 + $0x51] sm:$0xff] %vm957_vm0, %v1189_v22  ;;  %v1192_v26 = vmax.f32 %v1184_v23, 0.0  ;;  %v1182_v27 = vadd.f32 %v3713_v56, %v1168_v24  ;;  %1211 = vst.msk [vmem:[#allocation6 + $0x10] sm:$0xff] %vm957_vm0, %v1316_v25  ;;  %v1514_v28 = vld [vmem:[#allocation3 + $0x31] sm:$0xff] }
 0x13c   : > { %v4467_v29 = vld [vmem:[#allocation3 + $0x40] sm:$0xff]  ;;  %v1219_v40 = vld [vmem:[#allocation3 + $0x11] sm:$0xff] }
 0x13d   : > { %v4469_v30 = vld [vmem:[#allocation3 + $0x42] sm:$0xff]  ;;  %1531 = vrot.lane.b32.xlu1 %v1514_v28, %s5130_s1  ;;  %1385 = vrot.lane.b32.xlu0 %v1514_v28, %s5136_s7  ;;  %1201 = vst.msk [vmem:[#allocation3 + $0x81] sm:$0xff] %vm957_vm0, %v1192_v26  ;;  %v1190_v31 = vmax.f32 %v1182_v27, 0.0  ;;  %1214 = vst.msk [vmem:[#allocation6 + $0x40] sm:$0xff] %vm957_vm0, %v4467_v29  ;;  %s5138_s1 = smov 80   ;;  %v1268_v50 = vld [vmem:[#allocation3 + $0x12] sm:$0xff] }
 0x13e   : > { %1572 = vst.msk [vmem:[#allocation6 + $0x28] sm:$0xff] %vm957_vm0, %v4469_v30  ;;  %v4478_v32 = vld [vmem:[#allocation3 + $0x22] sm:$0xff]  ;;  %v3985_v56 = vld [vmem:[%s4203_s29 + $0x18] sm:$0xff]  }
 0x13f   : > { %v4480_v33 = vld [vmem:[#allocation3 + $0x20] sm:$0xff]  ;;  %1570 = vst.msk [vmem:[#allocation6 + $0x8] sm:$0xff] %vm957_vm0, %v4478_v32  ;;  %1199 = vst.msk [vmem:[#allocation3 + $0x61] sm:$0xff] %vm957_vm0, %v1190_v31  ;;  %1677 = vmatpush1.bf16.msra.mxu1 %v3985_v56 }
 0x140   : > { %1212 = vst.msk [vmem:[#allocation6 + $0x20] sm:$0xff] %vm957_vm0, %v4480_v33  ;;  %v4487_v34 = vld [vmem:[#allocation3 + $0x70] sm:$0xff]  ;;  %v1368_v55 = vld [vmem:[#allocation3 + $0x41] sm:$0xff]  ;;  %1678 = vmatprep.subr.bf16.mxu1 %v4161_v39 }
 0x141   : > { %1434 = vrot.lane.b32.xlu0 %v1416_v20, %s5138_s1  ;;  %1240 = vrot.lane.b32.xlu1 %v1514_v28, %s5132_s10  ;;  %v4491_v35 = vld [vmem:[#allocation3 + $0x72] sm:$0xff]  ;;  %1217 = vst.msk [vmem:[#allocation6 + $0x70] sm:$0xff] %vm957_vm0, %v4487_v34  ;;  %v1366_v59 = vld [vmem:[#allocation3 + $0x21] sm:$0xff] }
 0x142   : > { %v4496_v37 = vld [vmem:[#allocation3 + $0x50] sm:$0xff]  ;;  %1575 = vst.msk [vmem:[#allocation6 + $0x58] sm:$0xff] %vm957_vm0, %v4491_v35  ;;  %v1581_v44 = vld [vmem:[#allocation6 + $0x18] sm:$0xff] }
 0x143   : > { %v4498_v38 = vld [vmem:[#allocation3 + $0x52] sm:$0xff]  ;;  %1215 = vst.msk [vmem:[#allocation6 + $0x50] sm:$0xff] %vm957_vm0, %v4496_v37  ;;  %1679 = vmatpush1.bf16.msra.mxu1 %v3986_v57 }
 0x144   : > { %1573 = vst.msk [vmem:[#allocation6 + $0x38] sm:$0xff] %vm957_vm0, %v4498_v38  ;;  %v4507_v41 = vld [vmem:[#allocation3 + $0x82] sm:$0xff]  ;;  %1680 = vmatprep.subr.bf16.mxu1 %v4161_v39  ;;  %v1518_v62 = vld [vmem:[#allocation3 + $0x71] sm:$0xff] }
 0x145   : > { %1289 = vrot.lane.b32.xlu1 %v1416_v20, %s5134_s18  ;;  %1236 = vrot.lane.b32.xlu0 %v1219_v40, %s5132_s10  ;;  %1576 = vst.msk [vmem:[#allocation6 + $0x68] sm:$0xff] %vm957_vm0, %v4507_v41  ;;  %s5174_s10 = smov 48   ;;  %v1516_v63 = vld [vmem:[#allocation3 + $0x51] sm:$0xff]  ;;  %v1323_v0 = vld [vmem:[#allocation3 + $0x80] sm:$0xff] }
 0x146   : > { %v1579_v43 = vld [vmem:[#allocation6 + $0x8] sm:$0xff]  ;;  %v4515_v45 = vld [vmem:[#allocation3 + $0x60] sm:$0xff] }
 0x147   : > { %v1595_v46 = vpack.c.bf16 %v1581_v44, %v1579_v43  ;;  %v4517_v47 = vld [vmem:[#allocation3 + $0x62] sm:$0xff]  ;;  %1216 = vst.msk [vmem:[#allocation6 + $0x60] sm:$0xff] %vm957_vm0, %v4515_v45  ;;  %1681 = vmatpush1.bf16.msra.mxu1 %v3987_v58 }
 0x148   : > { %1574 = vst.msk [vmem:[#allocation6 + $0x48] sm:$0xff] %vm957_vm0, %v4517_v47  ;;  %1682 = vmatprep.subr.bf16.mxu1 %v4161_v39  ;;  %v1372_v2 = vld [vmem:[#allocation3 + $0x81] sm:$0xff] }
 0x149   : > { %1285 = vrot.lane.b32.xlu1 %v1268_v50, %s5134_s18  ;;  %1332 = vrot.lane.b32.xlu0 %v1316_v25, %s5174_s10  ;;  %s5175_s18 = smov 96   ;;  %v1517_v3 = vld [vmem:[#allocation3 + $0x61] sm:$0xff]  ;;  %v1589_v53 = vld [vmem:[#allocation6 + $0x58] sm:$0xff] }
 0x14a   : > { %3723 = vmatprep.mubr.msk.bf16.mxu1 %vm957_vm0, %v1595_v46 }
 0x14b   : > { %1683 = vmatpush1.bf16.msra.mxu1 %v3988_v60 }
 0x14c   : > { %1698 = vmatprep.subr.bf16.mxu1 %v4161_v39 }
 0x14d   : > { %1381 = vrot.lane.b32.xlu0 %v1219_v40, %s5136_s7  ;;  %1338 = vrot.lane.b32.xlu1 %v4467_v29, %s5174_s10 }
 0x14f   : > { %1699 = vmatpush2.bf16.msra.mxu1 %v3989_v61 }
 0x151   : > { %1430 = vrot.lane.b32.xlu0 %v1268_v50, %s5138_s1  ;;  %1387 = vrot.lane.b32.xlu1 %v1368_v55, %s5136_s7  ;;  %s5177_s7 = smov 16   ;;  %v1587_v50 = vld [vmem:[#allocation6 + $0x48] sm:$0xff] }
 0x155   : > { %1484 = vrot.lane.b32.xlu0 %v4467_v29, %s5175_s18  ;;  %1436 = vrot.lane.b32.xlu1 %v4469_v30, %s5138_s1  ;;  %s5179_s1 = smov 32  }
 0x159   : > { %1533 = vrot.lane.b32.xlu0 %v1368_v55, %s5176_s5  ;;  %1334 = vrot.lane.b32.xlu1 %v4480_v33, %s5174_s10 }
 0x15d   : > { %1242 = vrot.lane.b32.xlu0 %v1368_v55, %s5177_s7  ;;  %1383 = vrot.lane.b32.xlu1 %v1366_v59, %s5178_s9 }
 0x161   : > { %1291 = vrot.lane.b32.xlu0 %v4469_v30, %s5179_s1  ;;  %1432 = vrot.lane.b32.xlu1 %v4478_v32, %s5180_s13 }
 0x165   : > { %1480 = vrot.lane.b32.xlu0 %v4480_v33, %s5175_s18  ;;  %1490 = vrot.lane.b32.xlu1 %v4487_v34, %s5175_s18 }
 0x169   : > { %1529 = vrot.lane.b32.xlu0 %v1366_v59, %s5176_s5  ;;  %1539 = vrot.lane.b32.xlu1 %v1518_v62, %s5176_s5 }
 0x16d   : > { %1238 = vrot.lane.b32.xlu0 %v1366_v59, %s5177_s7  ;;  %1248 = vrot.lane.b32.xlu1 %v1518_v62, %s5177_s7  ;;  %v1599_v59 = vpack.c.bf16 %v1589_v53, %v1587_v50 }
 0x171   : > { %1287 = vrot.lane.b32.xlu0 %v4478_v32, %s5179_s1  ;;  %1297 = vrot.lane.b32.xlu1 %v4491_v35, %s5179_s1 }
 0x175   : > { %1344 = vrot.lane.b32.xlu0 %v4487_v34, %s5174_s10  ;;  %1486 = vrot.lane.b32.xlu1 %v4496_v37, %s5175_s18  ;;  %v1585_v34 = vld [vmem:[#allocation6 + $0x38] sm:$0xff] }
 0x179   : > { %1393 = vrot.lane.b32.xlu0 %v1518_v62, %s5178_s9  ;;  %1535 = vrot.lane.b32.xlu1 %v1516_v63, %s5176_s5 }
 0x17d   : > { %1442 = vrot.lane.b32.xlu0 %v4491_v35, %s5180_s13  ;;  %1244 = vrot.lane.b32.xlu1 %v1516_v63, %s5177_s7 }
 0x181   : > { %1340 = vrot.lane.b32.xlu0 %v4496_v37, %s5174_s10  ;;  %1293 = vrot.lane.b32.xlu1 %v4498_v38, %s5179_s1 }
 0x185   : > { %1389 = vrot.lane.b32.xlu0 %v1516_v63, %s5178_s9  ;;  %1346 = vrot.lane.b32.xlu1 %v1323_v0, %s5174_s10 }
 0x189   : > { %1438 = vrot.lane.b32.xlu0 %v4498_v38, %s5180_s13  ;;  %1395 = vrot.lane.b32.xlu1 %v1372_v2, %s5178_s9 }
 0x18d   : > { %1488 = vrot.lane.b32.xlu0 %v4515_v45, %s5175_s18  ;;  %1342 = vrot.lane.b32.xlu1 %v4515_v45, %s5174_s10 }
 0x191   : > { %1537 = vrot.lane.b32.xlu0 %v1517_v3, %s5176_s5  ;;  %1391 = vrot.lane.b32.xlu1 %v1517_v3, %s5178_s9 }
 0x195   : > { %1440 = vrot.lane.b32.xlu1 %v4517_v47, %s5180_s13  ;;  %1246 = vrot.lane.b32.xlu0 %v1517_v3, %s5177_s7 }
 0x199   : > { %1444 = vrot.lane.b32.xlu1 %v4507_v41, %s5180_s13  ;;  %1295 = vrot.lane.b32.xlu0 %v4517_v47, %s5179_s1  ;;  %v1583_v41 = vld [vmem:[#allocation6 + $0x28] sm:$0xff] }
 0x19a   : > { %v1597_v42 = vpack.c.bf16 %v1585_v34, %v1583_v41 }
 0x19d   : > { %1494 = vrot.lane.b32.xlu1 %v4601_v4, %s5175_s18  ;;  %1492 = vrot.lane.b32.xlu0 %v1323_v0, %s5175_s18 }
 0x1a1   : > { %1543 = vrot.lane.b32.xlu1 %v4606_v5, %s5176_s5  ;;  %1541 = vrot.lane.b32.xlu0 %v1372_v2, %s5176_s5 }
 0x1ab   : > { %v1483_v6 = vpop.permute.xlu1 %1482  ;;  %v4611_v7 = vpop.permute.xlu0 %1336 }
 0x1af   : > { %v1532_v8 = vpop.permute.xlu1 %1531  ;;  %v4613_v9 = vpop.permute.xlu0 %1385 }
 0x1b3   : > { %v4615_v10 = vpop.permute.xlu0 %1434  ;;  %v1241_v11 = vpop.permute.xlu1 %1240 }
 0x1b4   : > { %1262 = vst.msk [vmem:[#allocation6 + $0x30] sm:$0xff] %vm1258_vm2, %v1241_v11 }
 0x1b7   : > { %v1290_v12 = vpop.permute.xlu1 %1289  ;;  %v1237_v13 = vpop.permute.xlu0 %1236 }
 0x1b8   : > { %1311 = vst.msk [vmem:[#allocation6 + $0x30] sm:$0xff] %vm1307_vm3, %v1290_v12 }
 0x1b9   : > { %1260 = vst.msk [vmem:[#allocation6 + $0x10] sm:$0xff] %vm1258_vm2, %v1237_v13  ;;  %v1591_v13 = vld [vmem:[#allocation6 + $0x68] sm:$0xff] }
 0x1bb   : > { %v1286_v14 = vpop.permute.xlu1 %1285  ;;  %v1333_v15 = vpop.permute.xlu0 %1332 }
 0x1bc   : > { %1309 = vst.msk [vmem:[#allocation6 + $0x10] sm:$0xff] %vm1307_vm3, %v1286_v14 }
 0x1bd   : > { %1357 = vst.msk [vmem:[#allocation6] sm:$0xff] %vm1356_vm4, %v1333_v15 }
 0x1bf   : > { %v1382_v16 = vpop.permute.xlu0 %1381  ;;  %v1339_v17 = vpop.permute.xlu1 %1338 }
 0x1c0   : > { %1406 = vst.msk [vmem:[#allocation6] sm:$0xff] %vm1405_vm5, %v1382_v16 }
 0x1c1   : > { %1360 = vst.msk [vmem:[#allocation6 + $0x30] sm:$0xff] %vm1356_vm4, %v1339_v17 }
 0x1c3   : > { %v1431_v18 = vpop.permute.xlu0 %1430  ;;  %v1388_v19 = vpop.permute.xlu1 %1387 }
 0x1c4   : > { %1455 = vst.msk [vmem:[#allocation6] sm:$0xff] %vm1454_vm6, %v1431_v18 }
 0x1c5   : > { %1409 = vst.msk [vmem:[#allocation6 + $0x30] sm:$0xff] %vm1405_vm5, %v1388_v19  ;;  %v1601_v19 = vpack.c.bf16 %v4445_v51, %v1591_v13 }
 0x1c7   : > { %v1485_v20 = vpop.permute.xlu0 %1484  ;;  %v1437_v21 = vpop.permute.xlu1 %1436 }
 0x1c8   : > { %1458 = vst.msk [vmem:[#allocation6 + $0x30] sm:$0xff] %vm1454_vm6, %v1437_v21 }
 0x1cb   : > { %v1534_v22 = vpop.permute.xlu0 %1533  ;;  %v1335_v23 = vpop.permute.xlu1 %1334 }
 0x1cc   : > { %1358 = vst.msk [vmem:[#allocation6 + $0x10] sm:$0xff] %vm1356_vm4, %v1335_v23 }
 0x1cf   : > { %v1243_v24 = vpop.permute.xlu0 %1242  ;;  %v1384_v25 = vpop.permute.xlu1 %1383 }
 0x1d0   : > { %1263 = vst.msk [vmem:[#allocation6 + $0x40] sm:$0xff] %vm1258_vm2, %v1243_v24 }
 0x1d1   : > { %1407 = vst.msk [vmem:[#allocation6 + $0x10] sm:$0xff] %vm1405_vm5, %v1384_v25 }
 0x1d3   : > { %v1292_v26 = vpop.permute.xlu0 %1291  ;;  %v1433_v27 = vpop.permute.xlu1 %1432 }
 0x1d4   : > { %1312 = vst.msk [vmem:[#allocation6 + $0x40] sm:$0xff] %vm1307_vm3, %v1292_v26  ;;  %v3990_v26 = vld [vmem:[%s5167_s14 + $0x8] ss:$0 sps:$4 sm:$0xff]  }
 0x1d5   : > { %1456 = vst.msk [vmem:[#allocation6 + $0x10] sm:$0xff] %vm1454_vm6, %v1433_v27  ;;  %v3991_v27 = vld [vmem:[%s5167_s14] sm:$0xff]   ;;  %3898 = vmatprep.subr.msk.bf16.mxu0 %vm1869_vm9, %v3990_v26  ;;  %s5185_s14 = sld [smem:[#allocation19_spill]] }
 0x1d6   : > { %1506 = vst.msk [vmem:[#allocation6 + $0x10] sm:$0xff] %vm1504_vm7, %v1483_v6 }
 0x1d7   : > { %1555 = vst.msk [vmem:[#allocation6 + $0x10] sm:$0xff] %vm1553_vm8, %v1532_v8  ;;  %v1481_v28 = vpop.permute.xlu0 %1480  ;;  %v4634_v29 = vpop.permute.xlu1 %1490 }
 0x1d8   : > { %1505 = vst.msk [vmem:[#allocation6] sm:$0xff] %vm1504_vm7, %v1481_v28  ;;  %v1871_v28 = vsel %vm1869_vm9, %v3990_v26, 0 }
 0x1d9   : > { %3842 = vmatpush3.bf16.msra.mxu0 %v1871_v28 }
 0x1da   : > { %3843 = vmatprep.subr.bf16.mxu0 %v3991_v27 }
 0x1db   : > { %v1530_v30 = vpop.permute.xlu0 %1529  ;;  %v4637_v31 = vpop.permute.xlu1 %1539 }
 0x1dc   : > { %1554 = vst.msk [vmem:[#allocation6] sm:$0xff] %vm1553_vm8, %v1530_v30 }
 0x1dd   : > { %3844 = vmatpush3.bf16.msra.mxu0 %v3991_v27 }
 0x1de   : > { %v1580_v38 = vld [vmem:[#allocation6 + $0x10] sm:$0xff]  ;;  %2440 = vmatprep.subr.bf16.mxu0 %v4161_v39 }
 0x1df   : > { %v1239_v32 = vpop.permute.xlu0 %1238  ;;  %v1249_v33 = vpop.permute.xlu1 %1248 }
 0x1e0   : > { %1261 = vst.msk [vmem:[#allocation6 + $0x20] sm:$0xff] %vm1258_vm2, %v1239_v32  ;;  %1266 = vst.msk [vmem:[#allocation6 + $0x70] sm:$0xff] %vm1258_vm2, %v1249_v33 }
 0x1e3   : > { %v1288_v35 = vpop.permute.xlu0 %1287  ;;  %v1298_v36 = vpop.permute.xlu1 %1297  ;;  %v1578_v37 = vld [vmem:[#allocation6] sm:$0xff] }
 0x1e4   : > { %1310 = vst.msk [vmem:[#allocation6 + $0x20] sm:$0xff] %vm1307_vm3, %v1288_v35  ;;  %1315 = vst.msk [vmem:[#allocation6 + $0x70] sm:$0xff] %vm1307_vm3, %v1298_v36  ;;  %v1594_v40 = vpack.c.bf16 %v1580_v38, %v1578_v37 }
 0x1e5   : > { %1990 = vst.msk [vmem:[#allocation6] sm:$0xff] %vm957_vm0, %v4448_v52 }
 0x1e6   : > { %1359 = vst.msk [vmem:[#allocation6 + $0x20] sm:$0xff] %vm1356_vm4, %v4611_v7  ;;  %1701 = vmatmul.mubr.bf16.vlgmr.msra.gmra.mxu1 %v1594_v40 }
 0x1e7   : > { %1408 = vst.msk [vmem:[#allocation6 + $0x20] sm:$0xff] %vm1405_vm5, %v4613_v9  ;;  %v1345_v43 = vpop.permute.xlu0 %1344  ;;  %3724 = vmatprep.mubr.msk.bf16.mxu1 %vm957_vm0, %v1597_v42  ;;  %v1487_v44 = vpop.permute.xlu1 %1486 }
 0x1e8   : > { %1457 = vst.msk [vmem:[#allocation6 + $0x20] sm:$0xff] %vm1454_vm6, %v4615_v10 }
 0x1e9   : > { %1507 = vst.msk [vmem:[#allocation6 + $0x20] sm:$0xff] %vm1504_vm7, %v1485_v20  ;;  %1508 = vst.msk [vmem:[#allocation6 + $0x30] sm:$0xff] %vm1504_vm7, %v1487_v44  ;;  %v3727_v44 = vld [vmem:[%s5181_s3] ss:$0 sm:$0xff]  ;;  %s5141_s3 = smov 24  }
 0x1ea   : > { %1556 = vst.msk [vmem:[#allocation6 + $0x20] sm:$0xff] %vm1553_vm8, %v1534_v22 }
 0x1eb   : > { %v1394_v52 = vpop.permute.xlu0 %1393  ;;  %v1536_v45 = vpop.permute.xlu1 %1535 }
 0x1ec   : > { %1557 = vst.msk [vmem:[#allocation6 + $0x30] sm:$0xff] %vm1553_vm8, %v1536_v45 }
 0x1ef   : > { %v1443_v46 = vpop.permute.xlu0 %1442  ;;  %v1245_v47 = vpop.permute.xlu1 %1244 }
 0x1f0   : > { %1264 = vst.msk [vmem:[#allocation6 + $0x50] sm:$0xff] %vm1258_vm2, %v1245_v47 }
 0x1f1   : > { %v1582_v56 = vld [vmem:[#allocation6 + $0x20] sm:$0xff] }
 0x1f3   : > { %v1341_v54 = vpop.permute.xlu0 %1340  ;;  %v1294_v55 = vpop.permute.xlu1 %1293  ;;  %v1584_v57 = vld [vmem:[#allocation6 + $0x30] sm:$0xff] }
 0x1f4   : > { %1361 = vst.msk [vmem:[#allocation6 + $0x40] sm:$0xff] %vm1356_vm4, %v1341_v54  ;;  %v1596_v58 = vpack.c.bf16 %v1584_v57, %v1582_v56 }
 0x1f5   : > { %1313 = vst.msk [vmem:[#allocation6 + $0x50] sm:$0xff] %vm1307_vm3, %v1294_v55 }
 0x1f6   : > { %1709 = vmatmul.mubr.bf16.gmra.mxu1 %v1596_v58 }
 0x1f7   : > { %v1390_v60 = vpop.permute.xlu0 %1389  ;;  %v1347_v61 = vpop.permute.xlu1 %1346  ;;  %3725 = vmatprep.mubr.msk.bf16.mxu1 %vm957_vm0, %v1599_v59 }
 0x1f8   : > { %1410 = vst.msk [vmem:[#allocation6 + $0x40] sm:$0xff] %vm1405_vm5, %v1390_v60 }
 0x1f9   : > { %1364 = vst.msk [vmem:[#allocation6 + $0x70] sm:$0xff] %vm1356_vm4, %v1347_v61 }
 0x1fb   : > { %v1439_v62 = vpop.permute.xlu0 %1438  ;;  %v1396_v63 = vpop.permute.xlu1 %1395 }
 0x1fc   : > { %1459 = vst.msk [vmem:[#allocation6 + $0x40] sm:$0xff] %vm1454_vm6, %v1439_v62 }
 0x1fd   : > { %1413 = vst.msk [vmem:[#allocation6 + $0x70] sm:$0xff] %vm1405_vm5, %v1396_v63 }
 0x1ff   : > { %v1489_v0 = vpop.permute.xlu0 %1488  ;;  %v1343_v2 = vpop.permute.xlu1 %1342 }
 0x200   : > { %1509 = vst.msk [vmem:[#allocation6 + $0x40] sm:$0xff] %vm1504_vm7, %v1489_v0 }
 0x201   : > { %1362 = vst.msk [vmem:[#allocation6 + $0x50] sm:$0xff] %vm1356_vm4, %v1343_v2 }
 0x203   : > { %v1538_v3 = vpop.permute.xlu0 %1537  ;;  %v1392_v6 = vpop.permute.xlu1 %1391 }
 0x204   : > { %1558 = vst.msk [vmem:[#allocation6 + $0x40] sm:$0xff] %vm1553_vm8, %v1538_v3 }
 0x205   : > { %1411 = vst.msk [vmem:[#allocation6 + $0x50] sm:$0xff] %vm1405_vm5, %v1392_v6 }
 0x207   : > { %v1441_v7 = vpop.permute.xlu1 %1440  ;;  %v1247_v8 = vpop.permute.xlu0 %1246 }
 0x208   : > { %1460 = vst.msk [vmem:[#allocation6 + $0x50] sm:$0xff] %vm1454_vm6, %v1441_v7 }
 0x209   : > { %1265 = vst.msk [vmem:[#allocation6 + $0x60] sm:$0xff] %vm1258_vm2, %v1247_v8 }
 0x20a   : > { %1510 = vst.msk [vmem:[#allocation6 + $0x50] sm:$0xff] %vm1504_vm7, %v4634_v29 }
 0x20b   : > { %1559 = vst.msk [vmem:[#allocation6 + $0x50] sm:$0xff] %vm1553_vm8, %v4637_v31  ;;  %v1445_v9 = vpop.permute.xlu1 %1444  ;;  %v1296_v10 = vpop.permute.xlu0 %1295  ;;  %v1586_v14 = vld [vmem:[#allocation6 + $0x40] sm:$0xff] }
 0x20c   : > { %1462 = vst.msk [vmem:[#allocation6 + $0x70] sm:$0xff] %vm1454_vm6, %v1445_v9 }
 0x20d   : > { %1314 = vst.msk [vmem:[#allocation6 + $0x60] sm:$0xff] %vm1307_vm3, %v1296_v10 }
 0x20e   : > { %1363 = vst.msk [vmem:[#allocation6 + $0x60] sm:$0xff] %vm1356_vm4, %v1345_v43 }
 0x20f   : > { %1412 = vst.msk [vmem:[#allocation6 + $0x60] sm:$0xff] %vm1405_vm5, %v1394_v52  ;;  %v1495_v11 = vpop.permute.xlu1 %1494  ;;  %v1493_v12 = vpop.permute.xlu0 %1492 }
 0x210   : > { %1461 = vst.msk [vmem:[#allocation6 + $0x60] sm:$0xff] %vm1454_vm6, %v1443_v46  ;;  %v3728_v46 = vld [vmem:[%s5182_s8] ss:$0 sm:$0xff]  ;;  %s5184_s8 = sld [smem:[#allocation18_spill]] }
 0x211   : > { %1512 = vst.msk [vmem:[#allocation6 + $0x70] sm:$0xff] %vm1504_vm7, %v1495_v11  ;;  %1511 = vst.msk [vmem:[#allocation6 + $0x60] sm:$0xff] %vm1504_vm7, %v1493_v12 }
 0x212   : > { %v1588_v15 = vld [vmem:[#allocation6 + $0x50] sm:$0xff] }
 0x213   : > { %v1598_v16 = vpack.c.bf16 %v1588_v15, %v1586_v14  ;;  %v1544_v17 = vpop.permute.xlu1 %1543  ;;  %v1542_v18 = vpop.permute.xlu0 %1541 }
 0x214   : > { %1561 = vst.msk [vmem:[#allocation6 + $0x70] sm:$0xff] %vm1553_vm8, %v1544_v17  ;;  %1560 = vst.msk [vmem:[#allocation6 + $0x60] sm:$0xff] %vm1553_vm8, %v1542_v18 }
 0x215   : > { %1717 = vmatmul.mubr.bf16.gmra.mxu1 %v1598_v16 }
 0x216   : > { %3726 = vmatprep.mubr.msk.bf16.mxu1 %vm957_vm0, %v1601_v19 }
 0x21b   : > { %v1590_v20 = vld [vmem:[#allocation6 + $0x60] sm:$0xff]  ;;  %v1592_v21 = vld [vmem:[#allocation6 + $0x70] sm:$0xff] }
 0x21c   : > { %v1600_v22 = vpack.c.bf16 %v1592_v21, %v1590_v20 }
 0x21e   : > { %1725 = vmatmul.mubr.bf16.gmra.mxu1 %v1600_v22 }
 0x2a6   : > { %v1702_v23 = vpop.f32.mrf.mxu1 }
 0x2a7   : > { %1741 = vrot.lane.b32.xlu0 %v1702_v23, %s5177_s7 }
 0x2a8   : > { %v1704_v24 = vpop.f32.mrf.mxu1 }
 0x2aa   : > { %v1705_v25 = vpop.f32.mrf.mxu1 }
 0x2ab   : > { %1743 = vrot.lane.b32.xlu1 %v1705_v25, %s5177_s7 }
 0x2ac   : > { %v1707_v51 = vpop.f32.mrf.mxu1 }
 0x2b6   : > { %v1710_v29 = vpop.f32.mrf.mxu1 }
 0x2b7   : > { %1745 = vrot.lane.b32.xlu0 %v1710_v29, %s5177_s7  ;;  %v4720_v29 = vld [vmem:[%s5183_s19] ss:$0 sm:$0xff]  ;;  %s5192_s19 = sld [smem:[#allocation26_spill]] }
 0x2b8   : > { %v1712_v30 = vpop.f32.mrf.mxu1 }
 0x2b9   : > { %v4723_v30 = vld [vmem:[%s4228_s24] ss:$0 sm:$0xff] }
 0x2ba   : > { %v1713_v31 = vpop.f32.mrf.mxu1 }
 0x2bb   : > { %1747 = vrot.lane.b32.xlu1 %v1713_v31, %s5177_s7 }
 0x2bc   : > { %v1715_v32 = vpop.f32.mrf.mxu1 }
 0x2d5   : > { %v1718_v33 = vpop.f32.mrf.mxu1 }
 0x2d6   : > { %1749 = vrot.lane.b32.xlu0 %v1718_v33, %s5177_s7 }
 0x2d7   : > { %v1720_v34 = vpop.f32.mrf.mxu1 }
 0x2d9   : > { %v1721_v35 = vpop.f32.mrf.mxu1 }
 0x2da   : > { %1751 = vrot.lane.b32.xlu1 %v1721_v35, %s5177_s7 }
 0x2db   : > { %v1723_v36 = vpop.f32.mrf.mxu1 }
 0x2de   : > { %v1726_v37 = vpop.f32.mrf.mxu1 }
 0x2df   : > { %1753 = vrot.lane.b32.xlu0 %v1726_v37, %s5177_s7 }
 0x2e0   : > { %v1728_v38 = vpop.f32.mrf.mxu1 }
 0x2e2   : > { %v1729_v40 = vpop.f32.mrf.mxu1 }
 0x2e3   : > { %1755 = vrot.lane.b32.xlu1 %v1729_v40, %s5177_s7  ;;  %2014 = vrot.lane.b32.xlu0 %v4436_v48, %s5177_s7 }
 0x2e4   : > { %v1731_v41 = vpop.f32.mrf.mxu1 }
 0x2e7   : > { %2062 = vrot.lane.b32.xlu0 %v4440_v49, %s5179_s1 }
 0x319   : > { %v1742_v42 = vpop.permute.xlu0 %1741 }
 0x31a   : > { %1766 = vst.msk [vmem:[#allocation2] sm:$0xff] %vm1765_vm10, %v1742_v42 }
 0x31d   : > { %v1744_v43 = vpop.permute.xlu1 %1743 }
 0x31e   : > { %1767 = vst.msk [vmem:[#allocation2 + $0x8] sm:$0xff] %vm1765_vm10, %v1744_v43 }
 0x321   : > { %v1799_v52 = vld [vmem:[#allocation2] sm:$0xff] }
 0x322   : > { %v1813_v45 = vmul.f32 %v3727_v44, %v1799_v52 }
 0x324   : > { %v1827_v53 = vadd.f32 %v3728_v46, %v1813_v45 }
 0x325   : > { %v1800_v47 = vld [vmem:[#allocation2 + $0x8] sm:$0xff] }
 0x326   : > { %v1814_v50 = vmul.f32 %v3727_v44, %v1800_v47  ;;  %v1835_v55 = vmax.f32 %v1827_v53, 0.0 }
 0x328   : > { %v1828_v54 = vadd.f32 %v3728_v46, %v1814_v50 }
 0x329   : > { %v1746_v48 = vpop.permute.xlu0 %1745 }
 0x32a   : > { %1768 = vst.msk [vmem:[#allocation2 + $0x10] sm:$0xff] %vm1765_vm10, %v1746_v48  ;;  %v1836_v49 = vmax.f32 %v1828_v54, 0.0 }
 0x32c   : > { %v1843_v56 = vpack.c.bf16 %v1836_v49, %v1835_v55 }
 0x32d   : > { %v1748_v57 = vpop.permute.xlu1 %1747 }
 0x32e   : > { %1769 = vst.msk [vmem:[#allocation2 + $0x18] sm:$0xff] %vm1765_vm10, %v1748_v57  ;;  %3845 = vmatprep.mubr.msk.bf16.mxu0 %vm1856_vm11, %v1843_v56  ;;  %v3992_v57 = vld [vmem:[%s4233_s30 + $0x38] sm:$0xff]  }
 0x331   : > { %v1801_v58 = vld [vmem:[#allocation2 + $0x10] sm:$0xff] }
 0x332   : > { %v1815_v59 = vmul.f32 %v3727_v44, %v1801_v58  ;;  %v3993_v58 = vld [vmem:[%s4233_s30 + $0x30] sm:$0xff]  }
 0x334   : > { %v1829_v62 = vadd.f32 %v3728_v46, %v1815_v59 }
 0x335   : > { %v1802_v60 = vld [vmem:[#allocation2 + $0x18] sm:$0xff] }
 0x336   : > { %v1816_v61 = vmul.f32 %v3727_v44, %v1802_v60  ;;  %v1837_v0 = vmax.f32 %v1829_v62, 0.0 }
 0x338   : > { %v1830_v63 = vadd.f32 %v3728_v46, %v1816_v61 }
 0x33a   : > { %v1838_v2 = vmax.f32 %v1830_v63, 0.0  ;;  %v3994_v63 = vld [vmem:[%s4233_s30 + $0x28] sm:$0xff]  }
 0x33c   : > { %v1844_v3 = vpack.c.bf16 %v1838_v2, %v1837_v0  ;;  %v3995_v2 = vld [vmem:[%s4233_s30 + $0x20] sm:$0xff]  }
 0x33e   : > { %3846 = vmatmul.mubr.msk.bf16.vlgmr.msra.gmra.mxu0 %vm1856_vm11, %v1844_v3  ;;  %v3996_v3 = vld [vmem:[%s4233_s30 + $0x18] sm:$0xff]  }
 0x33f   : > { %2441 = vmatpush1.bf16.msra.mxu0 %v3992_v57 }
 0x340   : > { %2442 = vmatprep.subr.bf16.mxu0 %v4161_v39 }
 0x343   : > { %2443 = vmatpush1.bf16.msra.mxu0 %v3993_v58 }
 0x344   : > { %2444 = vmatprep.subr.bf16.mxu0 %v4161_v39 }
 0x347   : > { %2445 = vmatpush1.bf16.msra.mxu0 %v3994_v63 }
 0x348   : > { %v1750_v6 = vpop.permute.xlu0 %1749  ;;  %2446 = vmatprep.subr.bf16.mxu0 %v4161_v39 }
 0x349   : > { %1770 = vst.msk [vmem:[#allocation2 + $0x20] sm:$0xff] %vm1765_vm10, %v1750_v6 }
 0x34b   : > { %2447 = vmatpush1.bf16.msra.mxu0 %v3995_v2 }
 0x34c   : > { %v1752_v7 = vpop.permute.xlu1 %1751  ;;  %2448 = vmatprep.subr.bf16.mxu0 %v4161_v39 }
 0x34d   : > { %1771 = vst.msk [vmem:[#allocation2 + $0x28] sm:$0xff] %vm1765_vm10, %v1752_v7 }
 0x34f   : > { %2449 = vmatpush1.bf16.msra.mxu0 %v3996_v3 }
 0x350   : > { %v1803_v8 = vld [vmem:[#allocation2 + $0x20] sm:$0xff]  ;;  %2450 = vmatprep.subr.bf16.mxu0 %v4161_v39 }
 0x351   : > { %v1817_v9 = vmul.f32 %v3727_v44, %v1803_v8  ;;  %v1754_v10 = vpop.permute.xlu0 %1753 }
 0x352   : > { %1772 = vst.msk [vmem:[#allocation2 + $0x30] sm:$0xff] %vm1765_vm10, %v1754_v10  ;;  %v3997_v10 = vld [vmem:[%s4233_s30 + $0x10] sm:$0xff]  }
 0x353   : > { %v1831_v13 = vadd.f32 %v3728_v46, %v1817_v9  ;;  %2451 = vmatpush1.bf16.msra.mxu0 %v3997_v10 }
 0x354   : > { %v1804_v11 = vld [vmem:[#allocation2 + $0x28] sm:$0xff]  ;;  %2452 = vmatprep.subr.bf16.mxu0 %v4161_v39 }
 0x355   : > { %v1818_v12 = vmul.f32 %v3727_v44, %v1804_v11  ;;  %v1756_v14 = vpop.permute.xlu1 %1755  ;;  %v1839_v16 = vmax.f32 %v1831_v13, 0.0  ;;  %v2015_v27 = vpop.permute.xlu0 %2014 }
 0x356   : > { %1773 = vst.msk [vmem:[#allocation2 + $0x38] sm:$0xff] %vm1765_vm10, %v1756_v14 }
 0x357   : > { %v1832_v15 = vadd.f32 %v3728_v46, %v1818_v12  ;;  %2038 = vst.msk [vmem:[#allocation6] sm:$0xff] %vm1258_vm2, %v2015_v27 }
 0x359   : > { %v1840_v17 = vmax.f32 %v1832_v15, 0.0  ;;  %v1805_v18 = vld [vmem:[#allocation2 + $0x30] sm:$0xff]  ;;  %v2063_v28 = vpop.permute.xlu0 %2062 }
 0x35a   : > { %v1819_v20 = vmul.f32 %v3727_v44, %v1805_v18  ;;  %2086 = vst.msk [vmem:[#allocation6] sm:$0xff] %vm1307_vm3, %v2063_v28  ;;  %v3998_v18 = vld [vmem:[%s4233_s30 + $0x8] sm:$0xff]   ;;  %v4000_v28 = vld [vmem:[%s4233_s30 + $0x40] sm:$0xff]  }
 0x35b   : > { %v1845_v19 = vpack.c.bf16 %v1840_v17, %v1839_v16  ;;  %2453 = vmatpush1.bf16.msra.mxu0 %v3998_v18 }
 0x35c   : > { %v1833_v23 = vadd.f32 %v3728_v46, %v1819_v20  ;;  %2454 = vmatprep.subr.bf16.mxu0 %v4161_v39 }
 0x35d   : > { %3849 = vmatprep.mubr.msk.bf16.mxu0 %vm1856_vm11, %v1845_v19  ;;  %v1806_v21 = vld [vmem:[#allocation2 + $0x38] sm:$0xff] }
 0x35e   : > { %v1820_v22 = vmul.f32 %v3727_v44, %v1806_v21  ;;  %v1841_v25 = vmax.f32 %v1833_v23, 0.0 }
 0x360   : > { %v1834_v24 = vadd.f32 %v3728_v46, %v1820_v22 }
 0x362   : > { %v1842_v51 = vmax.f32 %v1834_v24, 0.0  ;;  %v3999_v24 = vld [vmem:[%s4233_s30] sm:$0xff]  }
 0x363   : > { %2455 = vmatpush1.bf16.msra.mxu0 %v3999_v24 }
 0x364   : > { %v1846_v26 = vpack.c.bf16 %v1842_v51, %v1841_v25  ;;  %2470 = vmatprep.subr.bf16.mxu0 %v4161_v39 }
 0x366   : > { %3850 = vmatmul.mubr.msk.bf16.gmra.mxu0 %vm1856_vm11, %v1846_v26 }
 0x367   : > { %2471 = vmatpush2.bf16.msra.mxu0 %v4000_v28 }
 0x368   : > { %3884 = vmatprep.subr.bf16.mxu0 %v4153_v1 }
 0x3fe   : > { %v3847_v31 = vpop.f32.mrf.mxu0 }
 0x3ff   : > { %v1946_v32 = vmul.f32 %v3847_v31, %v4720_v29 }
 0x400   : > { %v1907_v33 = vpop.f32.mrf.mxu0 }
 0x401   : > { %v1960_v34 = vadd.f32 %v4723_v30, %v1946_v32  ;;  %v1944_v35 = vmul.f32 %v4720_v29, %v1907_v33 }
 0x402   : > { %v3848_v36 = vpop.f32.mrf.mxu0 }
 0x403   : > { %v1968_v37 = vmax.f32 %v1960_v34, 0.0  ;;  %v1958_v38 = vadd.f32 %v4723_v30, %v1944_v35  ;;  %v1947_v40 = vmul.f32 %v3848_v36, %v4720_v29 }
 0x404   : > { %v1910_v41 = vpop.f32.mrf.mxu0 }
 0x405   : > { %1976 = vst.msk [vmem:[#allocation3 + $0x31] sm:$0xff] %vm957_vm0, %v1968_v37  ;;  %v1966_v42 = vmax.f32 %v1958_v38, 0.0  ;;  %v1961_v43 = vadd.f32 %v4723_v30, %v1947_v40  ;;  %v1945_v44 = vmul.f32 %v4720_v29, %v1910_v41 }
 0x407   : > { %1974 = vst.msk [vmem:[#allocation3 + $0x11] sm:$0xff] %vm957_vm0, %v1966_v42  ;;  %v1969_v52 = vmax.f32 %v1961_v43, 0.0  ;;  %v1959_v45 = vadd.f32 %v4723_v30, %v1945_v44 }
 0x409   : > { %1977 = vst.msk [vmem:[#allocation3 + $0x41] sm:$0xff] %vm957_vm0, %v1969_v52  ;;  %v1967_v46 = vmax.f32 %v1959_v45, 0.0 }
 0x40b   : > { %1975 = vst.msk [vmem:[#allocation3 + $0x21] sm:$0xff] %vm957_vm0, %v1967_v46 }
 0x40c   : > { %v2096_v47 = vld [vmem:[#allocation3 + $0x30] sm:$0xff] }
 0x40d   : > { %v2192_v50 = vld [vmem:[#allocation3 + $0x32] sm:$0xff]  ;;  %2114 = vrot.lane.b32.xlu0 %v2096_v47, %s5174_s10  ;;  %2256 = vrot.lane.b32.xlu1 %v2096_v47, %s5175_s18  ;;  %1993 = vst.msk [vmem:[#allocation6 + $0x30] sm:$0xff] %vm957_vm0, %v2096_v47 }
 0x40e   : > { %2343 = vst.msk [vmem:[#allocation6 + $0x18] sm:$0xff] %vm957_vm0, %v2192_v50  ;;  %v2094_v53 = vld [vmem:[#allocation3 + $0x10] sm:$0xff] }
 0x40f   : > { %1991 = vst.msk [vmem:[#allocation6 + $0x10] sm:$0xff] %vm957_vm0, %v2094_v53  ;;  %v2144_v54 = vld [vmem:[#allocation3 + $0x31] sm:$0xff] }
 0x410   : > { %v2240_v48 = vld [vmem:[#allocation3 + $0x40] sm:$0xff]  ;;  %v2142_v62 = vld [vmem:[#allocation3 + $0x11] sm:$0xff] }
 0x411   : > { %v4742_v55 = vld [vmem:[#allocation3 + $0x42] sm:$0xff]  ;;  %2162 = vrot.lane.b32.xlu0 %v2144_v54, %s5178_s9  ;;  %2304 = vrot.lane.b32.xlu1 %v2144_v54, %s5176_s5  ;;  %1994 = vst.msk [vmem:[#allocation6 + $0x40] sm:$0xff] %vm957_vm0, %v2240_v48  ;;  %v2190_v0 = vld [vmem:[#allocation3 + $0x12] sm:$0xff] }
 0x412   : > { %2344 = vst.msk [vmem:[#allocation6 + $0x28] sm:$0xff] %vm957_vm0, %v4742_v55  ;;  %v4749_v49 = vld [vmem:[#allocation3 + $0x22] sm:$0xff] }
 0x413   : > { %v4751_v56 = vld [vmem:[#allocation3 + $0x20] sm:$0xff]  ;;  %2342 = vst.msk [vmem:[#allocation6 + $0x8] sm:$0xff] %vm957_vm0, %v4749_v49 }
 0x414   : > { %1992 = vst.msk [vmem:[#allocation6 + $0x20] sm:$0xff] %vm957_vm0, %v4751_v56  ;;  %v2288_v9 = vld [vmem:[#allocation3 + $0x41] sm:$0xff] }
 0x415   : > { %2210 = vrot.lane.b32.xlu0 %v2192_v50, %s5180_s13  ;;  %2020 = vrot.lane.b32.xlu1 %v2144_v54, %s5177_s7  ;;  %v2353_v60 = vld [vmem:[#allocation6 + $0x18] sm:$0xff]  ;;  %v2143_v51 = vld [vmem:[#allocation3 + $0x21] sm:$0xff] }
 0x419   : > { %2110 = vrot.lane.b32.xlu0 %v2094_v53, %s5174_s10  ;;  %2068 = vrot.lane.b32.xlu1 %v2192_v50, %s5179_s1  ;;  %v2355_v10 = vld [vmem:[#allocation6 + $0x28] sm:$0xff] }
 0x41a   : > { %v2351_v59 = vld [vmem:[#allocation6 + $0x8] sm:$0xff] }
 0x41b   : > { %v2367_v61 = vpack.c.bf16 %v2353_v60, %v2351_v59 }
 0x41d   : > { %2158 = vrot.lane.b32.xlu0 %v2142_v62, %s5178_s9  ;;  %2016 = vrot.lane.b32.xlu1 %v2142_v62, %s5177_s7 }
 0x41e   : > { %3746 = vmatprep.mubr.msk.bf16.mxu0 %vm957_vm0, %v2367_v61 }
 0x421   : > { %2206 = vrot.lane.b32.xlu0 %v2190_v0, %s5180_s13  ;;  %2064 = vrot.lane.b32.xlu1 %v2190_v0, %s5179_s1 }
 0x425   : > { %2258 = vrot.lane.b32.xlu0 %v2240_v48, %s5175_s18  ;;  %2116 = vrot.lane.b32.xlu1 %v2240_v48, %s5174_s10 }
 0x426   : > { %v3851_v6 = vpop.f32.mrf.mxu0 }
 0x427   : > { %v1950_v7 = vmul.f32 %v3851_v6, %v4720_v29 }
 0x428   : > { %v1923_v8 = vpop.f32.mrf.mxu0 }
 0x429   : > { %v1964_v11 = vadd.f32 %v4723_v30, %v1950_v7  ;;  %v1948_v12 = vmul.f32 %v4720_v29, %v1923_v8  ;;  %2306 = vrot.lane.b32.xlu0 %v2288_v9, %s5176_s5  ;;  %2164 = vrot.lane.b32.xlu1 %v2288_v9, %s5178_s9 }
 0x42a   : > { %v3852_v13 = vpop.f32.mrf.mxu0 }
 0x42b   : > { %v1972_v14 = vmax.f32 %v1964_v11, 0.0  ;;  %v1962_v15 = vadd.f32 %v4723_v30, %v1948_v12  ;;  %v1951_v16 = vmul.f32 %v3852_v13, %v4720_v29 }
 0x42c   : > { %v1926_v17 = vpop.f32.mrf.mxu0 }
 0x42d   : > { %1980 = vst.msk [vmem:[#allocation3 + $0x71] sm:$0xff] %vm957_vm0, %v1972_v14  ;;  %v1970_v19 = vmax.f32 %v1962_v15, 0.0  ;;  %v1965_v20 = vadd.f32 %v4723_v30, %v1951_v16  ;;  %v1949_v21 = vmul.f32 %v4720_v29, %v1926_v17  ;;  %2022 = vrot.lane.b32.xlu0 %v2288_v9, %s5177_s7  ;;  %2212 = vrot.lane.b32.xlu1 %v4742_v55, %s5180_s13 }
 0x42f   : > { %1978 = vst.msk [vmem:[#allocation3 + $0x51] sm:$0xff] %vm957_vm0, %v1970_v19  ;;  %v1973_v22 = vmax.f32 %v1965_v20, 0.0  ;;  %v1963_v23 = vadd.f32 %v4723_v30, %v1949_v21 }
 0x431   : > { %1981 = vst.msk [vmem:[#allocation3 + $0x81] sm:$0xff] %vm957_vm0, %v1973_v22  ;;  %v1971_v25 = vmax.f32 %v1963_v23, 0.0  ;;  %2070 = vrot.lane.b32.xlu0 %v4742_v55, %s5179_s1  ;;  %2112 = vrot.lane.b32.xlu1 %v4751_v56, %s5174_s10 }
 0x433   : > { %1979 = vst.msk [vmem:[#allocation3 + $0x61] sm:$0xff] %vm957_vm0, %v1971_v25 }
 0x434   : > { %v2243_v26 = vld [vmem:[#allocation3 + $0x70] sm:$0xff] }
 0x435   : > { %v2053_v27 = vld [vmem:[#allocation3 + $0x72] sm:$0xff]  ;;  %2254 = vrot.lane.b32.xlu0 %v4751_v56, %s5175_s18  ;;  %2160 = vrot.lane.b32.xlu1 %v2143_v51, %s5178_s9  ;;  %1997 = vst.msk [vmem:[#allocation6 + $0x70] sm:$0xff] %vm957_vm0, %v2243_v26 }
 0x436   : > { %2347 = vst.msk [vmem:[#allocation6 + $0x58] sm:$0xff] %vm957_vm0, %v2053_v27  ;;  %v2241_v29 = vld [vmem:[#allocation3 + $0x50] sm:$0xff] }
 0x437   : > { %v2194_v30 = vld [vmem:[#allocation3 + $0x52] sm:$0xff]  ;;  %1995 = vst.msk [vmem:[#allocation6 + $0x50] sm:$0xff] %vm957_vm0, %v2241_v29 }
 0x438   : > { %2345 = vst.msk [vmem:[#allocation6 + $0x38] sm:$0xff] %vm957_vm0, %v2194_v30  ;;  %v2197_v31 = vld [vmem:[#allocation3 + $0x82] sm:$0xff]  ;;  %v2291_v34 = vld [vmem:[#allocation3 + $0x71] sm:$0xff] }
 0x439   : > { %2302 = vrot.lane.b32.xlu0 %v2143_v51, %s5176_s5  ;;  %2208 = vrot.lane.b32.xlu1 %v4749_v49, %s5180_s13  ;;  %2348 = vst.msk [vmem:[#allocation6 + $0x68] sm:$0xff] %vm957_vm0, %v2197_v31  ;;  %v2289_v35 = vld [vmem:[#allocation3 + $0x51] sm:$0xff]  ;;  %v2101_v36 = vld [vmem:[#allocation3 + $0x80] sm:$0xff] }
 0x43a   : > { %v2242_v32 = vld [vmem:[#allocation3 + $0x60] sm:$0xff] }
 0x43b   : > { %v2052_v33 = vld [vmem:[#allocation3 + $0x62] sm:$0xff]  ;;  %1996 = vst.msk [vmem:[#allocation6 + $0x60] sm:$0xff] %vm957_vm0, %v2242_v32 }
 0x43c   : > { %2346 = vst.msk [vmem:[#allocation6 + $0x48] sm:$0xff] %vm957_vm0, %v2052_v33  ;;  %v2149_v37 = vld [vmem:[#allocation3 + $0x81] sm:$0xff] }
 0x43d   : > { %2018 = vrot.lane.b32.xlu0 %v2143_v51, %s5177_s7  ;;  %2264 = vrot.lane.b32.xlu1 %v2243_v26, %s5175_s18  ;;  %v2290_v38 = vld [vmem:[#allocation3 + $0x61] sm:$0xff] }
 0x43f   : > { %v2357_v6 = vld [vmem:[#allocation6 + $0x38] sm:$0xff] }
 0x440   : > { %v2369_v13 = vpack.c.bf16 %v2357_v6, %v2355_v10 }
 0x441   : > { %2066 = vrot.lane.b32.xlu0 %v4749_v49, %s5179_s1  ;;  %2312 = vrot.lane.b32.xlu1 %v2291_v34, %s5176_s5 }
 0x443   : > { %v2359_v22 = vld [vmem:[#allocation6 + $0x48] sm:$0xff] }
 0x445   : > { %2122 = vrot.lane.b32.xlu0 %v2243_v26, %s5174_s10  ;;  %2028 = vrot.lane.b32.xlu1 %v2291_v34, %s5177_s7 }
 0x449   : > { %2170 = vrot.lane.b32.xlu0 %v2291_v34, %s5178_s9  ;;  %2076 = vrot.lane.b32.xlu1 %v2053_v27, %s5179_s1 }
 0x44d   : > { %2218 = vrot.lane.b32.xlu0 %v2053_v27, %s5180_s13  ;;  %2260 = vrot.lane.b32.xlu1 %v2241_v29, %s5175_s18  ;;  %v2361_v27 = vld [vmem:[#allocation6 + $0x58] sm:$0xff] }
 0x44e   : > { %v2371_v28 = vpack.c.bf16 %v2361_v27, %v2359_v22 }
 0x451   : > { %2308 = vrot.lane.b32.xlu1 %v2289_v35, %s5176_s5  ;;  %2118 = vrot.lane.b32.xlu0 %v2241_v29, %s5174_s10 }
 0x455   : > { %2166 = vrot.lane.b32.xlu0 %v2289_v35, %s5178_s9  ;;  %2024 = vrot.lane.b32.xlu1 %v2289_v35, %s5177_s7 }
 0x459   : > { %2214 = vrot.lane.b32.xlu0 %v2194_v30, %s5180_s13  ;;  %2072 = vrot.lane.b32.xlu1 %v2194_v30, %s5179_s1 }
 0x45d   : > { %2124 = vrot.lane.b32.xlu1 %v2101_v36, %s5174_s10  ;;  %2262 = vrot.lane.b32.xlu0 %v2242_v32, %s5175_s18 }
 0x461   : > { %2172 = vrot.lane.b32.xlu1 %v2149_v37, %s5178_s9  ;;  %2310 = vrot.lane.b32.xlu0 %v2290_v38, %s5176_s5 }
 0x465   : > { %2120 = vrot.lane.b32.xlu1 %v2242_v32, %s5174_s10  ;;  %2026 = vrot.lane.b32.xlu0 %v2290_v38, %s5177_s7 }
 0x469   : > { %2168 = vrot.lane.b32.xlu1 %v2290_v38, %s5178_s9  ;;  %2074 = vrot.lane.b32.xlu0 %v2052_v33, %s5179_s1 }
 0x46d   : > { %2216 = vrot.lane.b32.xlu1 %v2052_v33, %s5180_s13  ;;  %2266 = vrot.lane.b32.xlu0 %v2101_v36, %s5175_s18 }
 0x471   : > { %2220 = vrot.lane.b32.xlu1 %v2197_v31, %s5180_s13  ;;  %2314 = vrot.lane.b32.xlu0 %v2149_v37, %s5176_s5 }
 0x475   : > { %2268 = vrot.lane.b32.xlu1 %v4601_v4, %s5175_s18 }
 0x479   : > { %2316 = vrot.lane.b32.xlu1 %v4606_v5, %s5176_s5 }
 0x47f   : > { %v2115_v40 = vpop.permute.xlu0 %2114  ;;  %v2257_v41 = vpop.permute.xlu1 %2256 }
 0x483   : > { %v2163_v42 = vpop.permute.xlu0 %2162  ;;  %v2305_v43 = vpop.permute.xlu1 %2304 }
 0x487   : > { %v2211_v44 = vpop.permute.xlu0 %2210  ;;  %v2021_v52 = vpop.permute.xlu1 %2020 }
 0x488   : > { %2041 = vst.msk [vmem:[#allocation6 + $0x30] sm:$0xff] %vm1258_vm2, %v2021_v52 }
 0x48b   : > { %v2111_v45 = vpop.permute.xlu0 %2110  ;;  %v2069_v46 = vpop.permute.xlu1 %2068 }
 0x48c   : > { %2134 = vst.msk [vmem:[#allocation6] sm:$0xff] %vm1356_vm4, %v2111_v45 }
 0x48d   : > { %2089 = vst.msk [vmem:[#allocation6 + $0x30] sm:$0xff] %vm1307_vm3, %v2069_v46 }
 0x48f   : > { %v2159_v47 = vpop.permute.xlu0 %2158  ;;  %v2017_v50 = vpop.permute.xlu1 %2016 }
 0x490   : > { %2182 = vst.msk [vmem:[#allocation6] sm:$0xff] %vm1405_vm5, %v2159_v47 }
 0x491   : > { %2039 = vst.msk [vmem:[#allocation6 + $0x10] sm:$0xff] %vm1258_vm2, %v2017_v50 }
 0x493   : > { %v2207_v4 = vpop.permute.xlu0 %2206  ;;  %v2065_v5 = vpop.permute.xlu1 %2064 }
 0x494   : > { %2230 = vst.msk [vmem:[#allocation6] sm:$0xff] %vm1454_vm6, %v2207_v4 }
 0x495   : > { %2087 = vst.msk [vmem:[#allocation6 + $0x10] sm:$0xff] %vm1307_vm3, %v2065_v5 }
 0x497   : > { %v2259_v53 = vpop.permute.xlu0 %2258  ;;  %v2117_v54 = vpop.permute.xlu1 %2116 }
 0x498   : > { %2137 = vst.msk [vmem:[#allocation6 + $0x30] sm:$0xff] %vm1356_vm4, %v2117_v54 }
 0x49b   : > { %v2307_v48 = vpop.permute.xlu0 %2306  ;;  %v2165_v55 = vpop.permute.xlu1 %2164 }
 0x49c   : > { %2185 = vst.msk [vmem:[#allocation6 + $0x30] sm:$0xff] %vm1405_vm5, %v2165_v55 }
 0x49f   : > { %v2023_v49 = vpop.permute.xlu0 %2022  ;;  %v2213_v56 = vpop.permute.xlu1 %2212 }
 0x4a0   : > { %2042 = vst.msk [vmem:[#allocation6 + $0x40] sm:$0xff] %vm1258_vm2, %v2023_v49 }
 0x4a1   : > { %2233 = vst.msk [vmem:[#allocation6 + $0x30] sm:$0xff] %vm1454_vm6, %v2213_v56  ;;  %v4001_v56 = vld [vmem:[%s4248_s20 + $0x8] sm:$0xff]  }
 0x4a2   : > { %3853 = vmatprep.subr.bf16.mxu1 %v4001_v56 }
 0x4a3   : > { %v2071_v57 = vpop.permute.xlu0 %2070  ;;  %v2113_v58 = vpop.permute.xlu1 %2112  ;;  %3854 = vmatpush3.bf16.msra.mxu1 %v4001_v56 }
 0x4a4   : > { %2090 = vst.msk [vmem:[#allocation6 + $0x40] sm:$0xff] %vm1307_vm3, %v2071_v57  ;;  %v4002_v57 = vld [vmem:[%s4248_s20] sm:$0xff]  }
 0x4a5   : > { %2135 = vst.msk [vmem:[#allocation6 + $0x10] sm:$0xff] %vm1356_vm4, %v2113_v58  ;;  %3855 = vmatprep.subr.bf16.mxu1 %v4002_v57 }
 0x4a7   : > { %v2255_v59 = vpop.permute.xlu0 %2254  ;;  %v2161_v60 = vpop.permute.xlu1 %2160  ;;  %3856 = vmatpush3.bf16.msra.mxu1 %v4002_v57 }
 0x4a8   : > { %2278 = vst.msk [vmem:[#allocation6] sm:$0xff] %vm1504_vm7, %v2255_v59 }
 0x4a9   : > { %2183 = vst.msk [vmem:[#allocation6 + $0x10] sm:$0xff] %vm1405_vm5, %v2161_v60 }
 0x4ab   : > { %v2303_v61 = vpop.permute.xlu0 %2302  ;;  %v2209_v62 = vpop.permute.xlu1 %2208 }
 0x4ac   : > { %2326 = vst.msk [vmem:[#allocation6] sm:$0xff] %vm1553_vm8, %v2303_v61 }
 0x4ad   : > { %2231 = vst.msk [vmem:[#allocation6 + $0x10] sm:$0xff] %vm1454_vm6, %v2209_v62 }
 0x4ae   : > { %2279 = vst.msk [vmem:[#allocation6 + $0x10] sm:$0xff] %vm1504_vm7, %v2257_v41 }
 0x4af   : > { %2327 = vst.msk [vmem:[#allocation6 + $0x10] sm:$0xff] %vm1553_vm8, %v2305_v43  ;;  %v2019_v63 = vpop.permute.xlu0 %2018  ;;  %v4872_v0 = vpop.permute.xlu1 %2264  ;;  %v2363_v43 = vld [vmem:[#allocation6 + $0x68] sm:$0xff] }
 0x4b0   : > { %2040 = vst.msk [vmem:[#allocation6 + $0x20] sm:$0xff] %vm1258_vm2, %v2019_v63 }
 0x4b3   : > { %v2067_v2 = vpop.permute.xlu0 %2066  ;;  %v4875_v3 = vpop.permute.xlu1 %2312  ;;  %v2350_v7 = vld [vmem:[#allocation6] sm:$0xff] }
 0x4b4   : > { %2088 = vst.msk [vmem:[#allocation6 + $0x20] sm:$0xff] %vm1307_vm3, %v2067_v2 }
 0x4b5   : > { %2136 = vst.msk [vmem:[#allocation6 + $0x20] sm:$0xff] %vm1356_vm4, %v2115_v40 }
 0x4b6   : > { %v2352_v8 = vld [vmem:[#allocation6 + $0x10] sm:$0xff]  ;;  %2184 = vst.msk [vmem:[#allocation6 + $0x20] sm:$0xff] %vm1405_vm5, %v2163_v42 }
 0x4b7   : > { %v2366_v9 = vpack.c.bf16 %v2352_v8, %v2350_v7  ;;  %2232 = vst.msk [vmem:[#allocation6 + $0x20] sm:$0xff] %vm1454_vm6, %v2211_v44  ;;  %v2123_v11 = vpop.permute.xlu0 %2122  ;;  %v2029_v12 = vpop.permute.xlu1 %2028  ;;  %v2365_v44 = vld [vmem:[#allocation6 + $0x78] sm:$0xff] }
 0x4b8   : > { %2280 = vst.msk [vmem:[#allocation6 + $0x20] sm:$0xff] %vm1504_vm7, %v2259_v53  ;;  %v2373_v50 = vpack.c.bf16 %v2365_v44, %v2363_v43 }
 0x4b9   : > { %2045 = vst.msk [vmem:[#allocation6 + $0x70] sm:$0xff] %vm1258_vm2, %v2029_v12  ;;  %2473 = vmatmul.mubr.bf16.vlgmr.msra.gmra.mxu0 %v2366_v9 }
 0x4ba   : > { %2328 = vst.msk [vmem:[#allocation6 + $0x20] sm:$0xff] %vm1553_vm8, %v2307_v48  ;;  %3747 = vmatprep.mubr.msk.bf16.mxu0 %vm957_vm0, %v2369_v13 }
 0x4bb   : > { %v2171_v14 = vpop.permute.xlu0 %2170  ;;  %v2077_v15 = vpop.permute.xlu1 %2076 }
 0x4bc   : > { %2093 = vst.msk [vmem:[#allocation6 + $0x70] sm:$0xff] %vm1307_vm3, %v2077_v15 }
 0x4bf   : > { %v2219_v16 = vpop.permute.xlu0 %2218  ;;  %v2261_v17 = vpop.permute.xlu1 %2260 }
 0x4c0   : > { %2281 = vst.msk [vmem:[#allocation6 + $0x30] sm:$0xff] %vm1504_vm7, %v2261_v17 }
 0x4c1   : > { %v2354_v25 = vld [vmem:[#allocation6 + $0x20] sm:$0xff] }
 0x4c3   : > { %v2119_v18 = vpop.permute.xlu0 %2118  ;;  %v2309_v19 = vpop.permute.xlu1 %2308 }
 0x4c4   : > { %2138 = vst.msk [vmem:[#allocation6 + $0x40] sm:$0xff] %vm1356_vm4, %v2119_v18 }
 0x4c5   : > { %2329 = vst.msk [vmem:[#allocation6 + $0x30] sm:$0xff] %vm1553_vm8, %v2309_v19 }
 0x4c7   : > { %v2167_v20 = vpop.permute.xlu0 %2166  ;;  %v2025_v21 = vpop.permute.xlu1 %2024 }
 0x4c8   : > { %2186 = vst.msk [vmem:[#allocation6 + $0x40] sm:$0xff] %vm1405_vm5, %v2167_v20 }
 0x4c9   : > { %2043 = vst.msk [vmem:[#allocation6 + $0x50] sm:$0xff] %vm1258_vm2, %v2025_v21 }
 0x4cb   : > { %v2215_v23 = vpop.permute.xlu0 %2214  ;;  %v2073_v24 = vpop.permute.xlu1 %2072 }
 0x4cc   : > { %v2356_v51 = vld [vmem:[#allocation6 + $0x30] sm:$0xff]  ;;  %2234 = vst.msk [vmem:[#allocation6 + $0x40] sm:$0xff] %vm1454_vm6, %v2215_v23 }
 0x4cd   : > { %2091 = vst.msk [vmem:[#allocation6 + $0x50] sm:$0xff] %vm1307_vm3, %v2073_v24  ;;  %v2368_v26 = vpack.c.bf16 %v2356_v51, %v2354_v25 }
 0x4cf   : > { %2481 = vmatmul.mubr.bf16.gmra.mxu0 %v2368_v26  ;;  %v2263_v29 = vpop.permute.xlu0 %2262  ;;  %v2125_v30 = vpop.permute.xlu1 %2124 }
 0x4d0   : > { %3748 = vmatprep.mubr.msk.bf16.mxu0 %vm957_vm0, %v2371_v28  ;;  %2282 = vst.msk [vmem:[#allocation6 + $0x40] sm:$0xff] %vm1504_vm7, %v2263_v29 }
 0x4d1   : > { %2141 = vst.msk [vmem:[#allocation6 + $0x70] sm:$0xff] %vm1356_vm4, %v2125_v30 }
 0x4d3   : > { %v2311_v31 = vpop.permute.xlu0 %2310  ;;  %v2173_v32 = vpop.permute.xlu1 %2172 }
 0x4d4   : > { %2330 = vst.msk [vmem:[#allocation6 + $0x40] sm:$0xff] %vm1553_vm8, %v2311_v31 }
 0x4d5   : > { %2189 = vst.msk [vmem:[#allocation6 + $0x70] sm:$0xff] %vm1405_vm5, %v2173_v32 }
 0x4d7   : > { %v2027_v33 = vpop.permute.xlu0 %2026  ;;  %v2121_v34 = vpop.permute.xlu1 %2120 }
 0x4d8   : > { %2044 = vst.msk [vmem:[#allocation6 + $0x60] sm:$0xff] %vm1258_vm2, %v2027_v33 }
 0x4d9   : > { %2139 = vst.msk [vmem:[#allocation6 + $0x50] sm:$0xff] %vm1356_vm4, %v2121_v34 }
 0x4db   : > { %v2075_v35 = vpop.permute.xlu0 %2074  ;;  %v2169_v36 = vpop.permute.xlu1 %2168  ;;  %v2358_v52 = vld [vmem:[#allocation6 + $0x40] sm:$0xff] }
 0x4dc   : > { %2092 = vst.msk [vmem:[#allocation6 + $0x60] sm:$0xff] %vm1307_vm3, %v2075_v35 }
 0x4dd   : > { %2187 = vst.msk [vmem:[#allocation6 + $0x50] sm:$0xff] %vm1405_vm5, %v2169_v36 }
 0x4de   : > { %2140 = vst.msk [vmem:[#allocation6 + $0x60] sm:$0xff] %vm1356_vm4, %v2123_v11  ;;  %v3750_v11 = vld [vmem:[%s5184_s8] ss:$0 sm:$0xff]  ;;  %s5186_s8 = sld [smem:[#allocation20_spill]] }
 0x4df   : > { %2188 = vst.msk [vmem:[#allocation6 + $0x60] sm:$0xff] %vm1405_vm5, %v2171_v14  ;;  %v2267_v37 = vpop.permute.xlu0 %2266  ;;  %v2217_v38 = vpop.permute.xlu1 %2216  ;;  %v3751_v14 = vld [vmem:[%s5185_s14] ss:$0 sm:$0xff]  ;;  %s5187_s14 = sld [smem:[#allocation23_spill]] }
 0x4e0   : > { %2236 = vst.msk [vmem:[#allocation6 + $0x60] sm:$0xff] %vm1454_vm6, %v2219_v16  ;;  %2235 = vst.msk [vmem:[#allocation6 + $0x50] sm:$0xff] %vm1454_vm6, %v2217_v38 }
 0x4e1   : > { %2284 = vst.msk [vmem:[#allocation6 + $0x60] sm:$0xff] %vm1504_vm7, %v2267_v37  ;;  %2283 = vst.msk [vmem:[#allocation6 + $0x50] sm:$0xff] %vm1504_vm7, %v4872_v0 }
 0x4e2   : > { %2331 = vst.msk [vmem:[#allocation6 + $0x50] sm:$0xff] %vm1553_vm8, %v4875_v3 }
 0x4e3   : > { %v2315_v40 = vpop.permute.xlu0 %2314  ;;  %v2221_v41 = vpop.permute.xlu1 %2220 }
 0x4e4   : > { %2332 = vst.msk [vmem:[#allocation6 + $0x60] sm:$0xff] %vm1553_vm8, %v2315_v40 }
 0x4e5   : > { %2237 = vst.msk [vmem:[#allocation6 + $0x70] sm:$0xff] %vm1454_vm6, %v2221_v41 }
 0x4e7   : > { %v2269_v42 = vpop.permute.xlu1 %2268 }
 0x4e8   : > { %2285 = vst.msk [vmem:[#allocation6 + $0x70] sm:$0xff] %vm1504_vm7, %v2269_v42 }
 0x4e9   : > { %v2360_v45 = vld [vmem:[#allocation6 + $0x50] sm:$0xff] }
 0x4ea   : > { %v2370_v46 = vpack.c.bf16 %v2360_v45, %v2358_v52 }
 0x4eb   : > { %v2317_v47 = vpop.permute.xlu1 %2316  ;;  %v2362_v4 = vld [vmem:[#allocation6 + $0x60] sm:$0xff] }
 0x4ec   : > { %2333 = vst.msk [vmem:[#allocation6 + $0x70] sm:$0xff] %vm1553_vm8, %v2317_v47  ;;  %2489 = vmatmul.mubr.bf16.gmra.mxu0 %v2370_v46 }
 0x4ed   : > { %3749 = vmatprep.mubr.msk.bf16.mxu0 %vm957_vm0, %v2373_v50 }
 0x4f3   : > { %v2364_v5 = vld [vmem:[#allocation6 + $0x70] sm:$0xff] }
 0x4f4   : > { %v2372_v53 = vpack.c.bf16 %v2364_v5, %v2362_v4 }
 0x4f6   : > { %2497 = vmatmul.mubr.bf16.gmra.mxu0 %v2372_v53 }
 0x4f7   : > { %3886 = vmatprep.mubr.msk.bf16.mxu0 %vm4163_vm15, %v4153_v1 }
 0x579   : > { %v2474_v54 = vpop.f32.mrf.mxu0 }
 0x57a   : > { %2513 = vrot.lane.b32.xlu0 %v2474_v54, %s5141_s3 }
 0x57b   : > { %v2476_v48 = vpop.f32.mrf.mxu0 }
 0x57d   : > { %v2477_v55 = vpop.f32.mrf.mxu0 }
 0x57e   : > { %2515 = vrot.lane.b32.xlu1 %v2477_v55, %s5141_s3  ;;  %v2552_v55 = vld [vmem:[%s5186_s8] sm:$0xff] }
 0x57f   : > { %v2479_v49 = vpop.f32.mrf.mxu0 }
 0x580   : > { %v4003_v49 = vld [vmem:[%s5187_s14] sm:$0xff]   ;;  %s5188_s14 = sld [smem:[#allocation21_spill]] }
 0x581   : > { %3885 = vmatpush3.bf16.msra.mxu0 %v4003_v49 }
 0x582   : > { %3890 = vmatprep.subr.bf16.mxu0 %v4153_v1 }
 0x58f   : > { %v2482_v58 = vpop.f32.mrf.mxu0 }
 0x590   : > { %2517 = vrot.lane.b32.xlu0 %v2482_v58, %s5141_s3 }
 0x591   : > { %v2484_v59 = vpop.f32.mrf.mxu0 }
 0x593   : > { %v2485_v60 = vpop.f32.mrf.mxu0 }
 0x594   : > { %2519 = vrot.lane.b32.xlu1 %v2485_v60, %s5141_s3 }
 0x595   : > { %v2487_v61 = vpop.f32.mrf.mxu0 }
 0x5ac   : > { %v2490_v62 = vpop.f32.mrf.mxu0 }
 0x5ad   : > { %2521 = vrot.lane.b32.xlu0 %v2490_v62, %s5141_s3 }
 0x5ae   : > { %v2492_v63 = vpop.f32.mrf.mxu0 }
 0x5b0   : > { %v2493_v0 = vpop.f32.mrf.mxu0 }
 0x5b1   : > { %2523 = vrot.lane.b32.xlu1 %v2493_v0, %s5141_s3  ;;  %v2553_v0 = vld [vmem:[%s5186_s8 + $0x8] sm:$0xff]  ;;  %s5190_s8 = sld [smem:[#allocation24_spill]] }
 0x5b2   : > { %v2495_v2 = vpop.f32.mrf.mxu0 }
 0x5b6   : > { %v2498_v3 = vpop.f32.mrf.mxu0 }
 0x5b7   : > { %2525 = vrot.lane.b32.xlu0 %v2498_v3, %s5141_s3 }
 0x5b8   : > { %v2500_v6 = vpop.f32.mrf.mxu0 }
 0x5b9   : > { %v3760_v6 = vld [vmem:[%s5188_s14] ss:$0 sm:$0xff]  ;;  %s5196_s14 = sld [smem:[#allocation30_spill]] }
 0x5ba   : > { %v2501_v7 = vpop.f32.mrf.mxu0 }
 0x5bb   : > { %2527 = vrot.lane.b32.xlu1 %v2501_v7, %s5141_s3  ;;  %s5189_s3 = sld [smem:[#allocation22_spill]] }
 0x5bc   : > { %v2503_v8 = vpop.f32.mrf.mxu0 }
 0x5c1   : > { %v3761_v7 = vld [vmem:[%s5189_s3] ss:$0 sm:$0xff]  ;;  %s5194_s3 = sld [smem:[#allocation27_spill]] }
 0x5ec   : > { %v2514_v9 = vpop.permute.xlu0 %2513 }
 0x5ed   : > { %2538 = vst.msk [vmem:[#allocation2] sm:$0xff] %vm2537_vm12, %v2514_v9 }
 0x5f0   : > { %v2516_v10 = vpop.permute.xlu1 %2515 }
 0x5f1   : > { %2539 = vst.msk [vmem:[#allocation2 + $0x8] sm:$0xff] %vm2537_vm12, %v2516_v10 }
 0x5f4   : > { %v2554_v12 = vld [vmem:[#allocation2] sm:$0xff] }
 0x5f5   : > { %v2568_v13 = vmul.f32 %v3750_v11, %v2554_v12 }
 0x5f7   : > { %v2582_v17 = vadd.f32 %v3751_v14, %v2568_v13 }
 0x5f8   : > { %v2555_v15 = vld [vmem:[#allocation2 + $0x8] sm:$0xff] }
 0x5f9   : > { %v2569_v16 = vmul.f32 %v3750_v11, %v2555_v15  ;;  %v2590_v19 = vmax.f32 %v2582_v17, 0.0  ;;  %v3764_v17 = vld [vmem:[%s5190_s8] ss:$0 sm:$0xff]  ;;  %s5195_s8 = sld [smem:[#allocation28_spill]] }
 0x5fb   : > { %v2583_v18 = vadd.f32 %v3751_v14, %v2569_v16 }
 0x5fd   : > { %v2591_v20 = vmax.f32 %v2583_v18, 0.0  ;;  %v3765_v18 = vld [vmem:[%s5191_s17] ss:$0 sm:$0xff]  ;;  %s5193_s17 = sld [smem:[#allocation29_spill]] }
 0x5ff   : > { %v2598_v21 = vpack.c.bf16 %v2591_v20, %v2590_v19 }
 0x601   : > { %3857 = vmatprep.mubr.msk.bf16.mxu1 %vm2614_vm13, %v2598_v21 }
 0x602   : > { %v2518_v22 = vpop.permute.xlu0 %2517 }
 0x603   : > { %2540 = vst.msk [vmem:[#allocation2 + $0x10] sm:$0xff] %vm2537_vm12, %v2518_v22 }
 0x606   : > { %v2520_v23 = vpop.permute.xlu1 %2519 }
 0x607   : > { %2541 = vst.msk [vmem:[#allocation2 + $0x18] sm:$0xff] %vm2537_vm12, %v2520_v23  ;;  %v4021_v23 = vld [vmem:[%s5192_s19 + $0x38] sm:$0xff]  }
 0x60a   : > { %v2556_v24 = vld [vmem:[#allocation2 + $0x10] sm:$0xff] }
 0x60b   : > { %v2570_v25 = vmul.f32 %v3750_v11, %v2556_v24 }
 0x60d   : > { %v2584_v27 = vadd.f32 %v3751_v14, %v2570_v25 }
 0x60e   : > { %v2557_v51 = vld [vmem:[#allocation2 + $0x18] sm:$0xff] }
 0x60f   : > { %v2571_v26 = vmul.f32 %v3750_v11, %v2557_v51  ;;  %v2592_v29 = vmax.f32 %v2584_v27, 0.0 }
 0x611   : > { %v2585_v28 = vadd.f32 %v3751_v14, %v2571_v26 }
 0x613   : > { %v2593_v30 = vmax.f32 %v2585_v28, 0.0 }
 0x615   : > { %v2599_v31 = vpack.c.bf16 %v2593_v30, %v2592_v29  ;;  %v4023_v29 = vld [vmem:[%s5192_s19 + $0x30] sm:$0xff]  }
 0x617   : > { %3858 = vmatmul.mubr.msk.bf16.vlgmr.msra.gmra.mxu1 %vm2614_vm13, %v2599_v31 }
 0x61f   : > { %v2522_v32 = vpop.permute.xlu0 %2521 }
 0x620   : > { %2542 = vst.msk [vmem:[#allocation2 + $0x20] sm:$0xff] %vm2537_vm12, %v2522_v32  ;;  %v4024_v32 = vld [vmem:[%s5192_s19 + $0x28] sm:$0xff]  }
 0x623   : > { %v2524_v33 = vpop.permute.xlu1 %2523 }
 0x624   : > { %2543 = vst.msk [vmem:[#allocation2 + $0x28] sm:$0xff] %vm2537_vm12, %v2524_v33 }
 0x627   : > { %v2558_v34 = vld [vmem:[#allocation2 + $0x20] sm:$0xff] }
 0x628   : > { %v2572_v35 = vmul.f32 %v3750_v11, %v2558_v34 }
 0x629   : > { %v2526_v36 = vpop.permute.xlu0 %2525 }
 0x62a   : > { %2544 = vst.msk [vmem:[#allocation2 + $0x30] sm:$0xff] %vm2537_vm12, %v2526_v36  ;;  %v2586_v40 = vadd.f32 %v3751_v14, %v2572_v35 }
 0x62b   : > { %v2559_v37 = vld [vmem:[#allocation2 + $0x28] sm:$0xff] }
 0x62c   : > { %v2573_v38 = vmul.f32 %v3750_v11, %v2559_v37  ;;  %v2594_v43 = vmax.f32 %v2586_v40, 0.0 }
 0x62d   : > { %v2528_v41 = vpop.permute.xlu1 %2527 }
 0x62e   : > { %2545 = vst.msk [vmem:[#allocation2 + $0x38] sm:$0xff] %vm2537_vm12, %v2528_v41  ;;  %v2587_v42 = vadd.f32 %v3751_v14, %v2573_v38 }
 0x630   : > { %v2595_v44 = vmax.f32 %v2587_v42, 0.0 }
 0x631   : > { %v2560_v52 = vld [vmem:[#allocation2 + $0x30] sm:$0xff] }
 0x632   : > { %v2600_v45 = vpack.c.bf16 %v2595_v44, %v2594_v43  ;;  %v2574_v46 = vmul.f32 %v3750_v11, %v2560_v52 }
 0x634   : > { %3861 = vmatprep.mubr.msk.bf16.mxu1 %vm2614_vm13, %v2600_v45  ;;  %v2588_v4 = vadd.f32 %v3751_v14, %v2574_v46 }
 0x635   : > { %v2561_v47 = vld [vmem:[#allocation2 + $0x38] sm:$0xff] }
 0x636   : > { %v2575_v50 = vmul.f32 %v3750_v11, %v2561_v47  ;;  %v2596_v53 = vmax.f32 %v2588_v4, 0.0 }
 0x638   : > { %v2589_v5 = vadd.f32 %v3751_v14, %v2575_v50  ;;  %v4025_v50 = vld [vmem:[%s5192_s19 + $0x20] sm:$0xff]  }
 0x63a   : > { %v2597_v54 = vmax.f32 %v2589_v5, 0.0  ;;  %v4026_v5 = vld [vmem:[%s5192_s19 + $0x18] sm:$0xff]  }
 0x63c   : > { %v2601_v48 = vpack.c.bf16 %v2597_v54, %v2596_v53 }
 0x63e   : > { %3862 = vmatmul.mubr.msk.bf16.gmra.mxu1 %vm2614_vm13, %v2601_v48  ;;  %v4027_v48 = vld [vmem:[%s5192_s19 + $0x10] sm:$0xff]  }
 0x63f   : > { %3881 = vmatprep.mubr.msk.f32.mxu1 %vm2692_vm14, %v2552_v55 }
 0x6d7   : > { %v3859_v56 = vpop.f32.mrf.mxu1 }
 0x6d9   : > { %v2661_v57 = vpop.f32.mrf.mxu1 }
 0x6db   : > { %v3860_v58 = vpop.f32.mrf.mxu1 }
 0x6dd   : > { %v2664_v59 = vpop.f32.mrf.mxu1 }
 0x6fe   : > { %v3863_v60 = vpop.f32.mrf.mxu1 }
 0x700   : > { %v2677_v61 = vpop.f32.mrf.mxu1 }
 0x702   : > { %v3864_v62 = vpop.f32.mrf.mxu1 }
 0x703   : > { %3865 = vmatprep.subr.mxu1 %v3864_v62 }
 0x704   : > { %3866 = vmatpush3.msra.mxu1 %v3864_v62  ;;  %v2680_v63 = vpop.f32.mrf.mxu1 }
 0x705   : > { %3867 = vmatprep.subr.mxu1 %v3863_v60 }
 0x706   : > { %3868 = vmatpush3.msra.mxu1 %v3863_v60 }
 0x707   : > { %3869 = vmatprep.subr.mxu1 %v2680_v63 }
 0x708   : > { %3870 = vmatpush3.msra.mxu1 %v2680_v63 }
 0x709   : > { %3871 = vmatprep.subr.mxu1 %v2677_v61 }
 0x70a   : > { %3872 = vmatpush3.msra.mxu1 %v2677_v61 }
 0x70b   : > { %3873 = vmatprep.subr.mxu1 %v3860_v58 }
 0x70c   : > { %3874 = vmatpush3.msra.mxu1 %v3860_v58  ;;  %v4029_v58 = vld [vmem:[%s5192_s19] sm:$0xff]  }
 0x70d   : > { %3875 = vmatprep.subr.mxu1 %v3859_v56 }
 0x70e   : > { %3876 = vmatpush3.msra.mxu1 %v3859_v56  ;;  %v4028_v56 = vld [vmem:[%s5192_s19 + $0x8] sm:$0xff]  }
 0x70f   : > { %3877 = vmatprep.subr.mxu1 %v2664_v59 }
 0x710   : > { %3878 = vmatpush3.msra.mxu1 %v2664_v59  ;;  %v4030_v59 = vld [vmem:[%s5192_s19 + $0x40] sm:$0xff]   ;;  %s5197_s19 = sld [smem:[#allocation31_spill]] }
 0x711   : > { %3879 = vmatprep.subr.mxu1 %v2661_v57 }
 0x712   : > { %3880 = vmatpush3.msra.mxu1 %v2661_v57 }
 0x713   : > { %3882 = vmatmul.mubr.msk.f32.vlgmr.msra.gmra.mxu1 %vm2692_vm14, %v2553_v0  ;;  %3119 = vmatprep.subr.bf16.mxu1 %v4161_v39  ;;  %vm2896_vm14 = vcmask 125952  }
 0x714   : > { %3120 = vmatpush1.bf16.msra.mxu1 %v4021_v23 }
 0x715   : > { %3121 = vmatprep.subr.bf16.mxu1 %v4161_v39 }
 0x718   : > { %3122 = vmatpush1.bf16.msra.mxu1 %v4023_v29 }
 0x719   : > { %3123 = vmatprep.subr.bf16.mxu1 %v4161_v39 }
 0x71c   : > { %3124 = vmatpush1.bf16.msra.mxu1 %v4024_v32 }
 0x71d   : > { %3125 = vmatprep.subr.bf16.mxu1 %v4161_v39 }
 0x720   : > { %3126 = vmatpush1.bf16.msra.mxu1 %v4025_v50 }
 0x721   : > { %3127 = vmatprep.subr.bf16.mxu1 %v4161_v39 }
 0x724   : > { %3128 = vmatpush1.bf16.msra.mxu1 %v4026_v5  ;;  %v4053_v5 = vld [vmem:[%s4313_s27 + $0x28] sm:$0xff]  }
 0x725   : > { %3129 = vmatprep.subr.bf16.mxu1 %v4161_v39 }
 0x728   : > { %3130 = vmatpush1.bf16.msra.mxu1 %v4027_v48 }
 0x729   : > { %3131 = vmatprep.subr.bf16.mxu1 %v4161_v39 }
 0x72c   : > { %3132 = vmatpush1.bf16.msra.mxu1 %v4028_v56 }
 0x72d   : > { %3133 = vmatprep.subr.bf16.mxu1 %v4161_v39 }
 0x730   : > { %3134 = vmatpush1.bf16.msra.mxu1 %v4029_v58 }
 0x731   : > { %3149 = vmatprep.subr.bf16.mxu1 %v4161_v39 }
 0x734   : > { %3150 = vmatpush2.bf16.msra.mxu1 %v4030_v59 }
 0x7d3   : > { %v3883_v2 = vpop.f32.mrf.mxu1 }
 0x7d4   : > { %2775 = vst.msk [vmem:[#allocation4 + $0x8] sm:$0xff] %vm957_vm0, %v3883_v2 }
 0x7d5   : > { %v2765_v3 = vpop.f32.mrf.mxu1 }
 0x7d6   : > { %2774 = vst.msk [vmem:[#allocation4] sm:$0xff] %vm957_vm0, %v2765_v3 }
 0x7db   : > { %v2801_v8 = vld [vmem:[#allocation4 + $0x8] sm:$0xff] }
 0x7dc   : > { %v2809_v9 = vmul.f32 %v3760_v6, %v2801_v8 }
 0x7dd   : > { %v2800_v10 = vld [vmem:[#allocation4] sm:$0xff] }
 0x7de   : > { %v2808_v11 = vmul.f32 %v3760_v6, %v2800_v10  ;;  %v2817_v12 = vadd.f32 %v3761_v7, %v2809_v9 }
 0x7e0   : > { %v2816_v13 = vadd.f32 %v3761_v7, %v2808_v11  ;;  %v2819_v15 = vmax.f32 %v2817_v12, 0.0 }
 0x7e2   : > { %v2818_v14 = vmax.f32 %v2816_v13, 0.0 }
 0x7e4   : > { %v2820_v16 = vpack.c.bf16 %v2819_v15, %v2818_v14 }
 0x7e6   : > { %3887 = vmatmul.mubr.msk.bf16.vlgmr.msra.gmra.mxu0 %vm957_vm0, %v2820_v16  ;;  %v4031_v16 = vld [vmem:[%s5193_s17 + $0x8] ss:$0 sps:$4 sm:$0xff]  }
 0x7e7   : > { %3894 = vmatprep.mubr.msk.bf16.mxu0 %vm4163_vm15, %v4153_v1 }
 0x8a6   : > { %v2864_v19 = vpop.f32.mrf.mxu0 }
 0x8a7   : > { %v2877_v20 = vmul.f32 %v3764_v17, %v2864_v19 }
 0x8a8   : > { %v3888_v21 = vpop.f32.mrf.mxu0 }
 0x8a9   : > { %v2885_v22 = vadd.f32 %v3765_v18, %v2877_v20 }
 0x8aa   : > { %v2867_v24 = vpop.f32.mrf.mxu0 }
 0x8ab   : > { %v2887_v25 = vmax.f32 %v2885_v22, 0.0  ;;  %v2878_v51 = vmul.f32 %v3764_v17, %v2867_v24  ;;  %v3229_v17 = vsel %vm1869_vm9, %v4031_v16, 0  ;;  %v4059_v16 = vld [vmem:[%s4313_s27 + $0x40] sm:$0xff]  }
 0x8ac   : > { %v3889_v26 = vpop.f32.mrf.mxu0  ;;  %3891 = vmatpush3.bf16.msra.mxu0 %v3229_v17 }
 0x8ad   : > { %v2891_v27 = vcombine.high %v2887_v25, %v2887_v25  ;;  %2897 = vst.msk [vmem:[#allocation5 + $0x9] sm:$0xf] %vm2896_vm14, %v2887_v25  ;;  %v2886_v28 = vadd.f32 %v3765_v18, %v2878_v51  ;;  %v4032_v18 = vld [vmem:[%s5193_s17] sm:$0xff]   ;;  %3892 = vmatprep.subr.bf16.mxu0 %v4153_v1 }
 0x8ae   : > { %v3776_v1 = vld [vmem:[%s5194_s3] ss:$0 sm:$0xff]  ;;  %s4164_s3 = smov [#allocation7]  }
 0x8af   : > { %2898 = vst.msk [vmem:[#allocation5 + $0x11] sm:$0xf] %vm2896_vm14, %v2891_v27  ;;  %v2888_v30 = vmax.f32 %v2886_v28, 0.0  ;;  %v3777_v26 = vld [vmem:[%s5195_s8] ss:$0 sm:$0xff]  ;;  %s4064_s8 = sshll.u32 %s4164_s3, 4  ;;  %s4065_s8 = int_to_ptr.vmem [resolvable:$false] %s4064_s8 }
 0x8b0   : > { %3893 = vmatpush3.bf16.msra.mxu0 %v4032_v18 }
 0x8b1   : > { %v2892_v31 = vcombine.high %v2888_v30, %v2888_v30  ;;  %2899 = vst.msk [vmem:[#allocation5 + $0x19] sm:$0xf] %vm2896_vm14, %v2888_v30  ;;  %3517 = vmatprep.subr.bf16.mxu0 %v4161_v39 }
 0x8b3   : > { %2900 = vst.msk [vmem:[#allocation5 + $0x21] sm:$0xf] %vm2896_vm14, %v2892_v31 }
 0x8b4   : > { %v4006_v33 = vld [vmem:[#allocation5 + $0x1] ss:$8 sps:$4 sm:$0xff]  }
 0x8b5   : > { %2925 = vrot.lane.b32.xlu0 %v4006_v33, %s5177_s7  ;;  %v4007_v34 = vld [vmem:[#allocation5 + $0x2] ss:$8 sps:$4 sm:$0xff]  }
 0x8b6   : > { %v4009_v38 = vld [vmem:[#allocation5 + $0x8] ss:$8 sps:$4 sm:$0xff]  }
 0x8b7   : > { %v4011_v41 = vld [vmem:[#allocation5 + $0x9] ss:$8 sps:$4 sm:$0xff]  }
 0x8b8   : > { %v4004_v35 = vld [vmem:[#allocation5 + $0x12] ss:$8 sps:$4 sm:$0xff]   ;;  %v4020_v45 = vld [vmem:[#allocation5] ss:$8 sps:$4 sm:$0xff]  }
 0x8b9   : > { %v4008_v36 = vld [vmem:[#allocation5 + $0x11] ss:$8 sps:$4 sm:$0xff]   ;;  %3054 = vst.msk [vmem:[#allocation6 + $0x8] sm:$0xff] %vm957_vm0, %v4004_v35  ;;  %2943 = vrot.lane.b32.xlu0 %v4007_v34, %s5179_s1  ;;  %2913 = vst.msk [vmem:[#allocation6] sm:$0xff] %vm957_vm0, %v4020_v45  ;;  %v3781_v34 = vld [vmem:[%s5196_s14] ss:$0 sm:$0xff] }
 0x8ba   : > { %v4005_v37 = vld [vmem:[#allocation5 + $0x22] ss:$8 sps:$4 sm:$0xff]   ;;  %2927 = vrot.lane.b32.xlu1 %v4008_v36, %s5177_s7  ;;  %v4010_v40 = vld [vmem:[#allocation5 + $0x12] ss:$8 sps:$4 sm:$0xff]   ;;  %v3782_v35 = vld [vmem:[%s5197_s19] ss:$0 sm:$0xff] }
 0x8bb   : > { %3055 = vst.msk [vmem:[#allocation6 + $0x18] sm:$0xff] %vm957_vm0, %v4005_v37  ;;  %v4012_v42 = vld [vmem:[#allocation5 + $0x18] ss:$8 sps:$4 sm:$0xff]   ;;  %v4013_v43 = vld [vmem:[#allocation5 + $0xa] ss:$8 sps:$4 sm:$0xff]   ;;  %s4066_s14 = scalar_lea.vmem %s4065_s8, 32 }
 0x8bc   : > { %v4022_v47 = vld [vmem:[#allocation5 + $0x10] ss:$8 sps:$4 sm:$0xff]   ;;  %v4018_v49 = vld [vmem:[#allocation5 + $0x20] ss:$8 sps:$4 sm:$0xff]  }
 0x8bd   : > { %2961 = vrot.lane.b32.xlu0 %v4009_v38, %s5174_s10  ;;  %v4014_v4 = vld [vmem:[#allocation5 + $0x19] ss:$8 sps:$4 sm:$0xff]   ;;  %2914 = vst.msk [vmem:[#allocation6 + $0x10] sm:$0xff] %vm957_vm0, %v4022_v47 }
 0x8be   : > { %2945 = vrot.lane.b32.xlu1 %v4010_v40, %s5179_s1  ;;  %v4015_v53 = vld [vmem:[#allocation5 + $0x10] ss:$8 sps:$4 sm:$0xff]   ;;  %v4019_v57 = vld [vmem:[#allocation5 + $0x21] ss:$8 sps:$4 sm:$0xff]  }
 0x8bf   : > { %v4016_v54 = vld [vmem:[#allocation5 + $0x1a] ss:$8 sps:$4 sm:$0xff]  }
 0x8c0   : > { %v3057_v44 = vld [vmem:[#allocation6 + $0x8] sm:$0xff]  ;;  %v4052_v47 = vld [vmem:[%s4313_s27 + $0x30] sm:$0xff]  }
 0x8c1   : > { %2979 = vrot.lane.b32.xlu0 %v4011_v41, %s5178_s9  ;;  %v4017_v55 = vld [vmem:[#allocation5 + $0x11] ss:$8 sps:$4 sm:$0xff]   ;;  %v4050_v41 = vld [vmem:[%s4313_s27 + $0x38] sm:$0xff]  }
 0x8c2   : > { %2963 = vrot.lane.b32.xlu1 %v4012_v42, %s5174_s10  ;;  %v3059_v52 = vld [vmem:[#allocation6 + $0x18] sm:$0xff] }
 0x8c3   : > { %v3061_v46 = vpack.c.bf16 %v3059_v52, %v3057_v44 }
 0x8c5   : > { %2997 = vrot.lane.b32.xlu0 %v4013_v43, %s5180_s13  ;;  %3775 = vmatprep.mubr.msk.bf16.mxu1 %vm957_vm0, %v3061_v46 }
 0x8c6   : > { %2981 = vrot.lane.b32.xlu1 %v4014_v4, %s5178_s9 }
 0x8c9   : > { %3016 = vrot.lane.b32.xlu0 %v4015_v53, %s5175_s18 }
 0x8ca   : > { %2999 = vrot.lane.b32.xlu1 %v4016_v54, %s5180_s13 }
 0x8cd   : > { %3034 = vrot.lane.b32.xlu0 %v4017_v55, %s5176_s5 }
 0x8ce   : > { %3018 = vrot.lane.b32.xlu1 %v4018_v49, %s5175_s18 }
 0x8d2   : > { %3036 = vrot.lane.b32.xlu1 %v4019_v57, %s5176_s5 }
 0x927   : > { %v2926_v60 = vpop.permute.xlu0 %2925 }
 0x928   : > { %2931 = vst.msk [vmem:[#allocation6] sm:$0xff] %vm1258_vm2, %v2926_v60 }
 0x92b   : > { %v2944_v61 = vpop.permute.xlu0 %2943 }
 0x92c   : > { %2949 = vst.msk [vmem:[#allocation6] sm:$0xff] %vm1307_vm3, %v2944_v61  ;;  %v2928_v62 = vpop.permute.xlu1 %2927 }
 0x92d   : > { %2932 = vst.msk [vmem:[#allocation6 + $0x10] sm:$0xff] %vm1258_vm2, %v2928_v62 }
 0x92f   : > { %v2962_v63 = vpop.permute.xlu0 %2961 }
 0x930   : > { %2967 = vst.msk [vmem:[#allocation6] sm:$0xff] %vm1356_vm4, %v2962_v63  ;;  %v2946_v0 = vpop.permute.xlu1 %2945 }
 0x931   : > { %2950 = vst.msk [vmem:[#allocation6 + $0x10] sm:$0xff] %vm1307_vm3, %v2946_v0  ;;  %v4054_v0 = vld [vmem:[%s4313_s27 + $0x20] sm:$0xff]  }
 0x933   : > { %v2980_v2 = vpop.permute.xlu0 %2979 }
 0x934   : > { %2985 = vst.msk [vmem:[#allocation6] sm:$0xff] %vm1405_vm5, %v2980_v2  ;;  %v2964_v3 = vpop.permute.xlu1 %2963 }
 0x935   : > { %2968 = vst.msk [vmem:[#allocation6 + $0x10] sm:$0xff] %vm1356_vm4, %v2964_v3 }
 0x937   : > { %v2998_v6 = vpop.permute.xlu0 %2997 }
 0x938   : > { %3003 = vst.msk [vmem:[#allocation6] sm:$0xff] %vm1454_vm6, %v2998_v6  ;;  %v2982_v7 = vpop.permute.xlu1 %2981 }
 0x939   : > { %2986 = vst.msk [vmem:[#allocation6 + $0x10] sm:$0xff] %vm1405_vm5, %v2982_v7  ;;  %v4055_v7 = vld [vmem:[%s4313_s27 + $0x18] sm:$0xff]  }
 0x93b   : > { %v3017_v8 = vpop.permute.xlu0 %3016 }
 0x93c   : > { %3022 = vst.msk [vmem:[#allocation6] sm:$0xff] %vm1504_vm7, %v3017_v8  ;;  %v3000_v9 = vpop.permute.xlu1 %2999 }
 0x93d   : > { %3004 = vst.msk [vmem:[#allocation6 + $0x10] sm:$0xff] %vm1454_vm6, %v3000_v9 }
 0x93f   : > { %v3035_v10 = vpop.permute.xlu0 %3034 }
 0x940   : > { %3040 = vst.msk [vmem:[#allocation6] sm:$0xff] %vm1553_vm8, %v3035_v10  ;;  %v3019_v11 = vpop.permute.xlu1 %3018  ;;  %v4056_v10 = vld [vmem:[%s4313_s27 + $0x10] sm:$0xff]  }
 0x941   : > { %3023 = vst.msk [vmem:[#allocation6 + $0x10] sm:$0xff] %vm1504_vm7, %v3019_v11 }
 0x944   : > { %v3037_v12 = vpop.permute.xlu1 %3036 }
 0x945   : > { %3041 = vst.msk [vmem:[#allocation6 + $0x10] sm:$0xff] %vm1553_vm8, %v3037_v12 }
 0x947   : > { %v3056_v13 = vld [vmem:[#allocation6] sm:$0xff] }
 0x94c   : > { %v3058_v14 = vld [vmem:[#allocation6 + $0x10] sm:$0xff] }
 0x94d   : > { %v3060_v15 = vpack.c.bf16 %v3058_v14, %v3056_v13  ;;  %v4057_v13 = vld [vmem:[%s4313_s27 + $0x8] sm:$0xff]  }
 0x94f   : > { %3152 = vmatmul.mubr.bf16.vlgmr.msra.gmra.mxu1 %v3060_v15  ;;  %v4058_v15 = vld [vmem:[%s4313_s27] sm:$0xff]  }
 0xa0f   : > { %v3153_v19 = vpop.f32.mrf.mxu1 }
 0xa10   : > { %3162 = vrot.lane.b32.xlu0 %v3153_v19, %s5177_s7 }
 0xa11   : > { %v3155_v20 = vpop.f32.mrf.mxu1 }
 0xa13   : > { %v3156_v21 = vpop.f32.mrf.mxu1 }
 0xa14   : > { %3164 = vrot.lane.b32.xlu1 %v3156_v21, %s5177_s7 }
 0xa15   : > { %v3158_v22 = vpop.f32.mrf.mxu1 }
 0xa82   : > { %v3163_v23 = vpop.permute.xlu0 %3162 }
 0xa83   : > { %3168 = vst.msk [vmem:[#allocation4] sm:$0xff] %vm1765_vm10, %v3163_v23 }
 0xa86   : > { %v3165_v24 = vpop.permute.xlu1 %3164 }
 0xa87   : > { %3169 = vst.msk [vmem:[#allocation4 + $0x8] sm:$0xff] %vm1765_vm10, %v3165_v24 }
 0xa8a   : > { %v3195_v25 = vld [vmem:[#allocation4] sm:$0xff] }
 0xa8b   : > { %v3203_v51 = vmul.f32 %v3776_v1, %v3195_v25 }
 0xa8d   : > { %v3211_v29 = vadd.f32 %v3777_v26, %v3203_v51 }
 0xa8e   : > { %v3196_v27 = vld [vmem:[#allocation4 + $0x8] sm:$0xff] }
 0xa8f   : > { %v3204_v28 = vmul.f32 %v3776_v1, %v3196_v27  ;;  %v3213_v31 = vmax.f32 %v3211_v29, 0.0 }
 0xa91   : > { %v3212_v30 = vadd.f32 %v3777_v26, %v3204_v28 }
 0xa93   : > { %v3214_v32 = vmax.f32 %v3212_v30, 0.0 }
 0xa95   : > { %v3215_v33 = vpack.c.bf16 %v3214_v32, %v3213_v31 }
 0xa97   : > { %3895 = vmatmul.mubr.msk.bf16.vlgmr.msra.gmra.mxu0 %vm1856_vm11, %v3215_v33 }
 0xa98   : > { %3518 = vmatpush1.bf16.msra.mxu0 %v4050_v41  ;;  %v3794_v41 = vld [vmem:[%s4323_s12] ss:$0 sm:$0xff] }
 0xa99   : > { %3519 = vmatprep.subr.bf16.mxu0 %v4161_v39 }
 0xa9c   : > { %3520 = vmatpush1.bf16.msra.mxu0 %v4052_v47 }
 0xa9d   : > { %3521 = vmatprep.subr.bf16.mxu0 %v4161_v39 }
 0xaa0   : > { %3522 = vmatpush1.bf16.msra.mxu0 %v4053_v5 }
 0xaa1   : > { %3523 = vmatprep.subr.bf16.mxu0 %v4161_v39 }
 0xaa4   : > { %3524 = vmatpush1.bf16.msra.mxu0 %v4054_v0 }
 0xaa5   : > { %3525 = vmatprep.subr.bf16.mxu0 %v4161_v39 }
 0xaa8   : > { %3526 = vmatpush1.bf16.msra.mxu0 %v4055_v7 }
 0xaa9   : > { %3527 = vmatprep.subr.bf16.mxu0 %v4161_v39 }
 0xaac   : > { %3528 = vmatpush1.bf16.msra.mxu0 %v4056_v10 }
 0xaad   : > { %3529 = vmatprep.subr.bf16.mxu0 %v4161_v39 }
 0xab0   : > { %3530 = vmatpush1.bf16.msra.mxu0 %v4057_v13 }
 0xab1   : > { %3531 = vmatprep.subr.bf16.mxu0 %v4161_v39 }
 0xab4   : > { %3532 = vmatpush1.bf16.msra.mxu0 %v4058_v15 }
 0xab5   : > { %3547 = vmatprep.subr.bf16.mxu0 %v4161_v39 }
 0xab8   : > { %3548 = vmatpush2.bf16.msra.mxu0 %v4059_v16 }
 0xb57   : > { %v3265_v36 = vpop.f32.mrf.mxu0 }
 0xb58   : > { %v3278_v37 = vmul.f32 %v3781_v34, %v3265_v36 }
 0xb59   : > { %v3896_v38 = vpop.f32.mrf.mxu0 }
 0xb5a   : > { %v3286_v40 = vadd.f32 %v3782_v35, %v3278_v37  ;;  %v3793_v37 = vld [vmem:[%s4318_s4] ss:$0 sm:$0xff] }
 0xb5b   : > { %v3268_v42 = vpop.f32.mrf.mxu0 }
 0xb5c   : > { %v3288_v43 = vmax.f32 %v3286_v40, 0.0  ;;  %v3279_v44 = vmul.f32 %v3781_v34, %v3268_v42 }
 0xb5d   : > { %v3897_v52 = vpop.f32.mrf.mxu0 }
 0xb5e   : > { %v3292_v45 = vcombine.high %v3288_v43, %v3288_v43  ;;  %3296 = vst.msk [vmem:[#allocation5 + $0x9] sm:$0xf] %vm2896_vm14, %v3288_v43  ;;  %v3287_v46 = vadd.f32 %v3782_v35, %v3279_v44 }
 0xb60   : > { %3297 = vst.msk [vmem:[#allocation5 + $0x11] sm:$0xf] %vm2896_vm14, %v3292_v45  ;;  %v3289_v50 = vmax.f32 %v3287_v46, 0.0 }
 0xb62   : > { %v3293_v4 = vcombine.high %v3289_v50, %v3289_v50  ;;  %3298 = vst.msk [vmem:[#allocation5 + $0x19] sm:$0xf] %vm2896_vm14, %v3289_v50 }
 0xb64   : > { %3299 = vst.msk [vmem:[#allocation5 + $0x21] sm:$0xf] %vm2896_vm14, %v3293_v4 }
 0xb65   : > { %v4033_v53 = vld [vmem:[#allocation5 + $0x1] ss:$8 sps:$4 sm:$0xff]  }
 0xb66   : > { %3324 = vrot.lane.b32.xlu0 %v4033_v53, %s5177_s7  ;;  %v4034_v54 = vld [vmem:[#allocation5 + $0x2] ss:$8 sps:$4 sm:$0xff]  }
 0xb67   : > { %v4036_v55 = vld [vmem:[#allocation5 + $0x8] ss:$8 sps:$4 sm:$0xff]  }
 0xb68   : > { %v4038_v58 = vld [vmem:[#allocation5 + $0x9] ss:$8 sps:$4 sm:$0xff]  }
 0xb69   : > { %v4035_v48 = vld [vmem:[#allocation5 + $0x11] ss:$8 sps:$4 sm:$0xff]   ;;  %v4049_v60 = vld [vmem:[#allocation5] ss:$8 sps:$4 sm:$0xff]  }
 0xb6a   : > { %3342 = vrot.lane.b32.xlu0 %v4034_v54, %s5179_s1  ;;  %3326 = vrot.lane.b32.xlu1 %v4035_v48, %s5177_s7  ;;  %v4037_v49 = vld [vmem:[#allocation5 + $0x12] ss:$8 sps:$4 sm:$0xff]   ;;  %3312 = vst.msk [vmem:[#allocation6] sm:$0xff] %vm957_vm0, %v4049_v60 }
 0xb6b   : > { %v4041_v56 = vld [vmem:[#allocation5 + $0x12] ss:$8 sps:$4 sm:$0xff]   ;;  %v4042_v57 = vld [vmem:[#allocation5 + $0x22] ss:$8 sps:$4 sm:$0xff]  }
 0xb6c   : > { %3452 = vst.msk [vmem:[#allocation6 + $0x8] sm:$0xff] %vm957_vm0, %v4041_v56  ;;  %3453 = vst.msk [vmem:[#allocation6 + $0x18] sm:$0xff] %vm957_vm0, %v4042_v57  ;;  %v4039_v59 = vld [vmem:[#allocation5 + $0x18] ss:$8 sps:$4 sm:$0xff]   ;;  %v4040_v62 = vld [vmem:[#allocation5 + $0xa] ss:$8 sps:$4 sm:$0xff]  }
 0xb6d   : > { %v4051_v61 = vld [vmem:[#allocation5 + $0x10] ss:$8 sps:$4 sm:$0xff]   ;;  %v4047_v12 = vld [vmem:[#allocation5 + $0x20] ss:$8 sps:$4 sm:$0xff]  }
 0xb6e   : > { %3360 = vrot.lane.b32.xlu0 %v4036_v55, %s5174_s10  ;;  %3344 = vrot.lane.b32.xlu1 %v4037_v49, %s5179_s1  ;;  %v4043_v63 = vld [vmem:[#allocation5 + $0x19] ss:$8 sps:$4 sm:$0xff]   ;;  %3313 = vst.msk [vmem:[#allocation6 + $0x10] sm:$0xff] %vm957_vm0, %v4051_v61 }
 0xb6f   : > { %v4044_v8 = vld [vmem:[#allocation5 + $0x10] ss:$8 sps:$4 sm:$0xff]   ;;  %v4048_v14 = vld [vmem:[#allocation5 + $0x21] ss:$8 sps:$4 sm:$0xff]  }
 0xb70   : > { %v4045_v9 = vld [vmem:[#allocation5 + $0x1a] ss:$8 sps:$4 sm:$0xff]  }
 0xb71   : > { %v4046_v11 = vld [vmem:[#allocation5 + $0x11] ss:$8 sps:$4 sm:$0xff]  }
 0xb72   : > { %3378 = vrot.lane.b32.xlu0 %v4038_v58, %s5178_s9  ;;  %3362 = vrot.lane.b32.xlu1 %v4039_v59, %s5174_s10 }
 0xb73   : > { %v3455_v2 = vld [vmem:[#allocation6 + $0x8] sm:$0xff]  ;;  %v3457_v3 = vld [vmem:[#allocation6 + $0x18] sm:$0xff] }
 0xb74   : > { %v3459_v6 = vpack.c.bf16 %v3457_v3, %v3455_v2 }
 0xb76   : > { %3396 = vrot.lane.b32.xlu0 %v4040_v62, %s5180_s13  ;;  %3380 = vrot.lane.b32.xlu1 %v4043_v63, %s5178_s9  ;;  %s949_s9 = sand.u32 1, %s4112_s23  }
 0xb77   : > { %3792 = vmatprep.mubr.msk.bf16.mxu0 %vm957_vm0, %v3459_v6  ;;  %s950_s19 = scalar_lea.vmem [#allocation7], %s949_s9  ;;  %vm3598_vm0 = vcmask 253952   ;;  %s3601_s1 = scalar_lea.sflag [#allocation8], %s949_s9 }
 0xb78   : > { %s3613_s10 = sshll.u32 %s950_s19, 4  ;;  %s3614_s10 = int_to_ptr.vmem [resolvable:$true] %s3613_s10 }
 0xb79   : > { %s4060_s7 = scalar_lea.vmem %s3614_s10, 16  ;;  %p4067_p0 = scmp.lt.s32.totalorder %s3614_s10, %s4065_s8 }
 0xb7a   : > { %3414 = vrot.lane.b32.xlu0 %v4044_v8, %s5175_s18  ;;  %3398 = vrot.lane.b32.xlu1 %v4045_v9, %s5180_s13  ;;  %s3795_s13 = sshll.u32 %s4351_s0, 4  ;;  %p4061_p11 = scmp.ne.s32.totalorder %s3614_s10, %s4060_s7 }
 0xb7b   : > { %p4068_p1 = scmp.lt.s32.totalorder %s4066_s14, %s4060_s7 }
 0xb7c   : > { %p4062_p12 = pnand %p4061_p11, %p4368_p5 }
 0xb7d   : > { %p4069_p2 = por %p4068_p1, %p4067_p0 }
 0xb7e   : > { %3432 = vrot.lane.b32.xlu0 %v4046_v11, %s5176_s5  ;;  %3416 = vrot.lane.b32.xlu1 %v4047_v12, %s5175_s18  ;;  %s3611_s18 = scalar_lea.hbm %s4328_s6, %s3795_s13  ;;  %p4063_p13 = pneg %p4062_p12 }
 0xb80   : > { %p4070_p3 = pnand %p4069_p2, %p4063_p13 }
 0xb82   : > { %3434 = vrot.lane.b32.xlu1 %v4048_v14, %s5176_s5  ;;  %s5198_s5 = smov 24  }
 0xbd8   : > { %v3325_v17 = vpop.permute.xlu0 %3324 }
 0xbd9   : > { %3330 = vst.msk [vmem:[#allocation6] sm:$0xff] %vm1258_vm2, %v3325_v17 }
 0xbdc   : > { %v3343_v18 = vpop.permute.xlu0 %3342  ;;  %v3327_v19 = vpop.permute.xlu1 %3326 }
 0xbdd   : > { %3348 = vst.msk [vmem:[#allocation6] sm:$0xff] %vm1307_vm3, %v3343_v18 }
 0xbde   : > { %3331 = vst.msk [vmem:[#allocation6 + $0x10] sm:$0xff] %vm1258_vm2, %v3327_v19 }
 0xbe0   : > { %v3361_v20 = vpop.permute.xlu0 %3360  ;;  %v3345_v21 = vpop.permute.xlu1 %3344 }
 0xbe1   : > { %3366 = vst.msk [vmem:[#allocation6] sm:$0xff] %vm1356_vm4, %v3361_v20 }
 0xbe2   : > { %3349 = vst.msk [vmem:[#allocation6 + $0x10] sm:$0xff] %vm1307_vm3, %v3345_v21 }
 0xbe4   : > { %v3379_v22 = vpop.permute.xlu0 %3378  ;;  %v3363_v23 = vpop.permute.xlu1 %3362 }
 0xbe5   : > { %3384 = vst.msk [vmem:[#allocation6] sm:$0xff] %vm1405_vm5, %v3379_v22 }
 0xbe6   : > { %3367 = vst.msk [vmem:[#allocation6 + $0x10] sm:$0xff] %vm1356_vm4, %v3363_v23 }
 0xbe8   : > { %v3397_v39 = vpop.permute.xlu0 %3396  ;;  %v3381_v24 = vpop.permute.xlu1 %3380 }
 0xbe9   : > { %3402 = vst.msk [vmem:[#allocation6] sm:$0xff] %vm1454_vm6, %v3397_v39 }
 0xbea   : > { %3385 = vst.msk [vmem:[#allocation6 + $0x10] sm:$0xff] %vm1405_vm5, %v3381_v24 }
 0xbec   : > { %v3415_v1 = vpop.permute.xlu0 %3414  ;;  %v3399_v25 = vpop.permute.xlu1 %3398 }
 0xbed   : > { %3420 = vst.msk [vmem:[#allocation6] sm:$0xff] %vm1504_vm7, %v3415_v1 }
 0xbee   : > { %3403 = vst.msk [vmem:[#allocation6 + $0x10] sm:$0xff] %vm1454_vm6, %v3399_v25 }
 0xbf0   : > { %v3433_v51 = vpop.permute.xlu0 %3432  ;;  %v3417_v26 = vpop.permute.xlu1 %3416 }
 0xbf1   : > { %3438 = vst.msk [vmem:[#allocation6] sm:$0xff] %vm1553_vm8, %v3433_v51 }
 0xbf2   : > { %3421 = vst.msk [vmem:[#allocation6 + $0x10] sm:$0xff] %vm1504_vm7, %v3417_v26 }
 0xbf4   : > { %v3435_v27 = vpop.permute.xlu1 %3434 }
 0xbf5   : > { %3439 = vst.msk [vmem:[#allocation6 + $0x10] sm:$0xff] %vm1553_vm8, %v3435_v27 }
 0xbf8   : > { %v3454_v28 = vld [vmem:[#allocation6] sm:$0xff] }
 0xbfc   : > { %v3456_v29 = vld [vmem:[#allocation6 + $0x10] sm:$0xff] }
 0xbfd   : > { %v3458_v30 = vpack.c.bf16 %v3456_v29, %v3454_v28 }
 0xbff   : > { %3550 = vmatmul.mubr.bf16.vlgmr.msra.gmra.mxu0 %v3458_v30 }
 0xcbf   : > { %v3551_v31 = vpop.f32.mrf.mxu0 }
 0xcc0   : > { %3560 = vrot.lane.b32.xlu0 %v3551_v31, %s5198_s5 }
 0xcc1   : > { %v3553_v32 = vpop.f32.mrf.mxu0 }
 0xcc3   : > { %v3554_v33 = vpop.f32.mrf.mxu0 }
 0xcc4   : > { %3562 = vrot.lane.b32.xlu1 %v3554_v33, %s5198_s5 }
 0xcc5   : > { %v3556_v34 = vpop.f32.mrf.mxu0 }
 0xd32   : > { %v3561_v35 = vpop.permute.xlu0 %3560 }
 0xd33   : > { %3566 = vst.msk [vmem:[#allocation4] sm:$0xff] %vm2537_vm12, %v3561_v35 }
 0xd36   : > { %v3563_v36 = vpop.permute.xlu1 %3562 }
 0xd37   : > { %3567 = vst.msk [vmem:[#allocation4 + $0x8] sm:$0xff] %vm2537_vm12, %v3563_v36 }
 0xd3a   : > { %v3570_v38 = vld [vmem:[#allocation4] sm:$0xff] }
 0xd3b   : > { %v3578_v40 = vmul.f32 %v3793_v37, %v3570_v38 }
 0xd3d   : > { %v3586_v44 = vadd.f32 %v3794_v41, %v3578_v40 }
 0xd3e   : > { %v3571_v42 = vld [vmem:[#allocation4 + $0x8] sm:$0xff] }
 0xd3f   : > { %v3579_v43 = vmul.f32 %v3793_v37, %v3571_v42  ;;  %v3588_v45 = vsel %vm2614_vm13, %v3586_v44, 0.0 }
 0xd41   : > { %v3587_v52 = vadd.f32 %v3794_v41, %v3579_v43 }
 0xd43   : > { %v3589_v46 = vsel %vm2614_vm13, %v3587_v52, 0.0 }
 0xd44   : > { %v3590_v47 = vadd.f32 %v3589_v46, %v3588_v45 }
 0xd46   : > { %v3591_v50 = vrot.slane %v3590_v47, 4 }
 0xd48   : > { %v3592_v4 = vadd.f32 %v3591_v50, %v3590_v47 }
 0xd4a   : > { %v3593_v5 = vrot.slane %v3592_v4, 2 }
 0xd4c   : > { %v3594_v53 = vadd.f32 %v3593_v5, %v3592_v4 }
 0xd4e   : > { %v3595_v54 = vrot.slane %v3594_v53, 1 }
 0xd50   : > { %v3596_v48 = vadd.f32 %v3595_v54, %v3594_v53 }
 0xd52   : > { %v3597_v55 = vmul.f32 0.0625, %v3596_v48 }
 0xd54   : > { %3599 = vst.msk [vmem:[%s950_s19] sm:$0x1] %vm3598_vm0, %v3597_v55 }
 0xd55   : > { %4073 = shalt.err (!%p4070_p3)
}
 0xd56   : > { %s4074_s0 = scalar_lea.hbm %s3611_s18, 16  ;;  %s4078_s5 = scalar_lea.hbm %s4328_s6, 32 }
 0xd57   : > { %p4075_p4 = scmp.ne.s32.totalorder %s3611_s18, %s4074_s0  ;;  %p4079_p9 = scmp.lt.s32.totalorder %s3611_s18, %s4328_s6 }
 0xd58   : > { %p4080_p10 = scmp.lt.s32.totalorder %s4078_s5, %s4074_s0 }
 0xd59   : > { %p4076_p7 = pnand %p4075_p4, %p4368_p5 }
 0xd5a   : > { %p4081_p11 = por %p4080_p10, %p4079_p9 }
 0xd5b   : > { %p4077_p8 = pneg %p4076_p7 }
 0xd5d   : > { %p4082_p12 = pnand %p4081_p11, %p4077_p8 }
 0xd5f   : > { %4085 = shalt.err (!%p4082_p12)
}
 0xd60   : > { %3899 = dma.vmem_to_hbm [thread:$0]  (%p4368_p5), %s3614_s10, 16, %s3611_s18, %s3601_s1  }
 0xd61 PF: > { %p3905_p13 = scmp.ge.s32.totalorder %s4120_s28, 2  ;;  %s3625_s9 = sand.u32 1, %s4108_s22  }
 0xd62   : > { %s3626_s13 = scalar_lea.sflag [#allocation8], %s3625_s9 }
 0xd63   : > { %p3902_p0 = pnand %p3905_p13, %p4372_p6 }
 0xd65   : > { %p3903_p1 = pneg %p3902_p0 }
 0xd67   : > { %4103 = dma.done.wait (%p3903_p1), %s3626_s13, 16  }
 0xd68   : > { %4105 = vsyncadd (%p3903_p1), %s3626_s13, 4294967280  ;;  %p73_p2 = scmp.ge.s32.totalorder %s4355_s2, 4   ;;  %s5199_s22 = smov %s4112_s23 }
 0xd69   : > { %s5200_s23 = smov %s4116_s26  ;;  %s5201_s26 = smov %s4366_s11 }
 0xd6a   : > { %s5202_s28 = smov %s4355_s2  ;;  %75 = sbr.rel (!%p73_p2) target bundleno = 61 (0x3d), region = 214 }
 0xd6f   :  { %3630 = vsyncpa [#allocation8], 1 }
 0xd70   :  { %3632 = vsyncpa [#allocation8 + $0x1], 1 }

</bundles_post_ra>
